<compile_context>
chip_gen: v5e
topology: v5e:2x2
jax: 0.10.0
libtpu: 0.0.40
codegen_flags: <defaults>
</compile_context>

<pallas_src>
import functools

import jax
import jax.numpy as jnp
from jax.experimental import pallas as pl
from jax.experimental.pallas import tpu as pltpu

LEAKY_SLOPE = 0.2
LATENT = 32
Z_PAD = 128                               # padded latent width (lane-dense)
ENC_DIMS = [256, 512, 512, 256, 128]
DEC_DIMS = [128, 256, 512, 256]           # final decoder layer maps -> seq_len
N_LOGICAL = 12                            # 5 enc + mean + logvar + 5 dec
NL = 11                                   # kernel layers (mean/logvar fused)


def _pad_to(n, m=128):
    return ((n + m - 1) // m) * m


# ----------------------------- Pallas kernel ------------------------------- #

def _vae_kernel(*refs, pad_dims):
    """Fused VAE forward with per-layer weight streaming.

    refs = [x, eps, w_hbm*NL, b*NL, xhat, mean, logvar, wbuf0, wbuf1, sem]
    """
    x_ref, eps_ref = refs[0], refs[1]
    w_hbm = refs[2:2 + NL]
    b_ref = refs[2 + NL:2 + 2 * NL]
    xhat_ref, mean_ref, logvar_ref = refs[2 + 2 * NL:5 + 2 * NL]
    wbuf0, wbuf1, sem = refs[5 + 2 * NL:8 + 2 * NL]
    wbufs = (wbuf0, wbuf1)

    def start_fetch(layer):
        ip, op = pad_dims[layer]
        cp = pltpu.make_async_copy(
            w_hbm[layer], wbufs[layer % 2].at[:ip, :op], sem.at[layer % 2])
        cp.start()
        return cp

    copies = [None] * NL
    copies[0] = start_fetch(0)             # prime the pipeline

    def lin(h, layer, act):
        # Prefetch the NEXT layer's weights so its HBM DMA overlaps this
        # layer's MXU matmul (the other slot's previous contents were already
        # consumed by layer-1's matmul, so the overwrite is safe).
        if layer + 1 < NL:
            copies[layer + 1] = start_fetch(layer + 1)
        copies[layer].wait()
        ip, op = pad_dims[layer]
        w = wbufs[layer % 2][:ip, :op]                       # bf16 weights
        y = jnp.dot(h.astype(jnp.bfloat16), w,
                    preferred_element_type=jnp.float32)      # f32 accumulate
        y = y + b_ref[layer][...]                            # f32 epilogue
        if act:
            y = jnp.where(y > 0, y, LEAKY_SLOPE * y)         # LeakyReLU(0.2)
        return y

    # Encoder: 5 x (Linear + LeakyReLU(0.2))
    h = x_ref[...]
    for i in range(5):
        h = lin(h, i, True)

    # Fused mean|logvar head: one lane-dense 256-wide MXU pass, then slice.
    ml = lin(h, 5, False)
    mean = ml[:, :Z_PAD]
    logvar = ml[:, Z_PAD:2 * Z_PAD]
    mean_ref[...] = mean
    logvar_ref[...] = logvar

    # Reparameterization exactly as in the PyTorch forward: z = mean + log_var * eps
    z = mean + logvar * eps_ref[...]

    # Decoder: 4 x (Linear + LeakyReLU) + final Linear (no activation)
    for i in range(5):
        z = lin(z, 6 + i, i < 4)
    xhat_ref[...] = z


# ------------------------------ call wrapper ------------------------------- #

def vae_forward(kernel_params, x, eps, *, bm=None):
    """kernel_params = (weights_bf16[NL], biases_f32[NL], pad_dims[NL])."""
    weights, biases, pad_dims = kernel_params
    B, S = x.shape
    S_pad = _pad_to(S)
    assert pad_dims[0][0] == S_pad, "params were packed for a different seq_len"

    # bm: multiple of 16 (bf16 sublane packing); small batches => single grid
    # step so weights are streamed exactly once (and megacore can't duplicate
    # weight HBM traffic on v7x).
    if bm is None:
        bm = min(_pad_to(B, 16), 512)
    B_pad = _pad_to(B, bm)

    x_p = jnp.zeros((B_pad, S_pad), jnp.float32).at[:B, :S].set(x)
    eps_p = jnp.zeros((B_pad, Z_PAD), jnp.float32).at[:B, :LATENT].set(eps)

    in_specs = [
        pl.BlockSpec((bm, S_pad), lambda i: (i, 0)),       # x
        pl.BlockSpec((bm, Z_PAD), lambda i: (i, 0)),       # eps
    ]
    # Weights stay in HBM; the kernel streams them per layer (overlapped DMA).
    in_specs += [pl.BlockSpec(memory_space=pl.ANY)] * NL
    # Biases are tiny -> keep them as resident VMEM inputs (constant index).
    in_specs += [pl.BlockSpec(b.shape, lambda i: (0, 0)) for b in biases]

    out_specs = (
        pl.BlockSpec((bm, S_pad), lambda i: (i, 0)),       # x_hat
        pl.BlockSpec((bm, Z_PAD), lambda i: (i, 0)),       # mean
        pl.BlockSpec((bm, Z_PAD), lambda i: (i, 0)),       # logvar
    )
    out_shape = (
        jax.ShapeDtypeStruct((B_pad, S_pad), jnp.float32),
        jax.ShapeDtypeStruct((B_pad, Z_PAD), jnp.float32),
        jax.ShapeDtypeStruct((B_pad, Z_PAD), jnp.float32),
    )

    max_i = max(ip for ip, _ in pad_dims)
    max_o = max(op for _, op in pad_dims)

    kernel = functools.partial(_vae_kernel, pad_dims=tuple(pad_dims))
    xhat_p, mean_p, logvar_p = pl.pallas_call(
        kernel,
        out_shape=out_shape,
        grid=(B_pad // bm,),
        in_specs=in_specs,
        out_specs=out_specs,
        scratch_shapes=[
            pltpu.VMEM((max_i, max_o), jnp.bfloat16),      # weight slot 0
            pltpu.VMEM((max_i, max_o), jnp.bfloat16),      # weight slot 1
            pltpu.SemaphoreType.DMA((2,)),
        ],
        compiler_params=pltpu.CompilerParams(
            dimension_semantics=("parallel",),
            vmem_limit_bytes=32 * 1024 * 1024,             # plenty; spill headroom on v7x
        ),
    )(x_p, eps_p, *weights, *biases)

    return xhat_p[:B, :S], mean_p[:B, :LATENT], logvar_p[:B, :LATENT]


# --------------------------- parameter construction ------------------------ #

def _init_linear(key, in_dim, out_dim):
    """nn.Linear default init: U(-1/sqrt(in), 1/sqrt(in)) for W and b."""
    k_w, k_b = jax.random.split(key)
    bound = 1.0 / jnp.sqrt(jnp.float32(in_dim))
    w = jax.random.uniform(k_w, (in_dim, out_dim), jnp.float32, -bound, bound)
    b = jax.random.uniform(k_b, (out_dim,), jnp.float32, -bound, bound)
    return w, b


def init_vae_params(key, seq_len):
    dims = ([(seq_len, ENC_DIMS[0])] +
            list(zip(ENC_DIMS[:-1], ENC_DIMS[1:])) +            # encoder
            [(ENC_DIMS[-1], LATENT), (ENC_DIMS[-1], LATENT)] +  # mean, logvar
            [(LATENT, DEC_DIMS[0])] +
            list(zip(DEC_DIMS[:-1], DEC_DIMS[1:])) +
            [(DEC_DIMS[-1], seq_len)])                          # decoder
    assert len(dims) == N_LOGICAL
    keys = jax.random.split(key, N_LOGICAL)
    return [_init_linear(k, i, o) for k, (i, o) in zip(keys, dims)]


def pack_params(params):
    """12 logical f32 (w, b) pairs -> (bf16 padded weights, f32 padded biases,
    pad_dims), with mean/logvar heads fused into one 256-wide layer."""
    def pad_wb(w, b):
        i, o = w.shape
        ip, op = _pad_to(i), _pad_to(o)
        w_p = jnp.zeros((ip, op), jnp.float32).at[:i, :o].set(w)
        b_p = jnp.zeros((1, op), jnp.float32).at[0, :o].set(b)
        return w_p, b_p

    ordered = [pad_wb(*params[i]) for i in range(5)]            # encoder

    # Fused head: cols [0:Z_PAD) hold mean, cols [Z_PAD:2*Z_PAD) hold logvar.
    (w_m, b_m), (w_v, b_v) = params[5], params[6]
    hin = w_m.shape[0]
    hin_p = _pad_to(hin)
    wf = (jnp.zeros((hin_p, 2 * Z_PAD), jnp.float32)
          .at[:hin, :LATENT].set(w_m)
          .at[:hin, Z_PAD:Z_PAD + LATENT].set(w_v))
    bf = (jnp.zeros((1, 2 * Z_PAD), jnp.float32)
          .at[0, :LATENT].set(b_m)
          .at[0, Z_PAD:Z_PAD + LATENT].set(b_v))
    ordered.append((wf, bf))

    ordered += [pad_wb(*params[i]) for i in range(7, 12)]       # decoder

    weights = [w.astype(jnp.bfloat16) for w, _ in ordered]      # HBM bytes halved
    biases = [b for _, b in ordered]
    pad_dims = [tuple(w.shape) for w in weights]
    assert len(weights) == NL
    return weights, biases, pad_dims


# ------------------------------ pure-JAX reference -------------------------- #

def _ref_forward(params, x, eps):
    """Reference with the same bf16 weight/activation quantization as the
    kernel (bf16 matmul inputs, f32 accumulation, f32 bias + LeakyReLU)."""
    def lin(p, h, act):
        w = p[0].astype(jnp.bfloat16)
        y = jnp.dot(h.astype(jnp.bfloat16), w,
                    preferred_element_type=jnp.float32) + p[1]
        return jnp.where(y > 0, y, LEAKY_SLOPE * y) if act else y

    h = x
    for i in range(5):
        h = lin(params[i], h, True)
    mean = lin(params[5], h, False)
    logvar = lin(params[6], h, False)
    z = mean + logvar * eps
    for i in range(5):
        z = lin(params[7 + i], z, i < 4)
    return z, mean, logvar


# ---------------------------------- main ------------------------------------ #

if __name__ == "__main__":
    key = jax.random.PRNGKey(0)
    k_param, k_x, k_eps = jax.random.split(key, 3)

    B, SEQ_LEN = 8, 300

    params = init_vae_params(k_param, SEQ_LEN)
    kernel_params = pack_params(params)

    x = jax.random.normal(k_x, (B, SEQ_LEN), jnp.float32)
    eps = jax.random.normal(k_eps, (B, LATENT), jnp.float32)

    x_hat, mean, logvar = jax.block_until_ready(vae_forward(kernel_params, x, eps))
    r_xhat, r_mean, r_logvar = jax.block_until_ready(_ref_forward(params, x, eps))

    assert x_hat.shape == (B, SEQ_LEN), x_hat.shape
    assert mean.shape == (B, LATENT) and logvar.shape == (B, LATENT)
    for got, ref in ((x_hat, r_xhat), (mean, r_mean), (logvar, r_logvar)):
        err = float(jnp.max(jnp.abs(got - ref)))
        assert jnp.allclose(got, ref, atol=2e-2, rtol=2e-2), err
    print("KERNEL_OK")
</pallas_src>

<mosaic_0001>
module attributes {stable_mosaic.version = 11 : i64} {
  func.func @_vae_kernel(%arg0: i32, %arg1: memref<16x384xf32, #tpu.memory_space<vmem>>, %arg2: memref<16x128xf32, #tpu.memory_space<vmem>>, %arg3: memref<384x256xbf16, #tpu.memory_space<any>>, %arg4: memref<256x512xbf16, #tpu.memory_space<any>>, %arg5: memref<512x512xbf16, #tpu.memory_space<any>>, %arg6: memref<512x256xbf16, #tpu.memory_space<any>>, %arg7: memref<256x128xbf16, #tpu.memory_space<any>>, %arg8: memref<128x256xbf16, #tpu.memory_space<any>>, %arg9: memref<128x128xbf16, #tpu.memory_space<any>>, %arg10: memref<128x256xbf16, #tpu.memory_space<any>>, %arg11: memref<256x512xbf16, #tpu.memory_space<any>>, %arg12: memref<512x256xbf16, #tpu.memory_space<any>>, %arg13: memref<256x384xbf16, #tpu.memory_space<any>>, %arg14: memref<1x256xf32, #tpu.memory_space<vmem>>, %arg15: memref<1x512xf32, #tpu.memory_space<vmem>>, %arg16: memref<1x512xf32, #tpu.memory_space<vmem>>, %arg17: memref<1x256xf32, #tpu.memory_space<vmem>>, %arg18: memref<1x128xf32, #tpu.memory_space<vmem>>, %arg19: memref<1x256xf32, #tpu.memory_space<vmem>>, %arg20: memref<1x128xf32, #tpu.memory_space<vmem>>, %arg21: memref<1x256xf32, #tpu.memory_space<vmem>>, %arg22: memref<1x512xf32, #tpu.memory_space<vmem>>, %arg23: memref<1x256xf32, #tpu.memory_space<vmem>>, %arg24: memref<1x384xf32, #tpu.memory_space<vmem>>, %arg25: memref<16x384xf32, #tpu.memory_space<vmem>>, %arg26: memref<16x128xf32, #tpu.memory_space<vmem>>, %arg27: memref<16x128xf32, #tpu.memory_space<vmem>>, %arg28: memref<512x512xbf16, #tpu.memory_space<vmem>>, %arg29: memref<512x512xbf16, #tpu.memory_space<vmem>>, %arg30: memref<2x!tpu.dma_semaphore, #tpu.memory_space<semaphore_mem>>) attributes {dimension_semantics = [#tpu.dimension_semantics<parallel>], iteration_bounds = array<i64: 1>, scalar_prefetch = 0 : i64, scratch_operands = 3 : i64, tpu.core_type = #tpu.core_type<tc>, window_params = [{transform_indices = @transform_0, window_bounds = array<i64: 16, 384>}, {transform_indices = @transform_1, window_bounds = array<i64: 16, 128>}, {}, {}, {}, {}, {}, {}, {}, {}, {}, {}, {}, {pipeline_mode = #tpu.pipeline_mode<synchronous>, transform_indices = @transform_13, window_bounds = array<i64: 1, 256>}, {pipeline_mode = #tpu.pipeline_mode<synchronous>, transform_indices = @transform_14, window_bounds = array<i64: 1, 512>}, {pipeline_mode = #tpu.pipeline_mode<synchronous>, transform_indices = @transform_15, window_bounds = array<i64: 1, 512>}, {pipeline_mode = #tpu.pipeline_mode<synchronous>, transform_indices = @transform_16, window_bounds = array<i64: 1, 256>}, {pipeline_mode = #tpu.pipeline_mode<synchronous>, transform_indices = @transform_17, window_bounds = array<i64: 1, 128>}, {pipeline_mode = #tpu.pipeline_mode<synchronous>, transform_indices = @transform_18, window_bounds = array<i64: 1, 256>}, {pipeline_mode = #tpu.pipeline_mode<synchronous>, transform_indices = @transform_19, window_bounds = array<i64: 1, 128>}, {pipeline_mode = #tpu.pipeline_mode<synchronous>, transform_indices = @transform_20, window_bounds = array<i64: 1, 256>}, {pipeline_mode = #tpu.pipeline_mode<synchronous>, transform_indices = @transform_21, window_bounds = array<i64: 1, 512>}, {pipeline_mode = #tpu.pipeline_mode<synchronous>, transform_indices = @transform_22, window_bounds = array<i64: 1, 256>}, {pipeline_mode = #tpu.pipeline_mode<synchronous>, transform_indices = @transform_23, window_bounds = array<i64: 1, 384>}, {transform_indices = @transform_24, window_bounds = array<i64: 16, 384>}, {transform_indices = @transform_25, window_bounds = array<i64: 16, 128>}, {transform_indices = @transform_26, window_bounds = array<i64: 16, 128>}]} {
    %c0_i32 = arith.constant 0 : i32
    %c0_i32_0 = arith.constant 0 : i32
    %c0_i32_1 = arith.constant 0 : i32
    %0 = tpu.memref_slice %arg28[%c0_i32_0, %c0_i32_1] : memref<512x512xbf16, #tpu.memory_space<vmem>> -> memref<384x256xbf16, #tpu.memory_space<vmem>>
    %1 = tpu.memref_slice %arg30[%c0_i32] : memref<2x!tpu.dma_semaphore, #tpu.memory_space<semaphore_mem>> -> memref<1x!tpu.dma_semaphore, #tpu.memory_space<semaphore_mem>>
    %2 = tpu.memref_squeeze %1 : memref<1x!tpu.dma_semaphore, #tpu.memory_space<semaphore_mem>> -> memref<!tpu.dma_semaphore, #tpu.memory_space<semaphore_mem>>
    tpu.enqueue_dma source(%arg3 : memref<384x256xbf16, #tpu.memory_space<any>>) target(%0 : memref<384x256xbf16, #tpu.memory_space<vmem>>) target_semaphore(%2 : memref<!tpu.dma_semaphore, #tpu.memory_space<semaphore_mem>>)
    %c0 = arith.constant 0 : index
    %c0_2 = arith.constant 0 : index
    %3 = vector.load %arg1[%c0, %c0_2] : memref<16x384xf32, #tpu.memory_space<vmem>>, vector<16x384xf32>
    %c1_i32 = arith.constant 1 : i32
    %c0_i32_3 = arith.constant 0 : i32
    %c0_i32_4 = arith.constant 0 : i32
    %4 = tpu.memref_slice %arg29[%c0_i32_3, %c0_i32_4] : memref<512x512xbf16, #tpu.memory_space<vmem>> -> memref<256x512xbf16, #tpu.memory_space<vmem>>
    %5 = tpu.memref_slice %arg30[%c1_i32] : memref<2x!tpu.dma_semaphore, #tpu.memory_space<semaphore_mem>> -> memref<1x!tpu.dma_semaphore, #tpu.memory_space<semaphore_mem>>
    %6 = tpu.memref_squeeze %5 : memref<1x!tpu.dma_semaphore, #tpu.memory_space<semaphore_mem>> -> memref<!tpu.dma_semaphore, #tpu.memory_space<semaphore_mem>>
    tpu.enqueue_dma source(%arg4 : memref<256x512xbf16, #tpu.memory_space<any>>) target(%4 : memref<256x512xbf16, #tpu.memory_space<vmem>>) target_semaphore(%6 : memref<!tpu.dma_semaphore, #tpu.memory_space<semaphore_mem>>)
    %c0_i32_5 = arith.constant 0 : i32
    %c0_i32_6 = arith.constant 0 : i32
    %c0_i32_7 = arith.constant 0 : i32
    %7 = tpu.memref_slice %arg28[%c0_i32_6, %c0_i32_7] : memref<512x512xbf16, #tpu.memory_space<vmem>> -> memref<384x256xbf16, #tpu.memory_space<vmem>>
    %8 = tpu.memref_slice %arg30[%c0_i32_5] : memref<2x!tpu.dma_semaphore, #tpu.memory_space<semaphore_mem>> -> memref<1x!tpu.dma_semaphore, #tpu.memory_space<semaphore_mem>>
    %9 = tpu.memref_squeeze %8 : memref<1x!tpu.dma_semaphore, #tpu.memory_space<semaphore_mem>> -> memref<!tpu.dma_semaphore, #tpu.memory_space<semaphore_mem>>
    tpu.wait_dma2 semaphore(%9 : memref<!tpu.dma_semaphore, #tpu.memory_space<semaphore_mem>>) src(%arg3 : memref<384x256xbf16, #tpu.memory_space<any>>) dst(%7 : memref<384x256xbf16, #tpu.memory_space<vmem>>)
    %c0_8 = arith.constant 0 : index
    %c0_9 = arith.constant 0 : index
    %10 = vector.load %arg28[%c0_8, %c0_9] : memref<512x512xbf16, #tpu.memory_space<vmem>>, vector<384x256xbf16>
    %11 = arith.truncf %3 : vector<16x384xf32> to vector<16x384xbf16>
    %cst = arith.constant dense<0.000000e+00> : vector<16x256xf32>
    %12 = tpu.matmul %11, %10, %cst {dimension_numbers = #tpu.dot_dimension_numbers<[1], [0], [0], [1], [0, 0, 1, 1], [], []>} : vector<16x384xbf16>, vector<384x256xbf16>, vector<16x256xf32> -> vector<16x256xf32>
    %c0_10 = arith.constant 0 : index
    %c0_11 = arith.constant 0 : index
    %13 = vector.load %arg14[%c0_10, %c0_11] : memref<1x256xf32, #tpu.memory_space<vmem>>, vector<1x256xf32>
    %14 = vector.broadcast %13 : vector<1x256xf32> to vector<16x256xf32>
    %15 = arith.addf %12, %14 : vector<16x256xf32>
    %cst_12 = arith.constant 0.000000e+00 : f32
    %16 = vector.broadcast %cst_12 : f32 to vector<16x256xf32>
    %17 = arith.cmpf ogt, %15, %16 : vector<16x256xf32>
    %cst_13 = arith.constant 2.000000e-01 : f32
    %18 = vector.broadcast %cst_13 : f32 to vector<16x256xf32>
    %19 = arith.mulf %18, %15 : vector<16x256xf32>
    %20 = arith.select %17, %15, %19 : vector<16x256xi1>, vector<16x256xf32>
    %c0_i32_14 = arith.constant 0 : i32
    %c0_i32_15 = arith.constant 0 : i32
    %c0_i32_16 = arith.constant 0 : i32
    %21 = tpu.memref_slice %arg28[%c0_i32_15, %c0_i32_16] : memref<512x512xbf16, #tpu.memory_space<vmem>> -> memref<512x512xbf16, #tpu.memory_space<vmem>>
    %22 = tpu.memref_slice %arg30[%c0_i32_14] : memref<2x!tpu.dma_semaphore, #tpu.memory_space<semaphore_mem>> -> memref<1x!tpu.dma_semaphore, #tpu.memory_space<semaphore_mem>>
    %23 = tpu.memref_squeeze %22 : memref<1x!tpu.dma_semaphore, #tpu.memory_space<semaphore_mem>> -> memref<!tpu.dma_semaphore, #tpu.memory_space<semaphore_mem>>
    tpu.enqueue_dma source(%arg5 : memref<512x512xbf16, #tpu.memory_space<any>>) target(%21 : memref<512x512xbf16, #tpu.memory_space<vmem>>) target_semaphore(%23 : memref<!tpu.dma_semaphore, #tpu.memory_space<semaphore_mem>>)
    %c1_i32_17 = arith.constant 1 : i32
    %c0_i32_18 = arith.constant 0 : i32
    %c0_i32_19 = arith.constant 0 : i32
    %24 = tpu.memref_slice %arg29[%c0_i32_18, %c0_i32_19] : memref<512x512xbf16, #tpu.memory_space<vmem>> -> memref<256x512xbf16, #tpu.memory_space<vmem>>
    %25 = tpu.memref_slice %arg30[%c1_i32_17] : memref<2x!tpu.dma_semaphore, #tpu.memory_space<semaphore_mem>> -> memref<1x!tpu.dma_semaphore, #tpu.memory_space<semaphore_mem>>
    %26 = tpu.memref_squeeze %25 : memref<1x!tpu.dma_semaphore, #tpu.memory_space<semaphore_mem>> -> memref<!tpu.dma_semaphore, #tpu.memory_space<semaphore_mem>>
    tpu.wait_dma2 semaphore(%26 : memref<!tpu.dma_semaphore, #tpu.memory_space<semaphore_mem>>) src(%arg4 : memref<256x512xbf16, #tpu.memory_space<any>>) dst(%24 : memref<256x512xbf16, #tpu.memory_space<vmem>>)
    %c0_20 = arith.constant 0 : index
    %c0_21 = arith.constant 0 : index
    %27 = vector.load %arg29[%c0_20, %c0_21] : memref<512x512xbf16, #tpu.memory_space<vmem>>, vector<256x512xbf16>
    %28 = arith.truncf %20 : vector<16x256xf32> to vector<16x256xbf16>
    %cst_22 = arith.constant dense<0.000000e+00> : vector<16x512xf32>
    %29 = tpu.matmul %28, %27, %cst_22 {dimension_numbers = #tpu.dot_dimension_numbers<[1], [0], [0], [1], [0, 0, 1, 1], [], []>} : vector<16x256xbf16>, vector<256x512xbf16>, vector<16x512xf32> -> vector<16x512xf32>
    %c0_23 = arith.constant 0 : index
    %c0_24 = arith.constant 0 : index
    %30 = vector.load %arg15[%c0_23, %c0_24] : memref<1x512xf32, #tpu.memory_space<vmem>>, vector<1x512xf32>
    %31 = vector.broadcast %30 : vector<1x512xf32> to vector<16x512xf32>
    %32 = arith.addf %29, %31 : vector<16x512xf32>
    %cst_25 = arith.constant 0.000000e+00 : f32
    %33 = vector.broadcast %cst_25 : f32 to vector<16x512xf32>
    %34 = arith.cmpf ogt, %32, %33 : vector<16x512xf32>
    %cst_26 = arith.constant 2.000000e-01 : f32
    %35 = vector.broadcast %cst_26 : f32 to vector<16x512xf32>
    %36 = arith.mulf %35, %32 : vector<16x512xf32>
    %37 = arith.select %34, %32, %36 : vector<16x512xi1>, vector<16x512xf32>
    %c1_i32_27 = arith.constant 1 : i32
    %c0_i32_28 = arith.constant 0 : i32
    %c0_i32_29 = arith.constant 0 : i32
    %38 = tpu.memref_slice %arg29[%c0_i32_28, %c0_i32_29] : memref<512x512xbf16, #tpu.memory_space<vmem>> -> memref<512x256xbf16, #tpu.memory_space<vmem>>
    %39 = tpu.memref_slice %arg30[%c1_i32_27] : memref<2x!tpu.dma_semaphore, #tpu.memory_space<semaphore_mem>> -> memref<1x!tpu.dma_semaphore, #tpu.memory_space<semaphore_mem>>
    %40 = tpu.memref_squeeze %39 : memref<1x!tpu.dma_semaphore, #tpu.memory_space<semaphore_mem>> -> memref<!tpu.dma_semaphore, #tpu.memory_space<semaphore_mem>>
    tpu.enqueue_dma source(%arg6 : memref<512x256xbf16, #tpu.memory_space<any>>) target(%38 : memref<512x256xbf16, #tpu.memory_space<vmem>>) target_semaphore(%40 : memref<!tpu.dma_semaphore, #tpu.memory_space<semaphore_mem>>)
    %c0_i32_30 = arith.constant 0 : i32
    %c0_i32_31 = arith.constant 0 : i32
    %c0_i32_32 = arith.constant 0 : i32
    %41 = tpu.memref_slice %arg28[%c0_i32_31, %c0_i32_32] : memref<512x512xbf16, #tpu.memory_space<vmem>> -> memref<512x512xbf16, #tpu.memory_space<vmem>>
    %42 = tpu.memref_slice %arg30[%c0_i32_30] : memref<2x!tpu.dma_semaphore, #tpu.memory_space<semaphore_mem>> -> memref<1x!tpu.dma_semaphore, #tpu.memory_space<semaphore_mem>>
    %43 = tpu.memref_squeeze %42 : memref<1x!tpu.dma_semaphore, #tpu.memory_space<semaphore_mem>> -> memref<!tpu.dma_semaphore, #tpu.memory_space<semaphore_mem>>
    tpu.wait_dma2 semaphore(%43 : memref<!tpu.dma_semaphore, #tpu.memory_space<semaphore_mem>>) src(%arg5 : memref<512x512xbf16, #tpu.memory_space<any>>) dst(%41 : memref<512x512xbf16, #tpu.memory_space<vmem>>)
    %c0_33 = arith.constant 0 : index
    %c0_34 = arith.constant 0 : index
    %44 = vector.load %arg28[%c0_33, %c0_34] : memref<512x512xbf16, #tpu.memory_space<vmem>>, vector<512x512xbf16>
    %45 = arith.truncf %37 : vector<16x512xf32> to vector<16x512xbf16>
    %cst_35 = arith.constant dense<0.000000e+00> : vector<16x512xf32>
    %46 = tpu.matmul %45, %44, %cst_35 {dimension_numbers = #tpu.dot_dimension_numbers<[1], [0], [0], [1], [0, 0, 1, 1], [], []>} : vector<16x512xbf16>, vector<512x512xbf16>, vector<16x512xf32> -> vector<16x512xf32>
    %c0_36 = arith.constant 0 : index
    %c0_37 = arith.constant 0 : index
    %47 = vector.load %arg16[%c0_36, %c0_37] : memref<1x512xf32, #tpu.memory_space<vmem>>, vector<1x512xf32>
    %48 = vector.broadcast %47 : vector<1x512xf32> to vector<16x512xf32>
    %49 = arith.addf %46, %48 : vector<16x512xf32>
    %cst_38 = arith.constant 0.000000e+00 : f32
    %50 = vector.broadcast %cst_38 : f32 to vector<16x512xf32>
    %51 = arith.cmpf ogt, %49, %50 : vector<16x512xf32>
    %cst_39 = arith.constant 2.000000e-01 : f32
    %52 = vector.broadcast %cst_39 : f32 to vector<16x512xf32>
    %53 = arith.mulf %52, %49 : vector<16x512xf32>
    %54 = arith.select %51, %49, %53 : vector<16x512xi1>, vector<16x512xf32>
    %c0_i32_40 = arith.constant 0 : i32
    %c0_i32_41 = arith.constant 0 : i32
    %c0_i32_42 = arith.constant 0 : i32
    %55 = tpu.memref_slice %arg28[%c0_i32_41, %c0_i32_42] : memref<512x512xbf16, #tpu.memory_space<vmem>> -> memref<256x128xbf16, #tpu.memory_space<vmem>>
    %56 = tpu.memref_slice %arg30[%c0_i32_40] : memref<2x!tpu.dma_semaphore, #tpu.memory_space<semaphore_mem>> -> memref<1x!tpu.dma_semaphore, #tpu.memory_space<semaphore_mem>>
    %57 = tpu.memref_squeeze %56 : memref<1x!tpu.dma_semaphore, #tpu.memory_space<semaphore_mem>> -> memref<!tpu.dma_semaphore, #tpu.memory_space<semaphore_mem>>
    tpu.enqueue_dma source(%arg7 : memref<256x128xbf16, #tpu.memory_space<any>>) target(%55 : memref<256x128xbf16, #tpu.memory_space<vmem>>) target_semaphore(%57 : memref<!tpu.dma_semaphore, #tpu.memory_space<semaphore_mem>>)
    %c1_i32_43 = arith.constant 1 : i32
    %c0_i32_44 = arith.constant 0 : i32
    %c0_i32_45 = arith.constant 0 : i32
    %58 = tpu.memref_slice %arg29[%c0_i32_44, %c0_i32_45] : memref<512x512xbf16, #tpu.memory_space<vmem>> -> memref<512x256xbf16, #tpu.memory_space<vmem>>
    %59 = tpu.memref_slice %arg30[%c1_i32_43] : memref<2x!tpu.dma_semaphore, #tpu.memory_space<semaphore_mem>> -> memref<1x!tpu.dma_semaphore, #tpu.memory_space<semaphore_mem>>
    %60 = tpu.memref_squeeze %59 : memref<1x!tpu.dma_semaphore, #tpu.memory_space<semaphore_mem>> -> memref<!tpu.dma_semaphore, #tpu.memory_space<semaphore_mem>>
    tpu.wait_dma2 semaphore(%60 : memref<!tpu.dma_semaphore, #tpu.memory_space<semaphore_mem>>) src(%arg6 : memref<512x256xbf16, #tpu.memory_space<any>>) dst(%58 : memref<512x256xbf16, #tpu.memory_space<vmem>>)
    %c0_46 = arith.constant 0 : index
    %c0_47 = arith.constant 0 : index
    %61 = vector.load %arg29[%c0_46, %c0_47] : memref<512x512xbf16, #tpu.memory_space<vmem>>, vector<512x256xbf16>
    %62 = arith.truncf %54 : vector<16x512xf32> to vector<16x512xbf16>
    %cst_48 = arith.constant dense<0.000000e+00> : vector<16x256xf32>
    %63 = tpu.matmul %62, %61, %cst_48 {dimension_numbers = #tpu.dot_dimension_numbers<[1], [0], [0], [1], [0, 0, 1, 1], [], []>} : vector<16x512xbf16>, vector<512x256xbf16>, vector<16x256xf32> -> vector<16x256xf32>
    %c0_49 = arith.constant 0 : index
    %c0_50 = arith.constant 0 : index
    %64 = vector.load %arg17[%c0_49, %c0_50] : memref<1x256xf32, #tpu.memory_space<vmem>>, vector<1x256xf32>
    %65 = vector.broadcast %64 : vector<1x256xf32> to vector<16x256xf32>
    %66 = arith.addf %63, %65 : vector<16x256xf32>
    %cst_51 = arith.constant 0.000000e+00 : f32
    %67 = vector.broadcast %cst_51 : f32 to vector<16x256xf32>
    %68 = arith.cmpf ogt, %66, %67 : vector<16x256xf32>
    %cst_52 = arith.constant 2.000000e-01 : f32
    %69 = vector.broadcast %cst_52 : f32 to vector<16x256xf32>
    %70 = arith.mulf %69, %66 : vector<16x256xf32>
    %71 = arith.select %68, %66, %70 : vector<16x256xi1>, vector<16x256xf32>
    %c1_i32_53 = arith.constant 1 : i32
    %c0_i32_54 = arith.constant 0 : i32
    %c0_i32_55 = arith.constant 0 : i32
    %72 = tpu.memref_slice %arg29[%c0_i32_54, %c0_i32_55] : memref<512x512xbf16, #tpu.memory_space<vmem>> -> memref<128x256xbf16, #tpu.memory_space<vmem>>
    %73 = tpu.memref_slice %arg30[%c1_i32_53] : memref<2x!tpu.dma_semaphore, #tpu.memory_space<semaphore_mem>> -> memref<1x!tpu.dma_semaphore, #tpu.memory_space<semaphore_mem>>
    %74 = tpu.memref_squeeze %73 : memref<1x!tpu.dma_semaphore, #tpu.memory_space<semaphore_mem>> -> memref<!tpu.dma_semaphore, #tpu.memory_space<semaphore_mem>>
    tpu.enqueue_dma source(%arg8 : memref<128x256xbf16, #tpu.memory_space<any>>) target(%72 : memref<128x256xbf16, #tpu.memory_space<vmem>>) target_semaphore(%74 : memref<!tpu.dma_semaphore, #tpu.memory_space<semaphore_mem>>)
    %c0_i32_56 = arith.constant 0 : i32
    %c0_i32_57 = arith.constant 0 : i32
    %c0_i32_58 = arith.constant 0 : i32
    %75 = tpu.memref_slice %arg28[%c0_i32_57, %c0_i32_58] : memref<512x512xbf16, #tpu.memory_space<vmem>> -> memref<256x128xbf16, #tpu.memory_space<vmem>>
    %76 = tpu.memref_slice %arg30[%c0_i32_56] : memref<2x!tpu.dma_semaphore, #tpu.memory_space<semaphore_mem>> -> memref<1x!tpu.dma_semaphore, #tpu.memory_space<semaphore_mem>>
    %77 = tpu.memref_squeeze %76 : memref<1x!tpu.dma_semaphore, #tpu.memory_space<semaphore_mem>> -> memref<!tpu.dma_semaphore, #tpu.memory_space<semaphore_mem>>
    tpu.wait_dma2 semaphore(%77 : memref<!tpu.dma_semaphore, #tpu.memory_space<semaphore_mem>>) src(%arg7 : memref<256x128xbf16, #tpu.memory_space<any>>) dst(%75 : memref<256x128xbf16, #tpu.memory_space<vmem>>)
    %c0_59 = arith.constant 0 : index
    %c0_60 = arith.constant 0 : index
    %78 = vector.load %arg28[%c0_59, %c0_60] : memref<512x512xbf16, #tpu.memory_space<vmem>>, vector<256x128xbf16>
    %79 = arith.truncf %71 : vector<16x256xf32> to vector<16x256xbf16>
    %cst_61 = arith.constant dense<0.000000e+00> : vector<16x128xf32>
    %80 = tpu.matmul %79, %78, %cst_61 {dimension_numbers = #tpu.dot_dimension_numbers<[1], [0], [0], [1], [0, 0, 1, 1], [], []>} : vector<16x256xbf16>, vector<256x128xbf16>, vector<16x128xf32> -> vector<16x128xf32>
    %c0_62 = arith.constant 0 : index
    %c0_63 = arith.constant 0 : index
    %81 = vector.load %arg18[%c0_62, %c0_63] : memref<1x128xf32, #tpu.memory_space<vmem>>, vector<1x128xf32>
    %82 = vector.broadcast %81 : vector<1x128xf32> to vector<16x128xf32>
    %83 = arith.addf %80, %82 : vector<16x128xf32>
    %cst_64 = arith.constant 0.000000e+00 : f32
    %84 = vector.broadcast %cst_64 : f32 to vector<16x128xf32>
    %85 = arith.cmpf ogt, %83, %84 : vector<16x128xf32>
    %cst_65 = arith.constant 2.000000e-01 : f32
    %86 = vector.broadcast %cst_65 : f32 to vector<16x128xf32>
    %87 = arith.mulf %86, %83 : vector<16x128xf32>
    %88 = arith.select %85, %83, %87 : vector<16x128xi1>, vector<16x128xf32>
    %c0_i32_66 = arith.constant 0 : i32
    %c0_i32_67 = arith.constant 0 : i32
    %c0_i32_68 = arith.constant 0 : i32
    %89 = tpu.memref_slice %arg28[%c0_i32_67, %c0_i32_68] : memref<512x512xbf16, #tpu.memory_space<vmem>> -> memref<128x128xbf16, #tpu.memory_space<vmem>>
    %90 = tpu.memref_slice %arg30[%c0_i32_66] : memref<2x!tpu.dma_semaphore, #tpu.memory_space<semaphore_mem>> -> memref<1x!tpu.dma_semaphore, #tpu.memory_space<semaphore_mem>>
    %91 = tpu.memref_squeeze %90 : memref<1x!tpu.dma_semaphore, #tpu.memory_space<semaphore_mem>> -> memref<!tpu.dma_semaphore, #tpu.memory_space<semaphore_mem>>
    tpu.enqueue_dma source(%arg9 : memref<128x128xbf16, #tpu.memory_space<any>>) target(%89 : memref<128x128xbf16, #tpu.memory_space<vmem>>) target_semaphore(%91 : memref<!tpu.dma_semaphore, #tpu.memory_space<semaphore_mem>>)
    %c1_i32_69 = arith.constant 1 : i32
    %c0_i32_70 = arith.constant 0 : i32
    %c0_i32_71 = arith.constant 0 : i32
    %92 = tpu.memref_slice %arg29[%c0_i32_70, %c0_i32_71] : memref<512x512xbf16, #tpu.memory_space<vmem>> -> memref<128x256xbf16, #tpu.memory_space<vmem>>
    %93 = tpu.memref_slice %arg30[%c1_i32_69] : memref<2x!tpu.dma_semaphore, #tpu.memory_space<semaphore_mem>> -> memref<1x!tpu.dma_semaphore, #tpu.memory_space<semaphore_mem>>
    %94 = tpu.memref_squeeze %93 : memref<1x!tpu.dma_semaphore, #tpu.memory_space<semaphore_mem>> -> memref<!tpu.dma_semaphore, #tpu.memory_space<semaphore_mem>>
    tpu.wait_dma2 semaphore(%94 : memref<!tpu.dma_semaphore, #tpu.memory_space<semaphore_mem>>) src(%arg8 : memref<128x256xbf16, #tpu.memory_space<any>>) dst(%92 : memref<128x256xbf16, #tpu.memory_space<vmem>>)
    %c0_72 = arith.constant 0 : index
    %c0_73 = arith.constant 0 : index
    %95 = vector.load %arg29[%c0_72, %c0_73] : memref<512x512xbf16, #tpu.memory_space<vmem>>, vector<128x256xbf16>
    %96 = arith.truncf %88 : vector<16x128xf32> to vector<16x128xbf16>
    %cst_74 = arith.constant dense<0.000000e+00> : vector<16x256xf32>
    %97 = tpu.matmul %96, %95, %cst_74 {dimension_numbers = #tpu.dot_dimension_numbers<[1], [0], [0], [1], [0, 0, 1, 1], [], []>} : vector<16x128xbf16>, vector<128x256xbf16>, vector<16x256xf32> -> vector<16x256xf32>
    %c0_75 = arith.constant 0 : index
    %c0_76 = arith.constant 0 : index
    %98 = vector.load %arg19[%c0_75, %c0_76] : memref<1x256xf32, #tpu.memory_space<vmem>>, vector<1x256xf32>
    %99 = vector.broadcast %98 : vector<1x256xf32> to vector<16x256xf32>
    %100 = arith.addf %97, %99 : vector<16x256xf32>
    %101 = vector.extract_strided_slice %100 {offsets = [0, 0], sizes = [16, 128], strides = [1, 1]} : vector<16x256xf32> to vector<16x128xf32>
    %102 = vector.extract_strided_slice %100 {offsets = [0, 128], sizes = [16, 128], strides = [1, 1]} : vector<16x256xf32> to vector<16x128xf32>
    %c0_77 = arith.constant 0 : index
    %c0_78 = arith.constant 0 : index
    %103 = vector.load %arg26[%c0_77, %c0_78] : memref<16x128xf32, #tpu.memory_space<vmem>>, vector<16x128xf32>
    tpu.vector_store %arg26[%c0_77, %c0_78], %101 {strides = array<i32>} : memref<16x128xf32, #tpu.memory_space<vmem>>, vector<16x128xf32>,
    %c0_79 = arith.constant 0 : index
    %c0_80 = arith.constant 0 : index
    %104 = vector.load %arg27[%c0_79, %c0_80] : memref<16x128xf32, #tpu.memory_space<vmem>>, vector<16x128xf32>
    tpu.vector_store %arg27[%c0_79, %c0_80], %102 {strides = array<i32>} : memref<16x128xf32, #tpu.memory_space<vmem>>, vector<16x128xf32>,
    %c0_81 = arith.constant 0 : index
    %c0_82 = arith.constant 0 : index
    %105 = vector.load %arg2[%c0_81, %c0_82] : memref<16x128xf32, #tpu.memory_space<vmem>>, vector<16x128xf32>
    %106 = arith.mulf %102, %105 : vector<16x128xf32>
    %107 = arith.addf %101, %106 : vector<16x128xf32>
    %c1_i32_83 = arith.constant 1 : i32
    %c0_i32_84 = arith.constant 0 : i32
    %c0_i32_85 = arith.constant 0 : i32
    %108 = tpu.memref_slice %arg29[%c0_i32_84, %c0_i32_85] : memref<512x512xbf16, #tpu.memory_space<vmem>> -> memref<128x256xbf16, #tpu.memory_space<vmem>>
    %109 = tpu.memref_slice %arg30[%c1_i32_83] : memref<2x!tpu.dma_semaphore, #tpu.memory_space<semaphore_mem>> -> memref<1x!tpu.dma_semaphore, #tpu.memory_space<semaphore_mem>>
    %110 = tpu.memref_squeeze %109 : memref<1x!tpu.dma_semaphore, #tpu.memory_space<semaphore_mem>> -> memref<!tpu.dma_semaphore, #tpu.memory_space<semaphore_mem>>
    tpu.enqueue_dma source(%arg10 : memref<128x256xbf16, #tpu.memory_space<any>>) target(%108 : memref<128x256xbf16, #tpu.memory_space<vmem>>) target_semaphore(%110 : memref<!tpu.dma_semaphore, #tpu.memory_space<semaphore_mem>>)
    %c0_i32_86 = arith.constant 0 : i32
    %c0_i32_87 = arith.constant 0 : i32
    %c0_i32_88 = arith.constant 0 : i32
    %111 = tpu.memref_slice %arg28[%c0_i32_87, %c0_i32_88] : memref<512x512xbf16, #tpu.memory_space<vmem>> -> memref<128x128xbf16, #tpu.memory_space<vmem>>
    %112 = tpu.memref_slice %arg30[%c0_i32_86] : memref<2x!tpu.dma_semaphore, #tpu.memory_space<semaphore_mem>> -> memref<1x!tpu.dma_semaphore, #tpu.memory_space<semaphore_mem>>
    %113 = tpu.memref_squeeze %112 : memref<1x!tpu.dma_semaphore, #tpu.memory_space<semaphore_mem>> -> memref<!tpu.dma_semaphore, #tpu.memory_space<semaphore_mem>>
    tpu.wait_dma2 semaphore(%113 : memref<!tpu.dma_semaphore, #tpu.memory_space<semaphore_mem>>) src(%arg9 : memref<128x128xbf16, #tpu.memory_space<any>>) dst(%111 : memref<128x128xbf16, #tpu.memory_space<vmem>>)
    %c0_89 = arith.constant 0 : index
    %c0_90 = arith.constant 0 : index
    %114 = vector.load %arg28[%c0_89, %c0_90] : memref<512x512xbf16, #tpu.memory_space<vmem>>, vector<128x128xbf16>
    %115 = arith.truncf %107 : vector<16x128xf32> to vector<16x128xbf16>
    %cst_91 = arith.constant dense<0.000000e+00> : vector<16x128xf32>
    %116 = tpu.matmul %115, %114, %cst_91 {dimension_numbers = #tpu.dot_dimension_numbers<[1], [0], [0], [1], [0, 0, 1, 1], [], []>} : vector<16x128xbf16>, vector<128x128xbf16>, vector<16x128xf32> -> vector<16x128xf32>
    %c0_92 = arith.constant 0 : index
    %c0_93 = arith.constant 0 : index
    %117 = vector.load %arg20[%c0_92, %c0_93] : memref<1x128xf32, #tpu.memory_space<vmem>>, vector<1x128xf32>
    %118 = vector.broadcast %117 : vector<1x128xf32> to vector<16x128xf32>
    %119 = arith.addf %116, %118 : vector<16x128xf32>
    %cst_94 = arith.constant 0.000000e+00 : f32
    %120 = vector.broadcast %cst_94 : f32 to vector<16x128xf32>
    %121 = arith.cmpf ogt, %119, %120 : vector<16x128xf32>
    %cst_95 = arith.constant 2.000000e-01 : f32
    %122 = vector.broadcast %cst_95 : f32 to vector<16x128xf32>
    %123 = arith.mulf %122, %119 : vector<16x128xf32>
    %124 = arith.select %121, %119, %123 : vector<16x128xi1>, vector<16x128xf32>
    %c0_i32_96 = arith.constant 0 : i32
    %c0_i32_97 = arith.constant 0 : i32
    %c0_i32_98 = arith.constant 0 : i32
    %125 = tpu.memref_slice %arg28[%c0_i32_97, %c0_i32_98] : memref<512x512xbf16, #tpu.memory_space<vmem>> -> memref<256x512xbf16, #tpu.memory_space<vmem>>
    %126 = tpu.memref_slice %arg30[%c0_i32_96] : memref<2x!tpu.dma_semaphore, #tpu.memory_space<semaphore_mem>> -> memref<1x!tpu.dma_semaphore, #tpu.memory_space<semaphore_mem>>
    %127 = tpu.memref_squeeze %126 : memref<1x!tpu.dma_semaphore, #tpu.memory_space<semaphore_mem>> -> memref<!tpu.dma_semaphore, #tpu.memory_space<semaphore_mem>>
    tpu.enqueue_dma source(%arg11 : memref<256x512xbf16, #tpu.memory_space<any>>) target(%125 : memref<256x512xbf16, #tpu.memory_space<vmem>>) target_semaphore(%127 : memref<!tpu.dma_semaphore, #tpu.memory_space<semaphore_mem>>)
    %c1_i32_99 = arith.constant 1 : i32
    %c0_i32_100 = arith.constant 0 : i32
    %c0_i32_101 = arith.constant 0 : i32
    %128 = tpu.memref_slice %arg29[%c0_i32_100, %c0_i32_101] : memref<512x512xbf16, #tpu.memory_space<vmem>> -> memref<128x256xbf16, #tpu.memory_space<vmem>>
    %129 = tpu.memref_slice %arg30[%c1_i32_99] : memref<2x!tpu.dma_semaphore, #tpu.memory_space<semaphore_mem>> -> memref<1x!tpu.dma_semaphore, #tpu.memory_space<semaphore_mem>>
    %130 = tpu.memref_squeeze %129 : memref<1x!tpu.dma_semaphore, #tpu.memory_space<semaphore_mem>> -> memref<!tpu.dma_semaphore, #tpu.memory_space<semaphore_mem>>
    tpu.wait_dma2 semaphore(%130 : memref<!tpu.dma_semaphore, #tpu.memory_space<semaphore_mem>>) src(%arg10 : memref<128x256xbf16, #tpu.memory_space<any>>) dst(%128 : memref<128x256xbf16, #tpu.memory_space<vmem>>)
    %c0_102 = arith.constant 0 : index
    %c0_103 = arith.constant 0 : index
    %131 = vector.load %arg29[%c0_102, %c0_103] : memref<512x512xbf16, #tpu.memory_space<vmem>>, vector<128x256xbf16>
    %132 = arith.truncf %124 : vector<16x128xf32> to vector<16x128xbf16>
    %cst_104 = arith.constant dense<0.000000e+00> : vector<16x256xf32>
    %133 = tpu.matmul %132, %131, %cst_104 {dimension_numbers = #tpu.dot_dimension_numbers<[1], [0], [0], [1], [0, 0, 1, 1], [], []>} : vector<16x128xbf16>, vector<128x256xbf16>, vector<16x256xf32> -> vector<16x256xf32>
    %c0_105 = arith.constant 0 : index
    %c0_106 = arith.constant 0 : index
    %134 = vector.load %arg21[%c0_105, %c0_106] : memref<1x256xf32, #tpu.memory_space<vmem>>, vector<1x256xf32>
    %135 = vector.broadcast %134 : vector<1x256xf32> to vector<16x256xf32>
    %136 = arith.addf %133, %135 : vector<16x256xf32>
    %cst_107 = arith.constant 0.000000e+00 : f32
    %137 = vector.broadcast %cst_107 : f32 to vector<16x256xf32>
    %138 = arith.cmpf ogt, %136, %137 : vector<16x256xf32>
    %cst_108 = arith.constant 2.000000e-01 : f32
    %139 = vector.broadcast %cst_108 : f32 to vector<16x256xf32>
    %140 = arith.mulf %139, %136 : vector<16x256xf32>
    %141 = arith.select %138, %136, %140 : vector<16x256xi1>, vector<16x256xf32>
    %c1_i32_109 = arith.constant 1 : i32
    %c0_i32_110 = arith.constant 0 : i32
    %c0_i32_111 = arith.constant 0 : i32
    %142 = tpu.memref_slice %arg29[%c0_i32_110, %c0_i32_111] : memref<512x512xbf16, #tpu.memory_space<vmem>> -> memref<512x256xbf16, #tpu.memory_space<vmem>>
    %143 = tpu.memref_slice %arg30[%c1_i32_109] : memref<2x!tpu.dma_semaphore, #tpu.memory_space<semaphore_mem>> -> memref<1x!tpu.dma_semaphore, #tpu.memory_space<semaphore_mem>>
    %144 = tpu.memref_squeeze %143 : memref<1x!tpu.dma_semaphore, #tpu.memory_space<semaphore_mem>> -> memref<!tpu.dma_semaphore, #tpu.memory_space<semaphore_mem>>
    tpu.enqueue_dma source(%arg12 : memref<512x256xbf16, #tpu.memory_space<any>>) target(%142 : memref<512x256xbf16, #tpu.memory_space<vmem>>) target_semaphore(%144 : memref<!tpu.dma_semaphore, #tpu.memory_space<semaphore_mem>>)
    %c0_i32_112 = arith.constant 0 : i32
    %c0_i32_113 = arith.constant 0 : i32
    %c0_i32_114 = arith.constant 0 : i32
    %145 = tpu.memref_slice %arg28[%c0_i32_113, %c0_i32_114] : memref<512x512xbf16, #tpu.memory_space<vmem>> -> memref<256x512xbf16, #tpu.memory_space<vmem>>
    %146 = tpu.memref_slice %arg30[%c0_i32_112] : memref<2x!tpu.dma_semaphore, #tpu.memory_space<semaphore_mem>> -> memref<1x!tpu.dma_semaphore, #tpu.memory_space<semaphore_mem>>
    %147 = tpu.memref_squeeze %146 : memref<1x!tpu.dma_semaphore, #tpu.memory_space<semaphore_mem>> -> memref<!tpu.dma_semaphore, #tpu.memory_space<semaphore_mem>>
    tpu.wait_dma2 semaphore(%147 : memref<!tpu.dma_semaphore, #tpu.memory_space<semaphore_mem>>) src(%arg11 : memref<256x512xbf16, #tpu.memory_space<any>>) dst(%145 : memref<256x512xbf16, #tpu.memory_space<vmem>>)
    %c0_115 = arith.constant 0 : index
    %c0_116 = arith.constant 0 : index
    %148 = vector.load %arg28[%c0_115, %c0_116] : memref<512x512xbf16, #tpu.memory_space<vmem>>, vector<256x512xbf16>
    %149 = arith.truncf %141 : vector<16x256xf32> to vector<16x256xbf16>
    %cst_117 = arith.constant dense<0.000000e+00> : vector<16x512xf32>
    %150 = tpu.matmul %149, %148, %cst_117 {dimension_numbers = #tpu.dot_dimension_numbers<[1], [0], [0], [1], [0, 0, 1, 1], [], []>} : vector<16x256xbf16>, vector<256x512xbf16>, vector<16x512xf32> -> vector<16x512xf32>
    %c0_118 = arith.constant 0 : index
    %c0_119 = arith.constant 0 : index
    %151 = vector.load %arg22[%c0_118, %c0_119] : memref<1x512xf32, #tpu.memory_space<vmem>>, vector<1x512xf32>
    %152 = vector.broadcast %151 : vector<1x512xf32> to vector<16x512xf32>
    %153 = arith.addf %150, %152 : vector<16x512xf32>
    %cst_120 = arith.constant 0.000000e+00 : f32
    %154 = vector.broadcast %cst_120 : f32 to vector<16x512xf32>
    %155 = arith.cmpf ogt, %153, %154 : vector<16x512xf32>
    %cst_121 = arith.constant 2.000000e-01 : f32
    %156 = vector.broadcast %cst_121 : f32 to vector<16x512xf32>
    %157 = arith.mulf %156, %153 : vector<16x512xf32>
    %158 = arith.select %155, %153, %157 : vector<16x512xi1>, vector<16x512xf32>
    %c0_i32_122 = arith.constant 0 : i32
    %c0_i32_123 = arith.constant 0 : i32
    %c0_i32_124 = arith.constant 0 : i32
    %159 = tpu.memref_slice %arg28[%c0_i32_123, %c0_i32_124] : memref<512x512xbf16, #tpu.memory_space<vmem>> -> memref<256x384xbf16, #tpu.memory_space<vmem>>
    %160 = tpu.memref_slice %arg30[%c0_i32_122] : memref<2x!tpu.dma_semaphore, #tpu.memory_space<semaphore_mem>> -> memref<1x!tpu.dma_semaphore, #tpu.memory_space<semaphore_mem>>
    %161 = tpu.memref_squeeze %160 : memref<1x!tpu.dma_semaphore, #tpu.memory_space<semaphore_mem>> -> memref<!tpu.dma_semaphore, #tpu.memory_space<semaphore_mem>>
    tpu.enqueue_dma source(%arg13 : memref<256x384xbf16, #tpu.memory_space<any>>) target(%159 : memref<256x384xbf16, #tpu.memory_space<vmem>>) target_semaphore(%161 : memref<!tpu.dma_semaphore, #tpu.memory_space<semaphore_mem>>)
    %c1_i32_125 = arith.constant 1 : i32
    %c0_i32_126 = arith.constant 0 : i32
    %c0_i32_127 = arith.constant 0 : i32
    %162 = tpu.memref_slice %arg29[%c0_i32_126, %c0_i32_127] : memref<512x512xbf16, #tpu.memory_space<vmem>> -> memref<512x256xbf16, #tpu.memory_space<vmem>>
    %163 = tpu.memref_slice %arg30[%c1_i32_125] : memref<2x!tpu.dma_semaphore, #tpu.memory_space<semaphore_mem>> -> memref<1x!tpu.dma_semaphore, #tpu.memory_space<semaphore_mem>>
    %164 = tpu.memref_squeeze %163 : memref<1x!tpu.dma_semaphore, #tpu.memory_space<semaphore_mem>> -> memref<!tpu.dma_semaphore, #tpu.memory_space<semaphore_mem>>
    tpu.wait_dma2 semaphore(%164 : memref<!tpu.dma_semaphore, #tpu.memory_space<semaphore_mem>>) src(%arg12 : memref<512x256xbf16, #tpu.memory_space<any>>) dst(%162 : memref<512x256xbf16, #tpu.memory_space<vmem>>)
    %c0_128 = arith.constant 0 : index
    %c0_129 = arith.constant 0 : index
    %165 = vector.load %arg29[%c0_128, %c0_129] : memref<512x512xbf16, #tpu.memory_space<vmem>>, vector<512x256xbf16>
    %166 = arith.truncf %158 : vector<16x512xf32> to vector<16x512xbf16>
    %cst_130 = arith.constant dense<0.000000e+00> : vector<16x256xf32>
    %167 = tpu.matmul %166, %165, %cst_130 {dimension_numbers = #tpu.dot_dimension_numbers<[1], [0], [0], [1], [0, 0, 1, 1], [], []>} : vector<16x512xbf16>, vector<512x256xbf16>, vector<16x256xf32> -> vector<16x256xf32>
    %c0_131 = arith.constant 0 : index
    %c0_132 = arith.constant 0 : index
    %168 = vector.load %arg23[%c0_131, %c0_132] : memref<1x256xf32, #tpu.memory_space<vmem>>, vector<1x256xf32>
    %169 = vector.broadcast %168 : vector<1x256xf32> to vector<16x256xf32>
    %170 = arith.addf %167, %169 : vector<16x256xf32>
    %cst_133 = arith.constant 0.000000e+00 : f32
    %171 = vector.broadcast %cst_133 : f32 to vector<16x256xf32>
    %172 = arith.cmpf ogt, %170, %171 : vector<16x256xf32>
    %cst_134 = arith.constant 2.000000e-01 : f32
    %173 = vector.broadcast %cst_134 : f32 to vector<16x256xf32>
    %174 = arith.mulf %173, %170 : vector<16x256xf32>
    %175 = arith.select %172, %170, %174 : vector<16x256xi1>, vector<16x256xf32>
    %c0_i32_135 = arith.constant 0 : i32
    %c0_i32_136 = arith.constant 0 : i32
    %c0_i32_137 = arith.constant 0 : i32
    %176 = tpu.memref_slice %arg28[%c0_i32_136, %c0_i32_137] : memref<512x512xbf16, #tpu.memory_space<vmem>> -> memref<256x384xbf16, #tpu.memory_space<vmem>>
    %177 = tpu.memref_slice %arg30[%c0_i32_135] : memref<2x!tpu.dma_semaphore, #tpu.memory_space<semaphore_mem>> -> memref<1x!tpu.dma_semaphore, #tpu.memory_space<semaphore_mem>>
    %178 = tpu.memref_squeeze %177 : memref<1x!tpu.dma_semaphore, #tpu.memory_space<semaphore_mem>> -> memref<!tpu.dma_semaphore, #tpu.memory_space<semaphore_mem>>
    tpu.wait_dma2 semaphore(%178 : memref<!tpu.dma_semaphore, #tpu.memory_space<semaphore_mem>>) src(%arg13 : memref<256x384xbf16, #tpu.memory_space<any>>) dst(%176 : memref<256x384xbf16, #tpu.memory_space<vmem>>)
    %c0_138 = arith.constant 0 : index
    %c0_139 = arith.constant 0 : index
    %179 = vector.load %arg28[%c0_138, %c0_139] : memref<512x512xbf16, #tpu.memory_space<vmem>>, vector<256x384xbf16>
    %180 = arith.truncf %175 : vector<16x256xf32> to vector<16x256xbf16>
    %cst_140 = arith.constant dense<0.000000e+00> : vector<16x384xf32>
    %181 = tpu.matmul %180, %179, %cst_140 {dimension_numbers = #tpu.dot_dimension_numbers<[1], [0], [0], [1], [0, 0, 1, 1], [], []>} : vector<16x256xbf16>, vector<256x384xbf16>, vector<16x384xf32> -> vector<16x384xf32>
    %c0_141 = arith.constant 0 : index
    %c0_142 = arith.constant 0 : index
    %182 = vector.load %arg24[%c0_141, %c0_142] : memref<1x384xf32, #tpu.memory_space<vmem>>, vector<1x384xf32>
    %183 = vector.broadcast %182 : vector<1x384xf32> to vector<16x384xf32>
    %184 = arith.addf %181, %183 : vector<16x384xf32>
    %c0_143 = arith.constant 0 : index
    %c0_144 = arith.constant 0 : index
    %185 = vector.load %arg25[%c0_143, %c0_144] : memref<16x384xf32, #tpu.memory_space<vmem>>, vector<16x384xf32>
    tpu.vector_store %arg25[%c0_143, %c0_144], %184 {strides = array<i32>} : memref<16x384xf32, #tpu.memory_space<vmem>>, vector<16x384xf32>,
    return
  }
  func.func @transform_0(%arg0: i32) -> (i32, i32) {
    %c0_i32 = arith.constant 0 : i32
    %c0_i32_0 = arith.constant 0 : i32
    return %arg0, %c0_i32 : i32, i32
  }
  func.func @transform_1(%arg0: i32) -> (i32, i32) {
    %c0_i32 = arith.constant 0 : i32
    %c0_i32_0 = arith.constant 0 : i32
    return %arg0, %c0_i32 : i32, i32
  }
  func.func @transform_13(%arg0: i32) -> (i32, i32) {
    %c0_i32 = arith.constant 0 : i32
    %c0_i32_0 = arith.constant 0 : i32
    %c0_i32_1 = arith.constant 0 : i32
    return %c0_i32, %c0_i32_0 : i32, i32
  }
  func.func @transform_14(%arg0: i32) -> (i32, i32) {
    %c0_i32 = arith.constant 0 : i32
    %c0_i32_0 = arith.constant 0 : i32
    %c0_i32_1 = arith.constant 0 : i32
    return %c0_i32, %c0_i32_0 : i32, i32
  }
  func.func @transform_15(%arg0: i32) -> (i32, i32) {
    %c0_i32 = arith.constant 0 : i32
    %c0_i32_0 = arith.constant 0 : i32
    %c0_i32_1 = arith.constant 0 : i32
    return %c0_i32, %c0_i32_0 : i32, i32
  }
  func.func @transform_16(%arg0: i32) -> (i32, i32) {
    %c0_i32 = arith.constant 0 : i32
    %c0_i32_0 = arith.constant 0 : i32
    %c0_i32_1 = arith.constant 0 : i32
    return %c0_i32, %c0_i32_0 : i32, i32
  }
  func.func @transform_17(%arg0: i32) -> (i32, i32) {
    %c0_i32 = arith.constant 0 : i32
    %c0_i32_0 = arith.constant 0 : i32
    %c0_i32_1 = arith.constant 0 : i32
    return %c0_i32, %c0_i32_0 : i32, i32
  }
  func.func @transform_18(%arg0: i32) -> (i32, i32) {
    %c0_i32 = arith.constant 0 : i32
    %c0_i32_0 = arith.constant 0 : i32
    %c0_i32_1 = arith.constant 0 : i32
    return %c0_i32, %c0_i32_0 : i32, i32
  }
  func.func @transform_19(%arg0: i32) -> (i32, i32) {
    %c0_i32 = arith.constant 0 : i32
    %c0_i32_0 = arith.constant 0 : i32
    %c0_i32_1 = arith.constant 0 : i32
    return %c0_i32, %c0_i32_0 : i32, i32
  }
  func.func @transform_20(%arg0: i32) -> (i32, i32) {
    %c0_i32 = arith.constant 0 : i32
    %c0_i32_0 = arith.constant 0 : i32
    %c0_i32_1 = arith.constant 0 : i32
    return %c0_i32, %c0_i32_0 : i32, i32
  }
  func.func @transform_21(%arg0: i32) -> (i32, i32) {
    %c0_i32 = arith.constant 0 : i32
    %c0_i32_0 = arith.constant 0 : i32
    %c0_i32_1 = arith.constant 0 : i32
    return %c0_i32, %c0_i32_0 : i32, i32
  }
  func.func @transform_22(%arg0: i32) -> (i32, i32) {
    %c0_i32 = arith.constant 0 : i32
    %c0_i32_0 = arith.constant 0 : i32
    %c0_i32_1 = arith.constant 0 : i32
    return %c0_i32, %c0_i32_0 : i32, i32
  }
  func.func @transform_23(%arg0: i32) -> (i32, i32) {
    %c0_i32 = arith.constant 0 : i32
    %c0_i32_0 = arith.constant 0 : i32
    %c0_i32_1 = arith.constant 0 : i32
    return %c0_i32, %c0_i32_0 : i32, i32
  }
  func.func @transform_24(%arg0: i32) -> (i32, i32) {
    %c0_i32 = arith.constant 0 : i32
    %c0_i32_0 = arith.constant 0 : i32
    return %arg0, %c0_i32 : i32, i32
  }
  func.func @transform_25(%arg0: i32) -> (i32, i32) {
    %c0_i32 = arith.constant 0 : i32
    %c0_i32_0 = arith.constant 0 : i32
    return %arg0, %c0_i32 : i32, i32
  }
  func.func @transform_26(%arg0: i32) -> (i32, i32) {
    %c0_i32 = arith.constant 0 : i32
    %c0_i32_0 = arith.constant 0 : i32
    return %arg0, %c0_i32 : i32, i32
  }
}

</mosaic_0001>

<bundles_post_ra>
// kernel: tpu_custom_call.1
= control target key start
LH: loop header
LB: loop body
LE: loop exit
PB: predicated region body
PF: predicated region fallthrough
CT: control target
= control target key end

     0   :  { %s8604_s0 = inlined_call_operand.hbm [shape: f32[16,384], index: 0, kind: input, shape index: {}]   ;;  %s8605_s1 = inlined_call_operand.hbm [shape: f32[16,128], index: 1, kind: input, shape index: {}]   ;;  %s8606_s2 = inlined_call_operand.hbm [shape: bf16[384,256], index: 2, kind: input, shape index: {}]   ;;  %s8607_s3 = inlined_call_operand.hbm [shape: bf16[256,512], index: 3, kind: input, shape index: {}]   ;;  %s8608_s4 = inlined_call_operand.hbm [shape: bf16[512,512], index: 4, kind: input, shape index: {}]   ;;  %s8609_s5 = inlined_call_operand.hbm [shape: bf16[512,256], index: 5, kind: input, shape index: {}]   ;;  %s8610_s6 = inlined_call_operand.hbm [shape: bf16[256,128], index: 6, kind: input, shape index: {}]   ;;  %s8611_s7 = inlined_call_operand.hbm [shape: bf16[128,256], index: 7, kind: input, shape index: {}]   ;;  %s8612_s8 = inlined_call_operand.hbm [shape: bf16[128,128], index: 8, kind: input, shape index: {}]   ;;  %s8613_s9 = inlined_call_operand.hbm [shape: bf16[128,256], index: 9, kind: input, shape index: {}]   ;;  %s8614_s10 = inlined_call_operand.hbm [shape: bf16[256,512], index: 10, kind: input, shape index: {}]   ;;  %s8615_s11 = inlined_call_operand.hbm [shape: bf16[512,256], index: 11, kind: input, shape index: {}]   ;;  %s8616_s12 = inlined_call_operand.hbm [shape: bf16[256,384], index: 12, kind: input, shape index: {}]   ;;  %s8617_s13 = inlined_call_operand.hbm [shape: f32[1,256], index: 13, kind: input, shape index: {}]   ;;  %s8618_s14 = inlined_call_operand.vmem [shape: f32[1,512], index: 14, kind: input, shape index: {}]   ;;  %s8619_s15 = inlined_call_operand.vmem [shape: f32[1,512], index: 15, kind: input, shape index: {}]   ;;  %s8620_s16 = inlined_call_operand.hbm [shape: f32[1,256], index: 16, kind: input, shape index: {}]   ;;  %s8621_s17 = inlined_call_operand.hbm [shape: f32[1,128], index: 17, kind: input, shape index: {}]   ;;  %s8622_s18 = inlined_call_operand.vmem [shape: f32[1,256], index: 18, kind: input, shape index: {}]   ;;  %s8623_s19 = inlined_call_operand.hbm [shape: f32[1,128], index: 19, kind: input, shape index: {}]   ;;  %s8624_s20 = inlined_call_operand.vmem [shape: f32[1,256], index: 20, kind: input, shape index: {}]   ;;  %s8625_s21 = inlined_call_operand.vmem [shape: f32[1,512], index: 21, kind: input, shape index: {}]   ;;  %s8626_s22 = inlined_call_operand.vmem [shape: f32[1,256], index: 22, kind: input, shape index: {}]   ;;  %s8627_s23 = inlined_call_operand.vmem [shape: f32[1,384], index: 23, kind: input, shape index: {}]   ;;  %s8628_s24 = inlined_call_operand.hbm [shape: f32[16,384], index: 24, kind: output, shape index: {0}]   ;;  %s8629_s25 = inlined_call_operand.hbm [shape: f32[16,128], index: 25, kind: output, shape index: {1}]   ;;  %s8630_s26 = inlined_call_operand.hbm [shape: f32[16,128], index: 26, kind: output, shape index: {2}]  }
   0x1   :  { %8631 = sst [smem:[#allocation53_spill]] %s8604_s0 }
   0x2   :  { %8632 = sst [smem:[#allocation54_spill]] %s8605_s1 }
   0x3   :  { %8633 = sst [smem:[#allocation55_spill]] %s8606_s2 }
   0x4   :  { %8634 = sst [smem:[#allocation56_spill]] %s8607_s3 }
   0x5   :  { %8635 = sst [smem:[#allocation57_spill]] %s8608_s4 }
   0x6   :  { %8636 = sst [smem:[#allocation58_spill]] %s8609_s5 }
   0x7   :  { %8637 = sst [smem:[#allocation59_spill]] %s8610_s6 }
   0x8   :  { %8638 = sst [smem:[#allocation60_spill]] %s8611_s7 }
   0x9   :  { %8639 = sst [smem:[#allocation61_spill]] %s8612_s8 }
   0xa   :  { %8640 = sst [smem:[#allocation62_spill]] %s8613_s9 }
   0xb   :  { %8641 = sst [smem:[#allocation63_spill]] %s8614_s10 }
   0xc   :  { %8642 = sst [smem:[#allocation64_spill]] %s8627_s23 }
   0xd   :  { %8643 = sst [smem:[#allocation65_spill]] %s8628_s24 }
   0xe   :  { %32 = vsyncpa [#allocation6], 0 }
   0xf   :  { %33 = vsyncpa [#allocation9], 0 }
  0x10   :  { %34 = vsyncpa [#allocation12], 0 }
  0x11   :  { %35 = vsyncpa [#allocation15], 0 }
  0x12   :  { %36 = vsyncpa [#allocation7], 0  ;;  %s8644_s7 = sld [smem:[#allocation54_spill]] }
  0x18   :  { %s55_s28 = sshll.u32 %s8644_s7, 4  ;;  %s56_s28 = int_to_ptr.hbm [resolvable:$true] %s55_s28 }
  0x19   :  { %37 = vsyncpa [#allocation18], 0  ;;  %s8062_s8 = smov [#allocation8]   ;;  %s84_s9 = sshll.u32 %s8620_s16, 4  ;;  %s85_s9 = int_to_ptr.hbm [resolvable:$true] %s84_s9 }
  0x1a   :  { %s57_s4 = sshll.u32 %s8062_s8, 4  ;;  %s8063_s30 = smov 128   ;;  %s58_s4 = int_to_ptr.vmem [resolvable:$true] %s57_s4 }
  0x1b   :  { %s8064_s2 = smov 8   ;;  %s8065_s5 = smov [#allocation11]  }
  0x1c   :  { %63 = dma.hbm_to_vmem [thread:$0]  %s56_s28, 256, %s58_s4, [#allocation9], %s8063_s30, %s8063_s30, %s8064_s2  }
  0x1d   :  { %s86_s10 = sshll.u32 %s8065_s5, 4  ;;  %s8645_s27 = sld [smem:[#allocation53_spill]]  ;;  %s87_s10 = int_to_ptr.vmem [resolvable:$true] %s86_s10 }
  0x1e   :  { %89 = dma.hbm_to_vmem [thread:$0]  %s85_s9, 32, %s87_s10, [#allocation12]  }
  0x1f   :  { %s8066_s7 = smov [#allocation5]   ;;  %s69_s0 = sshll.u32 %s8617_s13, 4  ;;  %s70_s0 = int_to_ptr.hbm [resolvable:$true] %s69_s0 }
  0x20   :  { %s44_s8 = sshll.u32 %s8066_s7, 4  ;;  %s8067_s24 = smov 384   ;;  %s45_s8 = int_to_ptr.vmem [resolvable:$true] %s44_s8 }
  0x21   :  { %s8068_s23 = smov 24   ;;  %s8069_s28 = smov [#allocation10]  }
  0x22   :  { %s71_s4 = sshll.u32 %s8069_s28, 4  ;;  %s95_s9 = sshll.u32 %s8621_s17, 4  ;;  %s72_s4 = int_to_ptr.vmem [resolvable:$true] %s71_s4  ;;  %s96_s9 = int_to_ptr.hbm [resolvable:$true] %s95_s9 }
  0x23   :  { %s42_s3 = sshll.u32 %s8645_s27, 4  ;;  %s108_s13 = sshll.u32 %s8623_s19, 4  ;;  %s43_s3 = int_to_ptr.hbm [resolvable:$true] %s42_s3  ;;  %s109_s13 = int_to_ptr.hbm [resolvable:$true] %s108_s13 }
  0x24   :  { %50 = dma.hbm_to_vmem [thread:$0]  %s43_s3, 768, %s45_s8, [#allocation6], %s8067_s24, %s8067_s24, %s8068_s23  }
  0x25   :  { %74 = dma.hbm_to_vmem [thread:$0]  %s70_s0, 32, %s72_s4, [#allocation9]  }
  0x26   :  { %s8070_s27 = smov [#allocation13]   ;;  %s8071_s3 = smov [#allocation14]  }
  0x27   :  { %s97_s7 = sshll.u32 %s8070_s27, 4  ;;  %s110_s8 = sshll.u32 %s8071_s3, 4  ;;  %s98_s7 = int_to_ptr.vmem [resolvable:$true] %s97_s7  ;;  %s111_s8 = int_to_ptr.vmem [resolvable:$true] %s110_s8 }
  0x28   :  { %100 = dma.hbm_to_vmem [thread:$0]  %s96_s9, 16, %s98_s7, [#allocation12]  }
  0x29   :  { %113 = dma.hbm_to_vmem [thread:$0]  %s109_s13, 16, %s111_s8, [#allocation15]  }
  0x2a   :  { %8028 = dma.done.wait [#allocation6], 768  }
  0x2b   :  { %8029 = vsyncadd [#allocation6], 4294966528 }
  0x2c   :  { %8030 = dma.done.wait [#allocation9], 288  }
  0x2d   :  { %8031 = vsyncadd [#allocation9], 4294967008 }
  0x2e   :  { %8032 = dma.done.wait [#allocation12], 48  }
  0x2f   :  { %8033 = vsyncadd [#allocation12], 4294967248 }
  0x30   :  { %8034 = dma.done.wait [#allocation15], 16  }
  0x31   :  { %8035 = vsyncadd [#allocation15], 4294967280  ;;  %s8646_s19 = sld [smem:[#allocation55_spill]]  ;;  %s8072_s0 = smov [#allocation2]   ;;  %v8255_v0 = vld [vmem:[#allocation5] sm:$0xff]  ;;  %v8257_v1 = vld [vmem:[#allocation5 + $0x8] sm:$0xff] }
  0x32   :  { %s148_s28 = sshll.u32 %s8072_s0, 4  ;;  %s8073_s4 = smov 256   ;;  %v8259_v2 = vld [vmem:[#allocation5 + $0x10] sm:$0xff]  ;;  %v8262_v3 = vld [vmem:[#allocation5 + $0x18] sm:$0xff]  ;;  %v8264_v4 = vld [vmem:[#allocation5 + $0x20] sm:$0xff]  ;;  %s8244_s28 = int_to_ptr.vmem [resolvable:$true] %s148_s28 }
  0x33   :  { %s8647_s9 = sld [smem:[#allocation56_spill]]  ;;  %s8074_s1 = smov [#allocation3]   ;;  %v8266_v5 = vld [vmem:[#allocation5 + $0x28] sm:$0xff] }
  0x34   :  { %s170_s13 = sshll.u32 %s8074_s1, 4  ;;  %s8253_s13 = int_to_ptr.vmem [resolvable:$true] %s170_s13 }
  0x37   :  { %s146_s29 = sshll.u32 %s8646_s19, 4  ;;  %s147_s29 = int_to_ptr.hbm [resolvable:$true] %s146_s29 }
  0x38   :  { %153 = dma.hbm_to_vmem [thread:$0]  %s147_s29, 6144, %s8244_s28, [#allocation4], %s8063_s30, %s8073_s4, %s8064_s2 }
  0x39   :  { %s168_s10 = sshll.u32 %s8647_s9, 4  ;;  %s169_s10 = int_to_ptr.hbm [resolvable:$true] %s168_s10 }
  0x3a   :  { %173 = dma.hbm_to_vmem [thread:$0]  %s169_s10, 8192, %s8253_s13, [#allocation4 + $0x1] }
  0x3b   :  { %8036 = dma.done.wait [#allocation4], 6144 }
  0x3c   :  { %8037 = vsyncadd [#allocation4], 4294961152  ;;  %v4902_v6 = vld [vmem:[#allocation2 + $0xe0] sm:$0xf]  ;;  %v7005_v7 = vld [vmem:[#allocation2 + $0xec] sm:$0xf0] }
  0x3d   :  { %v4966_v8 = vld [vmem:[#allocation2 + $0x1e0] sm:$0xf]  ;;  %v4903_v9 = vor.u32 %v7005_v7, %v4902_v6  ;;  %v7021_v10 = vld [vmem:[#allocation2 + $0x1ec] sm:$0xf0]  ;;  %v7004_v36 = vld [vmem:[#allocation2 + $0xe4] sm:$0xf] }
  0x3e   :  { %v5030_v11 = vld [vmem:[#allocation2 + $0x2e0] sm:$0xf]  ;;  %v7037_v12 = vld [vmem:[#allocation2 + $0x2ec] sm:$0xf0]  ;;  %v4967_v13 = vor.u32 %v7021_v10, %v4966_v8  ;;  %v4904_v37 = vld [vmem:[#allocation2 + $0xf0] sm:$0xf0] }
  0x3f   :  { %v5031_v14 = vor.u32 %v7037_v12, %v5030_v11  ;;  %v4894_v15 = vld [vmem:[#allocation2 + $0xc0] sm:$0xf]  ;;  %v7003_v16 = vld [vmem:[#allocation2 + $0xcc] sm:$0xf0]  ;;  %475 = vmatpush.bf16.msra.mxu0 %v4903_v9  ;;  %v4907_v41 = vor.u32 %v7004_v36, %v4904_v37  ;;  %v7002_v42 = vld [vmem:[#allocation2 + $0xc4] sm:$0xf] }
  0x40   :  { %v4958_v17 = vld [vmem:[#allocation2 + $0x1c0] sm:$0xf]  ;;  %v4895_v18 = vor.u32 %v7003_v16, %v4894_v15  ;;  %v7019_v19 = vld [vmem:[#allocation2 + $0x1cc] sm:$0xf0]  ;;  %489 = vmatpush.bf16.msra.mxu1 %v4967_v13  ;;  %v4896_v46 = vld [vmem:[#allocation2 + $0xd0] sm:$0xf0] }
  0x41   :  { %v5022_v20 = vld [vmem:[#allocation2 + $0x2c0] sm:$0xf]  ;;  %v7035_v21 = vld [vmem:[#allocation2 + $0x2cc] sm:$0xf0]  ;;  %503 = vmatpush.bf16.msra.mxu2 %v5031_v14  ;;  %v4959_v22 = vor.u32 %v7019_v19, %v4958_v17  ;;  %517 = vmatpush.bf16.msra.mxu3 %v4907_v41  ;;  %v4899_v52 = vor.u32 %v7002_v42, %v4896_v46  ;;  %v7000_v54 = vld [vmem:[#allocation2 + $0xa4] sm:$0xf] }
  0x42   :  { %v5023_v23 = vor.u32 %v7035_v21, %v5022_v20  ;;  %v4886_v24 = vld [vmem:[#allocation2 + $0xa0] sm:$0xf]  ;;  %v7001_v25 = vld [vmem:[#allocation2 + $0xac] sm:$0xf0]  ;;  %v4888_v55 = vld [vmem:[#allocation2 + $0xb0] sm:$0xf0] }
  0x43   :  { %v4950_v26 = vld [vmem:[#allocation2 + $0x1a0] sm:$0xf]  ;;  %v7017_v27 = vld [vmem:[#allocation2 + $0x1ac] sm:$0xf0]  ;;  %476 = vmatpush.bf16.msra.mxu0 %v4895_v18  ;;  %v4887_v30 = vor.u32 %v7001_v25, %v4886_v24  ;;  %v4891_v59 = vor.u32 %v7000_v54, %v4888_v55  ;;  %v6998_v63 = vld [vmem:[#allocation2 + $0x84] sm:$0xf] }
  0x44   :  { %v5014_v28 = vld [vmem:[#allocation2 + $0x2a0] sm:$0xf]  ;;  %v7033_v29 = vld [vmem:[#allocation2 + $0x2ac] sm:$0xf0]  ;;  %490 = vmatpush.bf16.msra.mxu1 %v4959_v22  ;;  %v4951_v33 = vor.u32 %v7017_v27, %v4950_v26  ;;  %v4880_v6 = vld [vmem:[#allocation2 + $0x90] sm:$0xf0] }
  0x45   :  { %v4878_v31 = vld [vmem:[#allocation2 + $0x80] sm:$0xf]  ;;  %v6999_v32 = vld [vmem:[#allocation2 + $0x8c] sm:$0xf0]  ;;  %504 = vmatpush.bf16.msra.mxu2 %v5023_v23  ;;  %v5015_v34 = vor.u32 %v7033_v29, %v5014_v28  ;;  %518 = vmatpush.bf16.msra.mxu3 %v4899_v52  ;;  %v4883_v13 = vor.u32 %v6998_v63, %v4880_v6  ;;  %v6996_v17 = vld [vmem:[#allocation2 + $0x64] sm:$0xf]  ;;  %v8276_v52 = vpack.c.bf16 %v8264_v4, %v8257_v1 }
  0x46   :  { %v4942_v35 = vld [vmem:[#allocation2 + $0x180] sm:$0xf]  ;;  %v7015_v38 = vld [vmem:[#allocation2 + $0x18c] sm:$0xf0]  ;;  %v4879_v43 = vor.u32 %v6999_v32, %v4878_v31  ;;  %v4872_v18 = vld [vmem:[#allocation2 + $0x70] sm:$0xf0] }
  0x47   :  { %v5006_v39 = vld [vmem:[#allocation2 + $0x280] sm:$0xf]  ;;  %v7031_v40 = vld [vmem:[#allocation2 + $0x28c] sm:$0xf0]  ;;  %477 = vmatpush.bf16.msra.mxu0 %v4887_v30  ;;  %v4943_v47 = vor.u32 %v7015_v38, %v4942_v35  ;;  %v4875_v26 = vor.u32 %v6996_v17, %v4872_v18  ;;  %v6994_v30 = vld [vmem:[#allocation2 + $0x44] sm:$0xf] }
  0x48   :  { %v4870_v44 = vld [vmem:[#allocation2 + $0x60] sm:$0xf]  ;;  %v6997_v45 = vld [vmem:[#allocation2 + $0x6c] sm:$0xf0]  ;;  %491 = vmatpush.bf16.msra.mxu1 %v4951_v33  ;;  %v5007_v48 = vor.u32 %v7031_v40, %v5006_v39  ;;  %v4864_v31 = vld [vmem:[#allocation2 + $0x50] sm:$0xf0] }
  0x49   :  { %505 = vmatpush.bf16.msra.mxu2 %v5015_v34  ;;  %v4934_v49 = vld [vmem:[#allocation2 + $0x160] sm:$0xf]  ;;  %v7013_v50 = vld [vmem:[#allocation2 + $0x16c] sm:$0xf0]  ;;  %v4871_v56 = vor.u32 %v6997_v45, %v4870_v44  ;;  %519 = vmatpush.bf16.msra.mxu3 %v4891_v59  ;;  %v7020_v34 = vld [vmem:[#allocation2 + $0x1e4] sm:$0xf]  ;;  %v4867_v39 = vor.u32 %v6994_v30, %v4864_v31 }
  0x4a   :  { %v4998_v51 = vld [vmem:[#allocation2 + $0x260] sm:$0xf]  ;;  %v7029_v53 = vld [vmem:[#allocation2 + $0x26c] sm:$0xf0]  ;;  %v4935_v60 = vor.u32 %v7013_v50, %v4934_v49  ;;  %v4968_v35 = vld [vmem:[#allocation2 + $0x1f0] sm:$0xf0]  ;;  %v226_v50 = vpack.c.bf16 %v8262_v3, %v8255_v0 }
  0x4b   :  { %478 = vmatpush.bf16.msra.mxu0 %v4879_v43  ;;  %v4862_v57 = vld [vmem:[#allocation2 + $0x40] sm:$0xf]  ;;  %v6995_v58 = vld [vmem:[#allocation2 + $0x4c] sm:$0xf0]  ;;  %v4999_v61 = vor.u32 %v7029_v53, %v4998_v51  ;;  %v7036_v36 = vld [vmem:[#allocation2 + $0x2e4] sm:$0xf]  ;;  %v4971_v42 = vor.u32 %v7020_v34, %v4968_v35  ;;  %v8272_v51 = vpack.c.bf16 %v8266_v5, %v8259_v2 }
  0x4c   :  { %492 = vmatpush.bf16.msra.mxu1 %v4943_v47  ;;  %v4926_v62 = vld [vmem:[#allocation2 + $0x140] sm:$0xf]  ;;  %v7011_v7 = vld [vmem:[#allocation2 + $0x14c] sm:$0xf0]  ;;  %v4863_v10 = vor.u32 %v6995_v58, %v4862_v57  ;;  %v5032_v37 = vld [vmem:[#allocation2 + $0x2f0] sm:$0xf0] }
  0x4d   :  { %506 = vmatpush.bf16.msra.mxu2 %v5007_v48  ;;  %v4990_v8 = vld [vmem:[#allocation2 + $0x240] sm:$0xf]  ;;  %v7027_v9 = vld [vmem:[#allocation2 + $0x24c] sm:$0xf0]  ;;  %v4927_v14 = vor.u32 %v7011_v7, %v4926_v62  ;;  %520 = vmatpush.bf16.msra.mxu3 %v4883_v13  ;;  %v5035_v43 = vor.u32 %v7036_v36, %v5032_v37  ;;  %v7018_v44 = vld [vmem:[#allocation2 + $0x1c4] sm:$0xf] }
  0x4e   :  { %v4854_v11 = vld [vmem:[#allocation2 + $0x20] sm:$0xf]  ;;  %v6993_v12 = vld [vmem:[#allocation2 + $0x2c] sm:$0xf0]  ;;  %v4991_v15 = vor.u32 %v7027_v9, %v4990_v8  ;;  %v6992_v45 = vld [vmem:[#allocation2 + $0x24] sm:$0xf] }
  0x4f   :  { %479 = vmatpush.bf16.msra.mxu0 %v4871_v56  ;;  %v4918_v16 = vld [vmem:[#allocation2 + $0x120] sm:$0xf]  ;;  %v7009_v19 = vld [vmem:[#allocation2 + $0x12c] sm:$0xf0]  ;;  %v4855_v22 = vor.u32 %v6993_v12, %v4854_v11  ;;  %v4856_v46 = vld [vmem:[#allocation2 + $0x30] sm:$0xf0] }
  0x50   :  { %493 = vmatpush.bf16.msra.mxu1 %v4935_v60  ;;  %v4982_v20 = vld [vmem:[#allocation2 + $0x220] sm:$0xf]  ;;  %v7025_v21 = vld [vmem:[#allocation2 + $0x22c] sm:$0xf0]  ;;  %v4919_v27 = vor.u32 %v7009_v19, %v4918_v16  ;;  %v4960_v47 = vld [vmem:[#allocation2 + $0x1d0] sm:$0xf0]  ;;  %v4859_v53 = vor.u32 %v6992_v45, %v4856_v46 }
  0x51   :  { %507 = vmatpush.bf16.msra.mxu2 %v4999_v61  ;;  %v4846_v23 = vld [vmem:[#allocation2] sm:$0xf]  ;;  %v6991_v24 = vld [vmem:[#allocation2 + $0xc] sm:$0xf0]  ;;  %v4983_v28 = vor.u32 %v7025_v21, %v4982_v20  ;;  %521 = vmatpush.bf16.msra.mxu3 %v4875_v26  ;;  %v7034_v48 = vld [vmem:[#allocation2 + $0x2c4] sm:$0xf]  ;;  %v4963_v54 = vor.u32 %v7018_v44, %v4960_v47 }
  0x52   :  { %v4910_v25 = vld [vmem:[#allocation2 + $0x100] sm:$0xf]  ;;  %v7007_v29 = vld [vmem:[#allocation2 + $0x10c] sm:$0xf0]  ;;  %v4847_v38 = vor.u32 %v6991_v24, %v4846_v23  ;;  %v5024_v49 = vld [vmem:[#allocation2 + $0x2d0] sm:$0xf0] }
  0x53   :  { %480 = vmatpush.bf16.msra.mxu0 %v4863_v10  ;;  %v4974_v32 = vld [vmem:[#allocation2 + $0x200] sm:$0xf]  ;;  %v7023_v33 = vld [vmem:[#allocation2 + $0x20c] sm:$0xf0]  ;;  %v4911_v40 = vor.u32 %v7007_v29, %v4910_v25  ;;  %v5027_v55 = vor.u32 %v7034_v48, %v5024_v49  ;;  %v7016_v56 = vld [vmem:[#allocation2 + $0x1a4] sm:$0xf] }
  0x54   :  { %494 = vmatpush.bf16.msra.mxu1 %v4927_v14  ;;  %v4975_v41 = vor.u32 %v7023_v33, %v4974_v32  ;;  %v6990_v57 = vld [vmem:[#allocation2 + $0x4] sm:$0xf]  ;;  %v4848_v0 = vld [vmem:[#allocation2 + $0x10] sm:$0xf0]  ;;  %s8648_s3 = sld [smem:[#allocation57_spill]] }
  0x55   :  { %508 = vmatpush.bf16.msra.mxu2 %v4991_v15  ;;  %522 = vmatpush.bf16.msra.mxu3 %v4867_v39  ;;  %v4952_v3 = vld [vmem:[#allocation2 + $0x1b0] sm:$0xf0]  ;;  %v7032_v58 = vld [vmem:[#allocation2 + $0x2a4] sm:$0xf]  ;;  %v4851_v1 = vor.u32 %v6990_v57, %v4848_v0  ;;  %v229_v31 = vld [vmem:[#allocation10] sm:$0x3] }
  0x56   :  { %v5016_v2 = vld [vmem:[#allocation2 + $0x2b0] sm:$0xf0]  ;;  %v4955_v4 = vor.u32 %v7016_v56, %v4952_v3  ;;  %v7014_v59 = vld [vmem:[#allocation2 + $0x184] sm:$0xf]  ;;  %v231_v32 = vperm.slane %v229_v31, 0  ;;  %v232_v49 = vperm.slane %v229_v31, 1 }
  0x57   :  { %481 = vmatpush.bf16.msra.mxu0 %v4855_v22  ;;  %v5019_v5 = vor.u32 %v7032_v58, %v5016_v2  ;;  %v4944_v60 = vld [vmem:[#allocation2 + $0x190] sm:$0xf0]  ;;  %v7030_v61 = vld [vmem:[#allocation2 + $0x284] sm:$0xf] }
  0x58   :  { %495 = vmatpush.bf16.msra.mxu1 %v4919_v27  ;;  %v5008_v62 = vld [vmem:[#allocation2 + $0x290] sm:$0xf0]  ;;  %v4947_v63 = vor.u32 %v7014_v59, %v4944_v60  ;;  %v7012_v7 = vld [vmem:[#allocation2 + $0x164] sm:$0xf] }
  0x59   :  { %509 = vmatpush.bf16.msra.mxu2 %v4983_v28  ;;  %523 = vmatpush.bf16.msra.mxu3 %v4859_v53  ;;  %v5011_v6 = vor.u32 %v7030_v61, %v5008_v62  ;;  %v4936_v8 = vld [vmem:[#allocation2 + $0x170] sm:$0xf0]  ;;  %v7028_v9 = vld [vmem:[#allocation2 + $0x264] sm:$0xf] }
  0x5a   :  { %v5000_v10 = vld [vmem:[#allocation2 + $0x270] sm:$0xf0]  ;;  %v4939_v11 = vor.u32 %v7012_v7, %v4936_v8  ;;  %v7010_v13 = vld [vmem:[#allocation2 + $0x144] sm:$0xf]  ;;  %s578_s8 = sshll.u32 %s8648_s3, 4  ;;  %s579_s8 = int_to_ptr.hbm [resolvable:$true] %s578_s8 }
  0x5b   :  { %482 = vmatpush.bf16.msra.mxu0 %v4847_v38  ;;  %v5003_v12 = vor.u32 %v7028_v9, %v5000_v10  ;;  %v4928_v14 = vld [vmem:[#allocation2 + $0x150] sm:$0xf0]  ;;  %v7026_v15 = vld [vmem:[#allocation2 + $0x244] sm:$0xf] }
  0x5c   :  { %496 = vmatpush.bf16.msra.mxu1 %v4911_v40  ;;  %v4992_v16 = vld [vmem:[#allocation2 + $0x250] sm:$0xf0]  ;;  %v4931_v17 = vor.u32 %v7010_v13, %v4928_v14  ;;  %v7008_v19 = vld [vmem:[#allocation2 + $0x124] sm:$0xf] }
  0x5d   :  { %510 = vmatpush.bf16.msra.mxu2 %v4975_v41  ;;  %524 = vmatpush.bf16.msra.mxu3 %v4851_v1  ;;  %v4995_v18 = vor.u32 %v7026_v15, %v4992_v16  ;;  %v4920_v20 = vld [vmem:[#allocation2 + $0x130] sm:$0xf0]  ;;  %v7024_v21 = vld [vmem:[#allocation2 + $0x224] sm:$0xf] }
  0x5e   :  { %483 = vmatmul.bf16.vlgmr.msra.gmra.mxu0 %v226_v50  ;;  %v4984_v22 = vld [vmem:[#allocation2 + $0x230] sm:$0xf0]  ;;  %v4923_v23 = vor.u32 %v7008_v19, %v4920_v20  ;;  %v7006_v25 = vld [vmem:[#allocation2 + $0x104] sm:$0xf] }
  0x5f   :  { %531 = vmatpush.bf16.msrb.mxu0 %v4971_v42  ;;  %497 = vmatmul.bf16.vlgmr.msra.gmra.mxu1 %v8276_v52  ;;  %v4987_v24 = vor.u32 %v7024_v21, %v4984_v22  ;;  %v4912_v26 = vld [vmem:[#allocation2 + $0x110] sm:$0xf0]  ;;  %v7022_v27 = vld [vmem:[#allocation2 + $0x204] sm:$0xf] }
  0x60   :  { %545 = vmatpush.bf16.msrb.mxu1 %v5035_v43  ;;  %511 = vmatmul.bf16.vlgmr.msra.gmra.mxu2 %v8272_v51  ;;  %v4976_v28 = vld [vmem:[#allocation2 + $0x210] sm:$0xf0]  ;;  %v4915_v29 = vor.u32 %v7006_v25, %v4912_v26 }
  0x61   :  { %525 = vmatmul.bf16.vlgmr.msra.gmra.mxu3 %v226_v50  ;;  %v4979_v30 = vor.u32 %v7022_v27, %v4976_v28  ;;  %583 = dma.hbm_to_vmem [thread:$0]  %s579_s8, 16384, %s8244_s28, [#allocation4] }
  0x63   :  { %532 = vmatpush.bf16.msrb.mxu0 %v4963_v54 }
  0x64   :  { %546 = vmatpush.bf16.msrb.mxu1 %v5027_v55 }
  0x67   :  { %533 = vmatpush.bf16.msrb.mxu0 %v4955_v4 }
  0x68   :  { %547 = vmatpush.bf16.msrb.mxu1 %v5019_v5 }
  0x6b   :  { %534 = vmatpush.bf16.msrb.mxu0 %v4947_v63 }
  0x6c   :  { %548 = vmatpush.bf16.msrb.mxu1 %v5011_v6 }
  0x6f   :  { %535 = vmatpush.bf16.msrb.mxu0 %v4939_v11 }
  0x70   :  { %549 = vmatpush.bf16.msrb.mxu1 %v5003_v12 }
  0x73   :  { %536 = vmatpush.bf16.msrb.mxu0 %v4931_v17 }
  0x74   :  { %550 = vmatpush.bf16.msrb.mxu1 %v4995_v18 }
  0x77   :  { %537 = vmatpush.bf16.msrb.mxu0 %v4923_v23 }
  0x78   :  { %551 = vmatpush.bf16.msrb.mxu1 %v4987_v24 }
  0x7b   :  { %538 = vmatpush.bf16.msrb.mxu0 %v4915_v29 }
  0x7c   :  { %552 = vmatpush.bf16.msrb.mxu1 %v4979_v30 }
  0x7e   :  { %539 = vmatmul.bf16.vlgmr.msrb.gmra.mxu0 %v8276_v52 }
  0x7f   :  { %553 = vmatmul.bf16.vlgmr.msrb.gmra.mxu1 %v8272_v51 }
  0xdb   :  { %v484_v33 = vpop.f32.mrf.mxu0 }
  0xdc   :  { %v485_v34 = vadd.f32 %v484_v33, %v231_v32  ;;  %v498_v35 = vpop.f32.mrf.mxu1 }
  0xde   :  { %v499_v36 = vadd.f32 %v498_v35, %v485_v34 }
  0xe3   :  { %v512_v37 = vpop.f32.mrf.mxu2  ;;  %v486_v39 = vpop.f32.mrf.mxu0 }
  0xe4   :  { %v513_v38 = vadd.f32 %v512_v37, %v499_v36  ;;  %v487_v40 = vadd.f32 %v486_v39, %v231_v32  ;;  %v500_v41 = vpop.f32.mrf.mxu1  ;;  %v526_v50 = vpop.f32.mrf.mxu3 }
  0xe5   :  { %v527_v51 = vadd.f32 %v526_v50, %v232_v49 }
  0xe6   :  { %vm559_vm0 = vcmp.gt.f32.partialorder %v513_v38, 0.0  ;;  %v563_v42 = vmul.f32 0.2, %v513_v38  ;;  %v501_v44 = vadd.f32 %v500_v41, %v487_v40 }
  0xe8   :  { %v8286_v43 = vsel %vm559_vm0, %v513_v38, %v563_v42 }
  0xeb   :  { %v514_v45 = vpop.f32.mrf.mxu2 }
  0xec   :  { %v515_v46 = vadd.f32 %v514_v45, %v501_v44  ;;  %v528_v56 = vpop.f32.mrf.mxu3 }
  0xed   :  { %v529_v0 = vadd.f32 %v528_v56, %v232_v49 }
  0xee   :  { %vm561_vm1 = vcmp.gt.f32.partialorder %v515_v46, 0.0  ;;  %v565_v47 = vmul.f32 0.2, %v515_v46 }
  0xf0   :  { %v8288_v48 = vsel %vm561_vm1, %v515_v46, %v565_v47 }
  0xfb   :  { %v540_v52 = vpop.f32.mrf.mxu0 }
  0xfc   :  { %v554_v53 = vpop.f32.mrf.mxu1  ;;  %v541_v54 = vadd.f32 %v540_v52, %v527_v51 }
  0xfe   :  { %v555_v55 = vadd.f32 %v554_v53, %v541_v54 }
 0x100   :  { %vm560_vm2 = vcmp.gt.f32.partialorder %v555_v55, 0.0  ;;  %v564_v57 = vmul.f32 0.2, %v555_v55 }
 0x102   :  { %v8290_v3 = vsel %vm560_vm2, %v555_v55, %v564_v57 }
 0x103   :  { %v542_v58 = vpop.f32.mrf.mxu0 }
 0x104   :  { %v543_v2 = vadd.f32 %v542_v58, %v529_v0  ;;  %v556_v1 = vpop.f32.mrf.mxu1 }
 0x106   :  { %v557_v4 = vadd.f32 %v556_v1, %v543_v2 }
 0x108   :  { %vm562_vm3 = vcmp.gt.f32.partialorder %v557_v4, 0.0  ;;  %v566_v5 = vmul.f32 0.2, %v557_v4 }
 0x10a   :  { %v8292_v59 = vsel %vm562_vm3, %v557_v4, %v566_v5 }
 0x10b   :  { %8038 = dma.done.wait [#allocation4 + $0x1], 8192 }
 0x10c   :  { %8039 = vsyncadd [#allocation4 + $0x1], 4294959104  ;;  %v5150_v60 = vld [vmem:[#allocation3 + $0xe0] sm:$0xf]  ;;  %v7068_v61 = vld [vmem:[#allocation3 + $0xec] sm:$0xf0] }
 0x10d   :  { %v5278_v62 = vld [vmem:[#allocation3 + $0x1e0] sm:$0xf]  ;;  %v5151_v63 = vor.u32 %v7068_v61, %v5150_v60  ;;  %v7100_v6 = vld [vmem:[#allocation3 + $0x1ec] sm:$0xf0]  ;;  %v7066_v7 = vld [vmem:[#allocation3 + $0xe4] sm:$0xf] }
 0x10e   :  { %v5152_v8 = vld [vmem:[#allocation3 + $0xf0] sm:$0xf0]  ;;  %v5279_v9 = vor.u32 %v7100_v6, %v5278_v62  ;;  %v7098_v11 = vld [vmem:[#allocation3 + $0x1e4] sm:$0xf]  ;;  %v5134_v13 = vld [vmem:[#allocation3 + $0xc0] sm:$0xf] }
 0x10f   :  { %v5155_v10 = vor.u32 %v7066_v7, %v5152_v8  ;;  %v5280_v12 = vld [vmem:[#allocation3 + $0x1f0] sm:$0xf0]  ;;  %984 = vmatpush.bf16.msrb.mxu2 %v5151_v63  ;;  %v7064_v15 = vld [vmem:[#allocation3 + $0xcc] sm:$0xf0]  ;;  %v5262_v16 = vld [vmem:[#allocation3 + $0x1c0] sm:$0xf] }
 0x110   :  { %v5283_v14 = vor.u32 %v7098_v11, %v5280_v12  ;;  %v7096_v17 = vld [vmem:[#allocation3 + $0x1cc] sm:$0xf0]  ;;  %998 = vmatpush.bf16.msrb.mxu3 %v5279_v9  ;;  %v5135_v18 = vor.u32 %v7064_v15, %v5134_v13  ;;  %v7062_v20 = vld [vmem:[#allocation3 + $0xc4] sm:$0xf]  ;;  %v5136_v21 = vld [vmem:[#allocation3 + $0xd0] sm:$0xf0] }
 0x111   :  { %1012 = vmatpush.bf16.msra.mxu0 %v5155_v10  ;;  %v5263_v19 = vor.u32 %v7096_v17, %v5262_v16  ;;  %v7094_v22 = vld [vmem:[#allocation3 + $0x1c4] sm:$0xf]  ;;  %v5139_v23 = vor.u32 %v7062_v20, %v5136_v21  ;;  %v5264_v24 = vld [vmem:[#allocation3 + $0x1d0] sm:$0xf0]  ;;  %v5118_v25 = vld [vmem:[#allocation3 + $0xa0] sm:$0xf] }
 0x112   :  { %1026 = vmatpush.bf16.msra.mxu1 %v5283_v14  ;;  %v7060_v26 = vld [vmem:[#allocation3 + $0xac] sm:$0xf0]  ;;  %v5267_v27 = vor.u32 %v7094_v22, %v5264_v24  ;;  %v5246_v28 = vld [vmem:[#allocation3 + $0x1a0] sm:$0xf]  ;;  %v7058_v30 = vld [vmem:[#allocation3 + $0xa4] sm:$0xf] }
 0x113   :  { %v7092_v29 = vld [vmem:[#allocation3 + $0x1ac] sm:$0xf0]  ;;  %985 = vmatpush.bf16.msrb.mxu2 %v5135_v18  ;;  %v5119_v31 = vor.u32 %v7060_v26, %v5118_v25  ;;  %v5120_v32 = vld [vmem:[#allocation3 + $0xb0] sm:$0xf0]  ;;  %v7090_v33 = vld [vmem:[#allocation3 + $0x1a4] sm:$0xf] }
 0x114   :  { %v5248_v34 = vld [vmem:[#allocation3 + $0x1b0] sm:$0xf0]  ;;  %999 = vmatpush.bf16.msrb.mxu3 %v5263_v19  ;;  %v5247_v35 = vor.u32 %v7092_v29, %v5246_v28  ;;  %v5123_v36 = vor.u32 %v7058_v30, %v5120_v32  ;;  %v5102_v37 = vld [vmem:[#allocation3 + $0x80] sm:$0xf]  ;;  %v7056_v38 = vld [vmem:[#allocation3 + $0x8c] sm:$0xf0] }
 0x115   :  { %1013 = vmatpush.bf16.msra.mxu0 %v5139_v23  ;;  %v5230_v39 = vld [vmem:[#allocation3 + $0x180] sm:$0xf]  ;;  %v5251_v40 = vor.u32 %v7090_v33, %v5248_v34  ;;  %v7088_v41 = vld [vmem:[#allocation3 + $0x18c] sm:$0xf0]  ;;  %v7054_v42 = vld [vmem:[#allocation3 + $0x84] sm:$0xf]  ;;  %v5103_v47 = vor.u32 %v7056_v38, %v5102_v37 }
 0x116   :  { %1027 = vmatpush.bf16.msra.mxu1 %v5267_v27  ;;  %v5104_v44 = vld [vmem:[#allocation3 + $0x90] sm:$0xf0]  ;;  %v7086_v45 = vld [vmem:[#allocation3 + $0x184] sm:$0xf]  ;;  %v5231_v49 = vor.u32 %v7088_v41, %v5230_v39  ;;  %v5086_v51 = vld [vmem:[#allocation3 + $0x60] sm:$0xf] }
 0x117   :  { %v5232_v46 = vld [vmem:[#allocation3 + $0x190] sm:$0xf0]  ;;  %986 = vmatpush.bf16.msrb.mxu2 %v5119_v31  ;;  %v5107_v50 = vor.u32 %v7054_v42, %v5104_v44  ;;  %v7052_v52 = vld [vmem:[#allocation3 + $0x6c] sm:$0xf0]  ;;  %v5214_v53 = vld [vmem:[#allocation3 + $0x160] sm:$0xf] }
 0x118   :  { %1000 = vmatpush.bf16.msrb.mxu3 %v5247_v35  ;;  %v5235_v54 = vor.u32 %v7086_v45, %v5232_v46  ;;  %v7084_v55 = vld [vmem:[#allocation3 + $0x16c] sm:$0xf0]  ;;  %v7050_v56 = vld [vmem:[#allocation3 + $0x64] sm:$0xf]  ;;  %v5088_v57 = vld [vmem:[#allocation3 + $0x70] sm:$0xf0]  ;;  %v5087_v2 = vor.u32 %v7052_v52, %v5086_v51 }
 0x119   :  { %1014 = vmatpush.bf16.msra.mxu0 %v5123_v36  ;;  %v7082_v0 = vld [vmem:[#allocation3 + $0x164] sm:$0xf]  ;;  %v5216_v58 = vld [vmem:[#allocation3 + $0x170] sm:$0xf0]  ;;  %v5215_v1 = vor.u32 %v7084_v55, %v5214_v53  ;;  %v5091_v4 = vor.u32 %v7050_v56, %v5088_v57  ;;  %v5070_v5 = vld [vmem:[#allocation3 + $0x40] sm:$0xf] }
 0x11a   :  { %1028 = vmatpush.bf16.msra.mxu1 %v5251_v40  ;;  %v7048_v60 = vld [vmem:[#allocation3 + $0x4c] sm:$0xf0]  ;;  %v5198_v61 = vld [vmem:[#allocation3 + $0x140] sm:$0xf]  ;;  %v5219_v62 = vor.u32 %v7082_v0, %v5216_v58  ;;  %v7046_v6 = vld [vmem:[#allocation3 + $0x44] sm:$0xf]  ;;  %v8296_v0 = vpack.c.bf16 %v8288_v48, %v8286_v43 }
 0x11b   :  { %987 = vmatpush.bf16.msrb.mxu2 %v5103_v47  ;;  %v7080_v63 = vld [vmem:[#allocation3 + $0x14c] sm:$0xf0]  ;;  %v5072_v7 = vld [vmem:[#allocation3 + $0x50] sm:$0xf0]  ;;  %v7078_v8 = vld [vmem:[#allocation3 + $0x144] sm:$0xf]  ;;  %v5071_v10 = vor.u32 %v7048_v60, %v5070_v5 }
 0x11c   :  { %1001 = vmatpush.bf16.msrb.mxu3 %v5231_v49  ;;  %v5200_v9 = vld [vmem:[#allocation3 + $0x150] sm:$0xf0]  ;;  %v5199_v11 = vor.u32 %v7080_v63, %v5198_v61  ;;  %v5075_v12 = vor.u32 %v7046_v6, %v5072_v7  ;;  %v5054_v13 = vld [vmem:[#allocation3 + $0x20] sm:$0xf]  ;;  %v7044_v14 = vld [vmem:[#allocation3 + $0x2c] sm:$0xf0] }
 0x11d   :  { %1015 = vmatpush.bf16.msra.mxu0 %v5107_v50  ;;  %v5182_v15 = vld [vmem:[#allocation3 + $0x120] sm:$0xf]  ;;  %v5203_v16 = vor.u32 %v7078_v8, %v5200_v9  ;;  %v7076_v17 = vld [vmem:[#allocation3 + $0x12c] sm:$0xf0]  ;;  %v7042_v18 = vld [vmem:[#allocation3 + $0x24] sm:$0xf]  ;;  %v5055_v22 = vor.u32 %v7044_v14, %v5054_v13 }
 0x11e   :  { %1029 = vmatpush.bf16.msra.mxu1 %v5235_v54  ;;  %v5056_v19 = vld [vmem:[#allocation3 + $0x30] sm:$0xf0]  ;;  %v7074_v20 = vld [vmem:[#allocation3 + $0x124] sm:$0xf]  ;;  %v5038_v23 = vld [vmem:[#allocation3] sm:$0xf]  ;;  %v5183_v25 = vor.u32 %v7076_v17, %v5182_v15 }
 0x11f   :  { %988 = vmatpush.bf16.msrb.mxu2 %v5087_v2  ;;  %v5184_v21 = vld [vmem:[#allocation3 + $0x130] sm:$0xf0]  ;;  %v7040_v24 = vld [vmem:[#allocation3 + $0xc] sm:$0xf0]  ;;  %v5059_v26 = vor.u32 %v7042_v18, %v5056_v19  ;;  %v5166_v27 = vld [vmem:[#allocation3 + $0x100] sm:$0xf] }
 0x120   :  { %1002 = vmatpush.bf16.msrb.mxu3 %v5215_v1  ;;  %v7072_v28 = vld [vmem:[#allocation3 + $0x10c] sm:$0xf0]  ;;  %v7038_v29 = vld [vmem:[#allocation3 + $0x4] sm:$0xf]  ;;  %v5187_v30 = vor.u32 %v7074_v20, %v5184_v21  ;;  %v5040_v31 = vld [vmem:[#allocation3 + $0x10] sm:$0xf0]  ;;  %v5039_v37 = vor.u32 %v7040_v24, %v5038_v23  ;;  %v8300_v1 = vpack.c.bf16 %v8292_v59, %v8290_v3 }
 0x121   :  { %1016 = vmatpush.bf16.msra.mxu0 %v5091_v4  ;;  %v7070_v32 = vld [vmem:[#allocation3 + $0x104] sm:$0xf]  ;;  %v5168_v33 = vld [vmem:[#allocation3 + $0x110] sm:$0xf0]  ;;  %v5158_v34 = vld [vmem:[#allocation3 + $0xe8] sm:$0xf]  ;;  %v5167_v41 = vor.u32 %v7072_v28, %v5166_v27  ;;  %v5043_v42 = vor.u32 %v7038_v29, %v5040_v31 }
 0x122   :  { %1030 = vmatpush.bf16.msra.mxu1 %v5219_v62  ;;  %v7069_v35 = vld [vmem:[#allocation3 + $0xf4] sm:$0xf0]  ;;  %v5286_v36 = vld [vmem:[#allocation3 + $0x1e8] sm:$0xf]  ;;  %v7067_v39 = vld [vmem:[#allocation3 + $0xec] sm:$0xf]  ;;  %v5171_v46 = vor.u32 %v7070_v32, %v5168_v33 }
 0x123   :  { %989 = vmatpush.bf16.msrb.mxu2 %v5071_v10  ;;  %v7101_v38 = vld [vmem:[#allocation3 + $0x1f4] sm:$0xf0]  ;;  %v5160_v40 = vld [vmem:[#allocation3 + $0xf8] sm:$0xf0]  ;;  %v7099_v44 = vld [vmem:[#allocation3 + $0x1ec] sm:$0xf]  ;;  %v5159_v47 = vor.u32 %v7069_v35, %v5158_v34 }
 0x124   :  { %1003 = vmatpush.bf16.msrb.mxu3 %v5199_v11  ;;  %v5288_v45 = vld [vmem:[#allocation3 + $0x1f8] sm:$0xf0]  ;;  %v5287_v49 = vor.u32 %v7101_v38, %v5286_v36  ;;  %v5163_v50 = vor.u32 %v7067_v39, %v5160_v40  ;;  %v5142_v51 = vld [vmem:[#allocation3 + $0xc8] sm:$0xf]  ;;  %v7065_v52 = vld [vmem:[#allocation3 + $0xd4] sm:$0xf0] }
 0x125   :  { %1017 = vmatpush.bf16.msra.mxu0 %v5075_v12  ;;  %v5270_v53 = vld [vmem:[#allocation3 + $0x1c8] sm:$0xf]  ;;  %v5291_v54 = vor.u32 %v7099_v44, %v5288_v45  ;;  %v7097_v55 = vld [vmem:[#allocation3 + $0x1d4] sm:$0xf0]  ;;  %v7063_v56 = vld [vmem:[#allocation3 + $0xcc] sm:$0xf]  ;;  %v5143_v4 = vor.u32 %v7065_v52, %v5142_v51 }
 0x126   :  { %1031 = vmatpush.bf16.msra.mxu1 %v5203_v16  ;;  %v5144_v57 = vld [vmem:[#allocation3 + $0xd8] sm:$0xf0]  ;;  %v7095_v58 = vld [vmem:[#allocation3 + $0x1cc] sm:$0xf]  ;;  %v5271_v5 = vor.u32 %v7097_v55, %v5270_v53  ;;  %v5126_v61 = vld [vmem:[#allocation3 + $0xa8] sm:$0xf] }
 0x127   :  { %990 = vmatpush.bf16.msrb.mxu2 %v5055_v22  ;;  %v5272_v2 = vld [vmem:[#allocation3 + $0x1d8] sm:$0xf0]  ;;  %v5147_v60 = vor.u32 %v7063_v56, %v5144_v57  ;;  %v7061_v62 = vld [vmem:[#allocation3 + $0xb4] sm:$0xf0]  ;;  %v5254_v63 = vld [vmem:[#allocation3 + $0x1a8] sm:$0xf] }
 0x128   :  { %1004 = vmatpush.bf16.msrb.mxu3 %v5183_v25  ;;  %v5275_v43 = vor.u32 %v7095_v58, %v5272_v2  ;;  %v7093_v48 = vld [vmem:[#allocation3 + $0x1b4] sm:$0xf0]  ;;  %v7059_v6 = vld [vmem:[#allocation3 + $0xac] sm:$0xf]  ;;  %v5128_v7 = vld [vmem:[#allocation3 + $0xb8] sm:$0xf0]  ;;  %v5127_v8 = vor.u32 %v7061_v62, %v5126_v61 }
 0x129   :  { %1018 = vmatpush.bf16.msra.mxu0 %v5059_v26  ;;  %v7091_v3 = vld [vmem:[#allocation3 + $0x1ac] sm:$0xf]  ;;  %v5256_v59 = vld [vmem:[#allocation3 + $0x1b8] sm:$0xf0]  ;;  %v5255_v9 = vor.u32 %v7093_v48, %v5254_v63  ;;  %v5131_v10 = vor.u32 %v7059_v6, %v5128_v7  ;;  %v5110_v11 = vld [vmem:[#allocation3 + $0x88] sm:$0xf] }
 0x12a   :  { %1032 = vmatpush.bf16.msra.mxu1 %v5187_v30  ;;  %v7057_v12 = vld [vmem:[#allocation3 + $0x94] sm:$0xf0]  ;;  %v5238_v13 = vld [vmem:[#allocation3 + $0x188] sm:$0xf]  ;;  %v5259_v14 = vor.u32 %v7091_v3, %v5256_v59  ;;  %v7055_v16 = vld [vmem:[#allocation3 + $0x8c] sm:$0xf] }
 0x12b   :  { %991 = vmatpush.bf16.msrb.mxu2 %v5039_v37  ;;  %v7089_v15 = vld [vmem:[#allocation3 + $0x194] sm:$0xf0]  ;;  %v5112_v17 = vld [vmem:[#allocation3 + $0x98] sm:$0xf0]  ;;  %v7087_v18 = vld [vmem:[#allocation3 + $0x18c] sm:$0xf]  ;;  %v5111_v20 = vor.u32 %v7057_v12, %v5110_v11 }
 0x12c   :  { %1005 = vmatpush.bf16.msrb.mxu3 %v5167_v41  ;;  %v5240_v19 = vld [vmem:[#allocation3 + $0x198] sm:$0xf0]  ;;  %v5239_v21 = vor.u32 %v7089_v15, %v5238_v13  ;;  %v5115_v22 = vor.u32 %v7055_v16, %v5112_v17  ;;  %v5094_v23 = vld [vmem:[#allocation3 + $0x68] sm:$0xf]  ;;  %v7053_v24 = vld [vmem:[#allocation3 + $0x74] sm:$0xf0] }
 0x12d   :  { %1019 = vmatpush.bf16.msra.mxu0 %v5043_v42  ;;  %v5222_v25 = vld [vmem:[#allocation3 + $0x168] sm:$0xf]  ;;  %v5243_v26 = vor.u32 %v7087_v18, %v5240_v19  ;;  %v7085_v27 = vld [vmem:[#allocation3 + $0x174] sm:$0xf0]  ;;  %v7051_v28 = vld [vmem:[#allocation3 + $0x6c] sm:$0xf]  ;;  %v5095_v32 = vor.u32 %v7053_v24, %v5094_v23 }
 0x12e   :  { %1033 = vmatpush.bf16.msra.mxu1 %v5171_v46  ;;  %992 = vmatmul.bf16.vlgmr.msrb.gmra.mxu2 %v8296_v0  ;;  %v5096_v29 = vld [vmem:[#allocation3 + $0x78] sm:$0xf0]  ;;  %v7083_v30 = vld [vmem:[#allocation3 + $0x16c] sm:$0xf]  ;;  %v5223_v33 = vor.u32 %v7085_v27, %v5222_v25  ;;  %v5078_v35 = vld [vmem:[#allocation3 + $0x48] sm:$0xf] }
 0x12f   :  { %1040 = vmatpush.bf16.msra.mxu2 %v5159_v47  ;;  %1006 = vmatmul.bf16.vlgmr.msrb.gmra.mxu3 %v8300_v1  ;;  %v5224_v31 = vld [vmem:[#allocation3 + $0x178] sm:$0xf0]  ;;  %v5099_v34 = vor.u32 %v7051_v28, %v5096_v29  ;;  %v7049_v36 = vld [vmem:[#allocation3 + $0x54] sm:$0xf0]  ;;  %v5206_v37 = vld [vmem:[#allocation3 + $0x148] sm:$0xf] }
 0x130   :  { %1054 = vmatpush.bf16.msra.mxu3 %v5287_v49  ;;  %1020 = vmatmul.bf16.vlgmr.msra.gmra.mxu0 %v8296_v0  ;;  %v5227_v38 = vor.u32 %v7083_v30, %v5224_v31  ;;  %v7081_v39 = vld [vmem:[#allocation3 + $0x154] sm:$0xf0]  ;;  %v7047_v40 = vld [vmem:[#allocation3 + $0x4c] sm:$0xf]  ;;  %v5080_v41 = vld [vmem:[#allocation3 + $0x58] sm:$0xf0]  ;;  %v5079_v45 = vor.u32 %v7049_v36, %v5078_v35 }
 0x131   :  { %1068 = vmatpush.bf16.msrb.mxu0 %v5163_v50  ;;  %1034 = vmatmul.bf16.vlgmr.msra.gmra.mxu1 %v8300_v1  ;;  %v7079_v42 = vld [vmem:[#allocation3 + $0x14c] sm:$0xf]  ;;  %v5208_v44 = vld [vmem:[#allocation3 + $0x158] sm:$0xf0]  ;;  %v5207_v46 = vor.u32 %v7081_v39, %v5206_v37  ;;  %v5083_v47 = vor.u32 %v7047_v40, %v5080_v41  ;;  %v5062_v49 = vld [vmem:[#allocation3 + $0x28] sm:$0xf] }
 0x132   :  { %1082 = vmatpush.bf16.msrb.mxu1 %v5291_v54  ;;  %v7045_v50 = vld [vmem:[#allocation3 + $0x34] sm:$0xf0]  ;;  %v5190_v51 = vld [vmem:[#allocation3 + $0x128] sm:$0xf]  ;;  %v5211_v52 = vor.u32 %v7079_v42, %v5208_v44  ;;  %v7043_v54 = vld [vmem:[#allocation3 + $0x2c] sm:$0xf] }
 0x133   :  { %1041 = vmatpush.bf16.msra.mxu2 %v5143_v4  ;;  %v7077_v53 = vld [vmem:[#allocation3 + $0x134] sm:$0xf0]  ;;  %v5064_v55 = vld [vmem:[#allocation3 + $0x38] sm:$0xf0]  ;;  %v7075_v56 = vld [vmem:[#allocation3 + $0x12c] sm:$0xf]  ;;  %v5063_v58 = vor.u32 %v7045_v50, %v5062_v49 }
 0x134   :  { %1055 = vmatpush.bf16.msra.mxu3 %v5271_v5  ;;  %v5192_v57 = vld [vmem:[#allocation3 + $0x138] sm:$0xf0]  ;;  %v5191_v2 = vor.u32 %v7077_v53, %v5190_v51  ;;  %v5067_v4 = vor.u32 %v7043_v54, %v5064_v55  ;;  %v5046_v5 = vld [vmem:[#allocation3 + $0x8] sm:$0xf]  ;;  %v7073_v63 = vld [vmem:[#allocation3 + $0x114] sm:$0xf0] }
 0x135   :  { %1069 = vmatpush.bf16.msrb.mxu0 %v5147_v60  ;;  %v7041_v60 = vld [vmem:[#allocation3 + $0x14] sm:$0xf0]  ;;  %v5174_v61 = vld [vmem:[#allocation3 + $0x108] sm:$0xf]  ;;  %v5195_v62 = vor.u32 %v7075_v56, %v5192_v57  ;;  %v5048_v48 = vld [vmem:[#allocation3 + $0x18] sm:$0xf0] }
 0x136   :  { %1083 = vmatpush.bf16.msrb.mxu1 %v5275_v43  ;;  %v7039_v43 = vld [vmem:[#allocation3 + $0xc] sm:$0xf]  ;;  %v5176_v7 = vld [vmem:[#allocation3 + $0x118] sm:$0xf0]  ;;  %v5047_v3 = vor.u32 %v7041_v60, %v5046_v5  ;;  %v5175_v59 = vor.u32 %v7073_v63, %v5174_v61  ;;  %s8649_s19 = sld [smem:[#allocation58_spill]] }
 0x137   :  { %1042 = vmatpush.bf16.msra.mxu2 %v5127_v8  ;;  %v7071_v6 = vld [vmem:[#allocation3 + $0x10c] sm:$0xf]  ;;  %v5051_v8 = vor.u32 %v7039_v43, %v5048_v48 }
 0x138   :  { %1056 = vmatpush.bf16.msra.mxu3 %v5255_v9  ;;  %v5179_v9 = vor.u32 %v7071_v6, %v5176_v7 }
 0x139   :  { %1070 = vmatpush.bf16.msrb.mxu0 %v5131_v10  ;;  %v654_v10 = vld [vmem:[%s8618_s14] sm:$0xf] }
 0x13a   :  { %1084 = vmatpush.bf16.msrb.mxu1 %v5259_v14  ;;  %v657_v11 = vperm.slane %v654_v10, 1  ;;  %v659_v35 = vperm.slane %v654_v10, 3  ;;  %v658_v39 = vperm.slane %v654_v10, 2 }
 0x13b   :  { %1043 = vmatpush.bf16.msra.mxu2 %v5111_v20 }
 0x13c   :  { %1057 = vmatpush.bf16.msra.mxu3 %v5239_v21  ;;  %s1120_s29 = sshll.u32 %s8649_s19, 4  ;;  %s1121_s29 = int_to_ptr.hbm [resolvable:$true] %s1120_s29 }
 0x13d   :  { %1071 = vmatpush.bf16.msrb.mxu0 %v5115_v22  ;;  %1127 = dma.hbm_to_vmem [thread:$0]  %s1121_s29, 8192, %s8253_s13, [#allocation4 + $0x1], %s8063_s30, %s8073_s4, %s8064_s2 }
 0x13e   :  { %1085 = vmatpush.bf16.msrb.mxu1 %v5243_v26 }
 0x13f   :  { %1044 = vmatpush.bf16.msra.mxu2 %v5095_v32 }
 0x140   :  { %1058 = vmatpush.bf16.msra.mxu3 %v5223_v33 }
 0x141   :  { %1072 = vmatpush.bf16.msrb.mxu0 %v5099_v34 }
 0x142   :  { %1086 = vmatpush.bf16.msrb.mxu1 %v5227_v38 }
 0x143   :  { %1045 = vmatpush.bf16.msra.mxu2 %v5079_v45 }
 0x144   :  { %1059 = vmatpush.bf16.msra.mxu3 %v5207_v46 }
 0x145   :  { %1073 = vmatpush.bf16.msrb.mxu0 %v5083_v47 }
 0x146   :  { %1087 = vmatpush.bf16.msrb.mxu1 %v5211_v52 }
 0x147   :  { %1046 = vmatpush.bf16.msra.mxu2 %v5063_v58 }
 0x148   :  { %1060 = vmatpush.bf16.msra.mxu3 %v5191_v2 }
 0x149   :  { %1074 = vmatpush.bf16.msrb.mxu0 %v5067_v4 }
 0x14a   :  { %1088 = vmatpush.bf16.msrb.mxu1 %v5195_v62 }
 0x14b   :  { %1047 = vmatpush.bf16.msra.mxu2 %v5047_v3 }
 0x14c   :  { %1061 = vmatpush.bf16.msra.mxu3 %v5175_v59 }
 0x14d   :  { %1075 = vmatpush.bf16.msrb.mxu0 %v5051_v8 }
 0x14e   :  { %1089 = vmatpush.bf16.msrb.mxu1 %v5179_v9  ;;  %1048 = vmatmul.bf16.vlgmr.msra.gmra.mxu2 %v8296_v0 }
 0x14f   :  { %1062 = vmatmul.bf16.vlgmr.msra.gmra.mxu3 %v8300_v1 }
 0x150   :  { %1076 = vmatmul.bf16.vlgmr.msrb.gmra.mxu0 %v8296_v0  ;;  %v656_v0 = vperm.slane %v654_v10, 0 }
 0x151   :  { %1090 = vmatmul.bf16.vlgmr.msrb.gmra.mxu1 %v8300_v1 }
 0x1ad   :  { %v1021_v12 = vpop.f32.mrf.mxu0 }
 0x1ae   :  { %v1022_v13 = vadd.f32 %v1021_v12, %v657_v11  ;;  %v1035_v14 = vpop.f32.mrf.mxu1 }
 0x1b0   :  { %v1036_v15 = vadd.f32 %v1035_v14, %v1022_v13 }
 0x1b1   :  { %v993_v1 = vpop.f32.mrf.mxu2 }
 0x1b2   :  { %vm1097_vm4 = vcmp.gt.f32.partialorder %v1036_v15, 0.0  ;;  %v1105_v16 = vmul.f32 0.2, %v1036_v15  ;;  %v994_v17 = vadd.f32 %v993_v1, %v656_v0  ;;  %v1007_v18 = vpop.f32.mrf.mxu3 }
 0x1b4   :  { %v8320_v19 = vsel %vm1097_vm4, %v1036_v15, %v1105_v16  ;;  %v1008_v20 = vadd.f32 %v1007_v18, %v994_v17 }
 0x1b5   :  { %v1023_v21 = vpop.f32.mrf.mxu0 }
 0x1b6   :  { %v1024_v22 = vadd.f32 %v1023_v21, %v657_v11  ;;  %v1037_v23 = vpop.f32.mrf.mxu1  ;;  %vm1096_vm5 = vcmp.gt.f32.partialorder %v1008_v20, 0.0  ;;  %v1104_v24 = vmul.f32 0.2, %v1008_v20 }
 0x1b8   :  { %v1038_v25 = vadd.f32 %v1037_v23, %v1024_v22  ;;  %v8322_v26 = vsel %vm1096_vm5, %v1008_v20, %v1104_v24 }
 0x1b9   :  { %v995_v27 = vpop.f32.mrf.mxu2 }
 0x1ba   :  { %vm1101_vm6 = vcmp.gt.f32.partialorder %v1038_v25, 0.0  ;;  %v1109_v28 = vmul.f32 0.2, %v1038_v25  ;;  %v996_v29 = vadd.f32 %v995_v27, %v656_v0  ;;  %v1009_v30 = vpop.f32.mrf.mxu3 }
 0x1bc   :  { %v8324_v31 = vsel %vm1101_vm6, %v1038_v25, %v1109_v28  ;;  %v1010_v32 = vadd.f32 %v1009_v30, %v996_v29 }
 0x1be   :  { %vm1100_vm7 = vcmp.gt.f32.partialorder %v1010_v32, 0.0  ;;  %v1108_v33 = vmul.f32 0.2, %v1010_v32 }
 0x1c0   :  { %v8326_v34 = vsel %vm1100_vm7, %v1010_v32, %v1108_v33 }
 0x1cd   :  { %v1077_v36 = vpop.f32.mrf.mxu0 }
 0x1ce   :  { %v1078_v37 = vadd.f32 %v1077_v36, %v659_v35  ;;  %v1091_v38 = vpop.f32.mrf.mxu1 }
 0x1d0   :  { %v1092_v40 = vadd.f32 %v1091_v38, %v1078_v37 }
 0x1d1   :  { %v1049_v42 = vpop.f32.mrf.mxu2 }
 0x1d2   :  { %vm1099_vm8 = vcmp.gt.f32.partialorder %v1092_v40, 0.0  ;;  %v1107_v41 = vmul.f32 0.2, %v1092_v40  ;;  %v1050_v44 = vadd.f32 %v1049_v42, %v658_v39  ;;  %v1063_v45 = vpop.f32.mrf.mxu3 }
 0x1d4   :  { %v8328_v46 = vsel %vm1099_vm8, %v1092_v40, %v1107_v41  ;;  %v1064_v47 = vadd.f32 %v1063_v45, %v1050_v44 }
 0x1d5   :  { %v1079_v49 = vpop.f32.mrf.mxu0 }
 0x1d6   :  { %v1080_v50 = vadd.f32 %v1079_v49, %v659_v35  ;;  %vm1098_vm9 = vcmp.gt.f32.partialorder %v1064_v47, 0.0  ;;  %v1106_v51 = vmul.f32 0.2, %v1064_v47  ;;  %v1093_v52 = vpop.f32.mrf.mxu1 }
 0x1d8   :  { %v1094_v53 = vadd.f32 %v1093_v52, %v1080_v50  ;;  %v8330_v54 = vsel %vm1098_vm9, %v1064_v47, %v1106_v51 }
 0x1d9   :  { %v1051_v56 = vpop.f32.mrf.mxu2 }
 0x1da   :  { %vm1103_vm10 = vcmp.gt.f32.partialorder %v1094_v53, 0.0  ;;  %v1111_v55 = vmul.f32 0.2, %v1094_v53  ;;  %v1052_v57 = vadd.f32 %v1051_v56, %v658_v39  ;;  %v1065_v2 = vpop.f32.mrf.mxu3 }
 0x1dc   :  { %v8332_v58 = vsel %vm1103_vm10, %v1094_v53, %v1111_v55  ;;  %v1066_v4 = vadd.f32 %v1065_v2, %v1052_v57 }
 0x1de   :  { %vm1102_vm11 = vcmp.gt.f32.partialorder %v1066_v4, 0.0  ;;  %v1110_v5 = vmul.f32 0.2, %v1066_v4 }
 0x1e0   :  { %v8334_v60 = vsel %vm1102_vm11, %v1066_v4, %v1110_v5 }
 0x1e1   :  { %8040 = dma.done.wait [#allocation4], 16384 }
 0x1e2   :  { %8041 = vsyncadd [#allocation4], 4294950912  ;;  %v5406_v61 = vld [vmem:[#allocation2 + $0xe0] sm:$0xf]  ;;  %v7132_v62 = vld [vmem:[#allocation2 + $0xec] sm:$0xf0] }
 0x1e3   :  { %v5534_v63 = vld [vmem:[#allocation2 + $0x1e0] sm:$0xf]  ;;  %v5407_v43 = vor.u32 %v7132_v62, %v5406_v61  ;;  %v7164_v48 = vld [vmem:[#allocation2 + $0x1ec] sm:$0xf0]  ;;  %s8650_s9 = sld [smem:[#allocation59_spill]]  ;;  %s8075_s1 = smov 64  }
 0x1e4   :  { %v5662_v6 = vld [vmem:[#allocation2 + $0x2e0] sm:$0xf]  ;;  %v7196_v7 = vld [vmem:[#allocation2 + $0x2ec] sm:$0xf0]  ;;  %v5535_v3 = vor.u32 %v7164_v48, %v5534_v63  ;;  %s8076_s27 = smov 4  }
 0x1e5   :  { %v5663_v59 = vor.u32 %v7196_v7, %v5662_v6  ;;  %v5390_v8 = vld [vmem:[#allocation2 + $0xc0] sm:$0xf]  ;;  %v7128_v9 = vld [vmem:[#allocation2 + $0xcc] sm:$0xf0]  ;;  %1914 = vmatpush.bf16.msrb.mxu2 %v5407_v43 }
 0x1e6   :  { %v5518_v10 = vld [vmem:[#allocation2 + $0x1c0] sm:$0xf]  ;;  %v5391_v11 = vor.u32 %v7128_v9, %v5390_v8  ;;  %v7160_v12 = vld [vmem:[#allocation2 + $0x1cc] sm:$0xf0]  ;;  %1928 = vmatpush.bf16.msrb.mxu3 %v5535_v3 }
 0x1e7   :  { %v5790_v13 = vld [vmem:[#allocation2 + $0x3e0] sm:$0xf]  ;;  %v7228_v14 = vld [vmem:[#allocation2 + $0x3ec] sm:$0xf0]  ;;  %1942 = vmatpush.bf16.msra.mxu0 %v5663_v59  ;;  %v5519_v0 = vor.u32 %v7160_v12, %v5518_v10 }
 0x1e8   :  { %v5791_v15 = vor.u32 %v7228_v14, %v5790_v13  ;;  %v5646_v1 = vld [vmem:[#allocation2 + $0x2c0] sm:$0xf]  ;;  %v7192_v16 = vld [vmem:[#allocation2 + $0x2cc] sm:$0xf0] }
 0x1e9   :  { %v5374_v17 = vld [vmem:[#allocation2 + $0xa0] sm:$0xf]  ;;  %v5647_v18 = vor.u32 %v7192_v16, %v5646_v1  ;;  %v7124_v20 = vld [vmem:[#allocation2 + $0xac] sm:$0xf0]  ;;  %1915 = vmatpush.bf16.msrb.mxu2 %v5391_v11  ;;  %s2162_s10 = sshll.u32 %s8650_s9, 4  ;;  %s2163_s10 = int_to_ptr.hbm [resolvable:$true] %s2162_s10 }
 0x1ea   :  { %v5502_v21 = vld [vmem:[#allocation2 + $0x1a0] sm:$0xf]  ;;  %v7156_v22 = vld [vmem:[#allocation2 + $0x1ac] sm:$0xf0]  ;;  %1956 = vmatpush.bf16.msra.mxu1 %v5791_v15  ;;  %v5375_v27 = vor.u32 %v7124_v20, %v5374_v17  ;;  %1929 = vmatpush.bf16.msrb.mxu3 %v5519_v0 }
 0x1eb   :  { %v5774_v23 = vld [vmem:[#allocation2 + $0x3c0] sm:$0xf]  ;;  %v7224_v24 = vld [vmem:[#allocation2 + $0x3cc] sm:$0xf0]  ;;  %1943 = vmatpush.bf16.msra.mxu0 %v5647_v18  ;;  %v5503_v33 = vor.u32 %v7156_v22, %v5502_v21 }
 0x1ec   :  { %v5630_v25 = vld [vmem:[#allocation2 + $0x2a0] sm:$0xf]  ;;  %v5775_v28 = vor.u32 %v7224_v24, %v5774_v23  ;;  %v7188_v29 = vld [vmem:[#allocation2 + $0x2ac] sm:$0xf0] }
 0x1ed   :  { %v5358_v30 = vld [vmem:[#allocation2 + $0x80] sm:$0xf]  ;;  %v7120_v32 = vld [vmem:[#allocation2 + $0x8c] sm:$0xf0]  ;;  %v5631_v35 = vor.u32 %v7188_v29, %v5630_v25  ;;  %1916 = vmatpush.bf16.msrb.mxu2 %v5375_v27 }
 0x1ee   :  { %v5486_v36 = vld [vmem:[#allocation2 + $0x180] sm:$0xf]  ;;  %v7152_v37 = vld [vmem:[#allocation2 + $0x18c] sm:$0xf0]  ;;  %1957 = vmatpush.bf16.msra.mxu1 %v5775_v28  ;;  %v5359_v44 = vor.u32 %v7120_v32, %v5358_v30  ;;  %1930 = vmatpush.bf16.msrb.mxu3 %v5503_v33  ;;  %v7130_v30 = vld [vmem:[#allocation2 + $0xe4] sm:$0xf] }
 0x1ef   :  { %v5758_v38 = vld [vmem:[#allocation2 + $0x3a0] sm:$0xf]  ;;  %v7220_v39 = vld [vmem:[#allocation2 + $0x3ac] sm:$0xf0]  ;;  %1944 = vmatpush.bf16.msra.mxu0 %v5631_v35  ;;  %v5487_v49 = vor.u32 %v7152_v37, %v5486_v36  ;;  %v5408_v32 = vld [vmem:[#allocation2 + $0xf0] sm:$0xf0] }
 0x1f0   :  { %v5614_v40 = vld [vmem:[#allocation2 + $0x280] sm:$0xf]  ;;  %v7184_v41 = vld [vmem:[#allocation2 + $0x28c] sm:$0xf0]  ;;  %v5759_v42 = vor.u32 %v7220_v39, %v5758_v38  ;;  %v7162_v33 = vld [vmem:[#allocation2 + $0x1e4] sm:$0xf] }
 0x1f1   :  { %v5742_v45 = vld [vmem:[#allocation2 + $0x380] sm:$0xf]  ;;  %v7216_v47 = vld [vmem:[#allocation2 + $0x38c] sm:$0xf0]  ;;  %v5615_v50 = vor.u32 %v7184_v41, %v5614_v40  ;;  %1917 = vmatpush.bf16.msrb.mxu2 %v5359_v44  ;;  %v5536_v35 = vld [vmem:[#allocation2 + $0x1f0] sm:$0xf0] }
 0x1f2   :  { %v5342_v51 = vld [vmem:[#allocation2 + $0x60] sm:$0xf]  ;;  %v7116_v52 = vld [vmem:[#allocation2 + $0x6c] sm:$0xf0]  ;;  %1958 = vmatpush.bf16.msra.mxu1 %v5759_v42  ;;  %v5743_v2 = vor.u32 %v7216_v47, %v5742_v45  ;;  %1931 = vmatpush.bf16.msrb.mxu3 %v5487_v49  ;;  %v7194_v39 = vld [vmem:[#allocation2 + $0x2e4] sm:$0xf]  ;;  %v5411_v47 = vor.u32 %v7130_v30, %v5408_v32 }
 0x1f3   :  { %v5470_v53 = vld [vmem:[#allocation2 + $0x160] sm:$0xf]  ;;  %v7148_v55 = vld [vmem:[#allocation2 + $0x16c] sm:$0xf0]  ;;  %v5343_v4 = vor.u32 %v7116_v52, %v5342_v51  ;;  %1945 = vmatpush.bf16.msra.mxu0 %v5615_v50  ;;  %v5664_v41 = vld [vmem:[#allocation2 + $0x2f0] sm:$0xf0]  ;;  %v5539_v51 = vor.u32 %v7162_v33, %v5536_v35 }
 0x1f4   :  { %v5598_v56 = vld [vmem:[#allocation2 + $0x260] sm:$0xf]  ;;  %v7180_v57 = vld [vmem:[#allocation2 + $0x26c] sm:$0xf0]  ;;  %v5471_v62 = vor.u32 %v7148_v55, %v5470_v53  ;;  %v7226_v49 = vld [vmem:[#allocation2 + $0x3e4] sm:$0xf] }
 0x1f5   :  { %v5726_v5 = vld [vmem:[#allocation2 + $0x360] sm:$0xf]  ;;  %v7212_v61 = vld [vmem:[#allocation2 + $0x36c] sm:$0xf0]  ;;  %v5599_v63 = vor.u32 %v7180_v57, %v5598_v56  ;;  %1918 = vmatpush.bf16.msrb.mxu2 %v5343_v4  ;;  %v5792_v50 = vld [vmem:[#allocation2 + $0x3f0] sm:$0xf0]  ;;  %v5667_v56 = vor.u32 %v7194_v39, %v5664_v41 }
 0x1f6   :  { %v5326_v43 = vld [vmem:[#allocation2 + $0x40] sm:$0xf]  ;;  %v7112_v48 = vld [vmem:[#allocation2 + $0x4c] sm:$0xf0]  ;;  %1959 = vmatpush.bf16.msra.mxu1 %v5743_v2  ;;  %v5727_v8 = vor.u32 %v7212_v61, %v5726_v5  ;;  %1932 = vmatpush.bf16.msrb.mxu3 %v5471_v62  ;;  %v7126_v53 = vld [vmem:[#allocation2 + $0xc4] sm:$0xf]  ;;  %v5795_v5 = vor.u32 %v7226_v49, %v5792_v50 }
 0x1f7   :  { %v5454_v6 = vld [vmem:[#allocation2 + $0x140] sm:$0xf]  ;;  %v7144_v7 = vld [vmem:[#allocation2 + $0x14c] sm:$0xf0]  ;;  %v5327_v9 = vor.u32 %v7112_v48, %v5326_v43  ;;  %1946 = vmatpush.bf16.msra.mxu0 %v5599_v63  ;;  %v5392_v55 = vld [vmem:[#allocation2 + $0xd0] sm:$0xf0]  ;;  %v8338_v63 = vpack.c.bf16 %v8326_v34, %v8322_v26 }
 0x1f8   :  { %v5582_v3 = vld [vmem:[#allocation2 + $0x240] sm:$0xf]  ;;  %v7176_v59 = vld [vmem:[#allocation2 + $0x24c] sm:$0xf0]  ;;  %v5455_v12 = vor.u32 %v7144_v7, %v5454_v6  ;;  %v7158_v2 = vld [vmem:[#allocation2 + $0x1c4] sm:$0xf]  ;;  %v5395_v43 = vor.u32 %v7126_v53, %v5392_v55  ;;  %v8342_v7 = vpack.c.bf16 %v8324_v31, %v8320_v19 }
 0x1f9   :  { %v5710_v10 = vld [vmem:[#allocation2 + $0x340] sm:$0xf]  ;;  %v7208_v11 = vld [vmem:[#allocation2 + $0x34c] sm:$0xf0]  ;;  %v5583_v13 = vor.u32 %v7176_v59, %v5582_v3  ;;  %1919 = vmatpush.bf16.msrb.mxu2 %v5327_v9  ;;  %v5520_v4 = vld [vmem:[#allocation2 + $0x1d0] sm:$0xf0]  ;;  %v8346_v9 = vpack.c.bf16 %v8334_v60, %v8330_v54 }
 0x1fa   :  { %v5310_v14 = vld [vmem:[#allocation2 + $0x20] sm:$0xf]  ;;  %v7108_v0 = vld [vmem:[#allocation2 + $0x2c] sm:$0xf0]  ;;  %1960 = vmatpush.bf16.msra.mxu1 %v5727_v8  ;;  %v5711_v18 = vor.u32 %v7208_v11, %v5710_v10  ;;  %1933 = vmatpush.bf16.msrb.mxu3 %v5455_v12  ;;  %v7190_v61 = vld [vmem:[#allocation2 + $0x2c4] sm:$0xf]  ;;  %v5523_v3 = vor.u32 %v7158_v2, %v5520_v4  ;;  %v8350_v11 = vpack.c.bf16 %v8332_v58, %v8328_v46 }
 0x1fb   :  { %v5438_v15 = vld [vmem:[#allocation2 + $0x120] sm:$0xf]  ;;  %v7140_v1 = vld [vmem:[#allocation2 + $0x12c] sm:$0xf0]  ;;  %v5311_v21 = vor.u32 %v7108_v0, %v5310_v14  ;;  %1947 = vmatpush.bf16.msra.mxu0 %v5583_v13  ;;  %v5648_v62 = vld [vmem:[#allocation2 + $0x2d0] sm:$0xf0] }
 0x1fc   :  { %v5566_v16 = vld [vmem:[#allocation2 + $0x220] sm:$0xf]  ;;  %v7172_v17 = vld [vmem:[#allocation2 + $0x22c] sm:$0xf0]  ;;  %v5439_v25 = vor.u32 %v7140_v1, %v5438_v15  ;;  %v7222_v48 = vld [vmem:[#allocation2 + $0x3c4] sm:$0xf]  ;;  %v5651_v26 = vor.u32 %v7190_v61, %v5648_v62 }
 0x1fd   :  { %v5294_v20 = vld [vmem:[#allocation2] sm:$0xf]  ;;  %v7104_v22 = vld [vmem:[#allocation2 + $0xc] sm:$0xf0]  ;;  %v5567_v27 = vor.u32 %v7172_v17, %v5566_v16  ;;  %1920 = vmatpush.bf16.msrb.mxu2 %v5311_v21  ;;  %v5776_v6 = vld [vmem:[#allocation2 + $0x3d0] sm:$0xf0] }
 0x1fe   :  { %v5694_v23 = vld [vmem:[#allocation2 + $0x320] sm:$0xf]  ;;  %v7204_v24 = vld [vmem:[#allocation2 + $0x32c] sm:$0xf0]  ;;  %1961 = vmatpush.bf16.msra.mxu1 %v5711_v18  ;;  %v5295_v40 = vor.u32 %v7104_v22, %v5294_v20  ;;  %1934 = vmatpush.bf16.msrb.mxu3 %v5439_v25  ;;  %v7122_v59 = vld [vmem:[#allocation2 + $0xa4] sm:$0xf]  ;;  %v5779_v19 = vor.u32 %v7222_v48, %v5776_v6 }
 0x1ff   :  { %v5422_v28 = vld [vmem:[#allocation2 + $0x100] sm:$0xf]  ;;  %v7136_v29 = vld [vmem:[#allocation2 + $0x10c] sm:$0xf0]  ;;  %v5695_v36 = vor.u32 %v7204_v24, %v5694_v23  ;;  %1948 = vmatpush.bf16.msra.mxu0 %v5567_v27  ;;  %v5376_v8 = vld [vmem:[#allocation2 + $0xb0] sm:$0xf0] }
 0x200   :  { %v5550_v37 = vld [vmem:[#allocation2 + $0x200] sm:$0xf]  ;;  %v7168_v38 = vld [vmem:[#allocation2 + $0x20c] sm:$0xf0]  ;;  %v5423_v45 = vor.u32 %v7136_v29, %v5422_v28  ;;  %v7154_v34 = vld [vmem:[#allocation2 + $0x1a4] sm:$0xf]  ;;  %v5379_v13 = vor.u32 %v7122_v59, %v5376_v8 }
 0x201   :  { %v5678_v42 = vld [vmem:[#allocation2 + $0x300] sm:$0xf]  ;;  %v7200_v44 = vld [vmem:[#allocation2 + $0x30c] sm:$0xf0]  ;;  %v5551_v52 = vor.u32 %v7168_v38, %v5550_v37  ;;  %1921 = vmatpush.bf16.msrb.mxu2 %v5295_v40  ;;  %v5504_v10 = vld [vmem:[#allocation2 + $0x1b0] sm:$0xf0] }
 0x202   :  { %1962 = vmatpush.bf16.msra.mxu1 %v5695_v36  ;;  %v5679_v57 = vor.u32 %v7200_v44, %v5678_v42  ;;  %1935 = vmatpush.bf16.msrb.mxu3 %v5423_v45  ;;  %v7186_v31 = vld [vmem:[#allocation2 + $0x2a4] sm:$0xf]  ;;  %v5632_v12 = vld [vmem:[#allocation2 + $0x2b0] sm:$0xf0]  ;;  %v5507_v60 = vor.u32 %v7154_v34, %v5504_v10  ;;  %v5414_v10 = vld [vmem:[#allocation2 + $0xe8] sm:$0xf] }
 0x203   :  { %1949 = vmatpush.bf16.msra.mxu0 %v5551_v52  ;;  %v7218_v14 = vld [vmem:[#allocation2 + $0x3a4] sm:$0xf]  ;;  %v5760_v54 = vld [vmem:[#allocation2 + $0x3b0] sm:$0xf0]  ;;  %v5635_v46 = vor.u32 %v7186_v31, %v5632_v12  ;;  %v7133_v31 = vld [vmem:[#allocation2 + $0xf4] sm:$0xf0] }
 0x204   :  { %1922 = vmatmul.bf16.vlgmr.msrb.gmra.mxu2 %v8338_v63  ;;  %v7118_v0 = vld [vmem:[#allocation2 + $0x84] sm:$0xf]  ;;  %v5360_v15 = vld [vmem:[#allocation2 + $0x90] sm:$0xf0]  ;;  %v5763_v16 = vor.u32 %v7218_v14, %v5760_v54  ;;  %v5542_v12 = vld [vmem:[#allocation2 + $0x1e8] sm:$0xf] }
 0x205   :  { %1970 = vmatpush.bf16.msra.mxu2 %v5411_v47  ;;  %1936 = vmatmul.bf16.vlgmr.msrb.gmra.mxu3 %v8342_v7  ;;  %v7150_v58 = vld [vmem:[#allocation2 + $0x184] sm:$0xf]  ;;  %v5488_v1 = vld [vmem:[#allocation2 + $0x190] sm:$0xf0]  ;;  %v5363_v20 = vor.u32 %v7118_v0, %v5360_v15  ;;  %v5670_v0 = vld [vmem:[#allocation2 + $0x2e8] sm:$0xf] }
 0x206   :  { %1984 = vmatpush.bf16.msra.mxu3 %v5539_v51  ;;  %1963 = vmatpush.bf16.msra.mxu1 %v5679_v57  ;;  %v7182_v17 = vld [vmem:[#allocation2 + $0x284] sm:$0xf]  ;;  %v5616_v18 = vld [vmem:[#allocation2 + $0x290] sm:$0xf0]  ;;  %v5491_v23 = vor.u32 %v7150_v58, %v5488_v1 }
 0x207   :  { %1998 = vmatpush.bf16.msrb.mxu0 %v5667_v56  ;;  %v7214_v21 = vld [vmem:[#allocation2 + $0x384] sm:$0xf]  ;;  %v5744_v22 = vld [vmem:[#allocation2 + $0x390] sm:$0xf0]  ;;  %v5619_v27 = vor.u32 %v7182_v17, %v5616_v18  ;;  %v5415_v17 = vor.u32 %v7133_v31, %v5414_v10  ;;  %v5798_v18 = vld [vmem:[#allocation2 + $0x3e8] sm:$0xf] }
 0x208   :  { %1950 = vmatmul.bf16.vlgmr.msra.gmra.mxu0 %v8346_v9  ;;  %v7114_v24 = vld [vmem:[#allocation2 + $0x64] sm:$0xf]  ;;  %v5344_v25 = vld [vmem:[#allocation2 + $0x70] sm:$0xf0]  ;;  %v5747_v30 = vor.u32 %v7214_v21, %v5744_v22  ;;  %v7149_v10 = vld [vmem:[#allocation2 + $0x174] sm:$0xf0] }
 0x209   :  { %1971 = vmatpush.bf16.msra.mxu2 %v5395_v43  ;;  %1964 = vmatmul.bf16.vlgmr.msra.gmra.mxu1 %v8350_v11  ;;  %v7146_v28 = vld [vmem:[#allocation2 + $0x164] sm:$0xf]  ;;  %v5472_v29 = vld [vmem:[#allocation2 + $0x170] sm:$0xf0]  ;;  %v5347_v35 = vor.u32 %v7114_v24, %v5344_v25  ;;  %v7129_v24 = vld [vmem:[#allocation2 + $0xd4] sm:$0xf0] }
 0x20a   :  { %2012 = vmatpush.bf16.msrb.mxu1 %v5795_v5  ;;  %1985 = vmatpush.bf16.msra.mxu3 %v5523_v3  ;;  %v7178_v32 = vld [vmem:[#allocation2 + $0x264] sm:$0xf]  ;;  %v5600_v33 = vld [vmem:[#allocation2 + $0x270] sm:$0xf0]  ;;  %v5475_v38 = vor.u32 %v7146_v28, %v5472_v29  ;;  %v5526_v28 = vld [vmem:[#allocation2 + $0x1c8] sm:$0xf] }
 0x20b   :  { %1999 = vmatpush.bf16.msrb.mxu0 %v5651_v26  ;;  %v7210_v36 = vld [vmem:[#allocation2 + $0x364] sm:$0xf]  ;;  %v5728_v37 = vld [vmem:[#allocation2 + $0x370] sm:$0xf0]  ;;  %v5603_v41 = vor.u32 %v7178_v32, %v5600_v33  ;;  %v7161_v29 = vld [vmem:[#allocation2 + $0x1d4] sm:$0xf0] }
 0x20c   :  { %v7110_v39 = vld [vmem:[#allocation2 + $0x44] sm:$0xf]  ;;  %v5328_v40 = vld [vmem:[#allocation2 + $0x50] sm:$0xf0]  ;;  %v5731_v45 = vor.u32 %v7210_v36, %v5728_v37  ;;  %v5654_v32 = vld [vmem:[#allocation2 + $0x2c8] sm:$0xf] }
 0x20d   :  { %1972 = vmatpush.bf16.msra.mxu2 %v5379_v13  ;;  %v7142_v42 = vld [vmem:[#allocation2 + $0x144] sm:$0xf]  ;;  %v5456_v44 = vld [vmem:[#allocation2 + $0x150] sm:$0xf0]  ;;  %v5331_v50 = vor.u32 %v7110_v39, %v5328_v40  ;;  %v7165_v13 = vld [vmem:[#allocation2 + $0x1f4] sm:$0xf0] }
 0x20e   :  { %2013 = vmatpush.bf16.msrb.mxu1 %v5779_v19  ;;  %1986 = vmatpush.bf16.msra.mxu3 %v5507_v60  ;;  %v7174_v47 = vld [vmem:[#allocation2 + $0x244] sm:$0xf]  ;;  %v5584_v49 = vld [vmem:[#allocation2 + $0x250] sm:$0xf0]  ;;  %v5459_v53 = vor.u32 %v7142_v42, %v5456_v44  ;;  %v5543_v21 = vor.u32 %v7165_v13, %v5542_v12  ;;  %v7193_v33 = vld [vmem:[#allocation2 + $0x2d4] sm:$0xf0] }
 0x20f   :  { %2000 = vmatpush.bf16.msrb.mxu0 %v5635_v46  ;;  %v7206_v51 = vld [vmem:[#allocation2 + $0x344] sm:$0xf]  ;;  %v5712_v52 = vld [vmem:[#allocation2 + $0x350] sm:$0xf0]  ;;  %v5587_v57 = vor.u32 %v7174_v47, %v5584_v49  ;;  %v7197_v46 = vld [vmem:[#allocation2 + $0x2f4] sm:$0xf0] }
 0x210   :  { %v7106_v55 = vld [vmem:[#allocation2 + $0x24] sm:$0xf]  ;;  %v5312_v56 = vld [vmem:[#allocation2 + $0x30] sm:$0xf0]  ;;  %v5715_v5 = vor.u32 %v7206_v51, %v5712_v52  ;;  %v5671_v25 = vor.u32 %v7197_v46, %v5670_v0  ;;  %v5782_v36 = vld [vmem:[#allocation2 + $0x3c8] sm:$0xf] }
 0x211   :  { %1973 = vmatpush.bf16.msra.mxu2 %v5363_v20  ;;  %v7138_v2 = vld [vmem:[#allocation2 + $0x124] sm:$0xf]  ;;  %v5440_v4 = vld [vmem:[#allocation2 + $0x130] sm:$0xf0]  ;;  %v5315_v48 = vor.u32 %v7106_v55, %v5312_v56  ;;  %v7229_v20 = vld [vmem:[#allocation2 + $0x3f4] sm:$0xf0] }
 0x212   :  { %2014 = vmatpush.bf16.msrb.mxu1 %v5763_v16  ;;  %1987 = vmatpush.bf16.msra.mxu3 %v5491_v23  ;;  %v7170_v61 = vld [vmem:[#allocation2 + $0x224] sm:$0xf]  ;;  %v5568_v62 = vld [vmem:[#allocation2 + $0x230] sm:$0xf0]  ;;  %v5443_v8 = vor.u32 %v7138_v2, %v5440_v4  ;;  %v5398_v23 = vld [vmem:[#allocation2 + $0xc8] sm:$0xf] }
 0x213   :  { %2001 = vmatpush.bf16.msrb.mxu0 %v5619_v27  ;;  %v7102_v43 = vld [vmem:[#allocation2 + $0x4] sm:$0xf]  ;;  %v5296_v6 = vld [vmem:[#allocation2 + $0x10] sm:$0xf0]  ;;  %v5571_v19 = vor.u32 %v7170_v61, %v5568_v62  ;;  %v7225_v37 = vld [vmem:[#allocation2 + $0x3d4] sm:$0xf0] }
 0x214   :  { %v7202_v3 = vld [vmem:[#allocation2 + $0x324] sm:$0xf]  ;;  %v5696_v59 = vld [vmem:[#allocation2 + $0x330] sm:$0xf0]  ;;  %v5299_v15 = vor.u32 %v7102_v43, %v5296_v6  ;;  %v5382_v39 = vld [vmem:[#allocation2 + $0xa8] sm:$0xf] }
 0x215   :  { %1974 = vmatpush.bf16.msra.mxu2 %v5347_v35  ;;  %v7134_v26 = vld [vmem:[#allocation2 + $0x104] sm:$0xf]  ;;  %v5424_v34 = vld [vmem:[#allocation2 + $0x110] sm:$0xf0]  ;;  %v5699_v14 = vor.u32 %v7202_v3, %v5696_v59  ;;  %v5399_v35 = vor.u32 %v7129_v24, %v5398_v23  ;;  %v7125_v40 = vld [vmem:[#allocation2 + $0xb4] sm:$0xf0] }
 0x216   :  { %2015 = vmatpush.bf16.msrb.mxu1 %v5747_v30  ;;  %1988 = vmatpush.bf16.msra.mxu3 %v5475_v38  ;;  %v7166_v54 = vld [vmem:[#allocation2 + $0x204] sm:$0xf]  ;;  %v5552_v60 = vld [vmem:[#allocation2 + $0x210] sm:$0xf0]  ;;  %v5427_v16 = vor.u32 %v7134_v26, %v5424_v34  ;;  %v5799_v30 = vor.u32 %v7229_v20, %v5798_v18  ;;  %v5527_v38 = vor.u32 %v7161_v29, %v5526_v28  ;;  %v5510_v42 = vld [vmem:[#allocation2 + $0x1a8] sm:$0xf] }
 0x217   :  { %2002 = vmatpush.bf16.msrb.mxu0 %v5603_v41  ;;  %v7198_v58 = vld [vmem:[#allocation2 + $0x304] sm:$0xf]  ;;  %v5680_v1 = vld [vmem:[#allocation2 + $0x310] sm:$0xf0]  ;;  %v5555_v22 = vor.u32 %v7166_v54, %v5552_v60  ;;  %v5655_v41 = vor.u32 %v7193_v33, %v5654_v32  ;;  %v7157_v44 = vld [vmem:[#allocation2 + $0x1b4] sm:$0xf0] }
 0x218   :  { %v5683_v27 = vor.u32 %v7198_v58, %v5680_v1  ;;  %v5638_v47 = vld [vmem:[#allocation2 + $0x2a8] sm:$0xf]  ;;  %v7189_v49 = vld [vmem:[#allocation2 + $0x2b4] sm:$0xf0] }
 0x219   :  { %1975 = vmatpush.bf16.msra.mxu2 %v5331_v50  ;;  %v5383_v50 = vor.u32 %v7125_v40, %v5382_v39  ;;  %v5766_v51 = vld [vmem:[#allocation2 + $0x3a8] sm:$0xf]  ;;  %v7221_v52 = vld [vmem:[#allocation2 + $0x3b4] sm:$0xf0] }
 0x21a   :  { %2016 = vmatpush.bf16.msrb.mxu1 %v5731_v45  ;;  %1989 = vmatpush.bf16.msra.mxu3 %v5459_v53  ;;  %v5783_v45 = vor.u32 %v7225_v37, %v5782_v36  ;;  %v5511_v53 = vor.u32 %v7157_v44, %v5510_v42  ;;  %v5366_v55 = vld [vmem:[#allocation2 + $0x88] sm:$0xf]  ;;  %v7121_v56 = vld [vmem:[#allocation2 + $0x94] sm:$0xf0]  ;;  %v7131_v44 = vld [vmem:[#allocation2 + $0xec] sm:$0xf] }
 0x21b   :  { %2003 = vmatpush.bf16.msrb.mxu0 %v5587_v57  ;;  %v5639_v57 = vor.u32 %v7189_v49, %v5638_v47  ;;  %v5494_v2 = vld [vmem:[#allocation2 + $0x188] sm:$0xf]  ;;  %v7153_v4 = vld [vmem:[#allocation2 + $0x194] sm:$0xf0]  ;;  %v5367_v43 = vor.u32 %v7121_v56, %v5366_v55  ;;  %v5416_v47 = vld [vmem:[#allocation2 + $0xf8] sm:$0xf0] }
 0x21c   :  { %v5622_v61 = vld [vmem:[#allocation2 + $0x288] sm:$0xf]  ;;  %v7185_v62 = vld [vmem:[#allocation2 + $0x294] sm:$0xf0]  ;;  %v5495_v3 = vor.u32 %v7153_v4, %v5494_v2  ;;  %v7163_v49 = vld [vmem:[#allocation2 + $0x1ec] sm:$0xf] }
 0x21d   :  { %1976 = vmatpush.bf16.msra.mxu2 %v5315_v48  ;;  %v5750_v48 = vld [vmem:[#allocation2 + $0x388] sm:$0xf]  ;;  %v7217_v6 = vld [vmem:[#allocation2 + $0x394] sm:$0xf0]  ;;  %v5623_v26 = vor.u32 %v7185_v62, %v5622_v61  ;;  %v7195_v55 = vld [vmem:[#allocation2 + $0x2ec] sm:$0xf]  ;;  %v5419_v61 = vor.u32 %v7131_v44, %v5416_v47 }
 0x21e   :  { %2017 = vmatpush.bf16.msrb.mxu1 %v5715_v5  ;;  %1990 = vmatpush.bf16.msra.mxu3 %v5443_v8  ;;  %v5767_v5 = vor.u32 %v7221_v52, %v5766_v51  ;;  %v5350_v59 = vld [vmem:[#allocation2 + $0x68] sm:$0xf]  ;;  %v7117_v8 = vld [vmem:[#allocation2 + $0x74] sm:$0xf0]  ;;  %v7227_v62 = vld [vmem:[#allocation2 + $0x3ec] sm:$0xf] }
 0x21f   :  { %2004 = vmatpush.bf16.msrb.mxu0 %v5571_v19  ;;  %v5478_v34 = vld [vmem:[#allocation2 + $0x168] sm:$0xf]  ;;  %v5751_v19 = vor.u32 %v7217_v6, %v5750_v48  ;;  %v7181_v12 = vld [vmem:[#allocation2 + $0x274] sm:$0xf0]  ;;  %v5351_v13 = vor.u32 %v7117_v8, %v5350_v59  ;;  %v5400_v59 = vld [vmem:[#allocation2 + $0xd8] sm:$0xf0] }
 0x220   :  { %v5606_v31 = vld [vmem:[#allocation2 + $0x268] sm:$0xf]  ;;  %v7213_v54 = vld [vmem:[#allocation2 + $0x374] sm:$0xf0]  ;;  %v5479_v60 = vor.u32 %v7149_v10, %v5478_v34  ;;  %v7159_v34 = vld [vmem:[#allocation2 + $0x1cc] sm:$0xf] }
 0x221   :  { %1977 = vmatpush.bf16.msra.mxu2 %v5299_v15  ;;  %v5334_v0 = vld [vmem:[#allocation2 + $0x48] sm:$0xf]  ;;  %v7113_v15 = vld [vmem:[#allocation2 + $0x54] sm:$0xf0]  ;;  %v5607_v46 = vor.u32 %v7181_v12, %v5606_v31  ;;  %v5528_v10 = vld [vmem:[#allocation2 + $0x1d8] sm:$0xf0] }
 0x222   :  { %2018 = vmatpush.bf16.msrb.mxu1 %v5699_v14  ;;  %1991 = vmatpush.bf16.msra.mxu3 %v5427_v16  ;;  %v5734_v14 = vld [vmem:[#allocation2 + $0x368] sm:$0xf]  ;;  %v7145_v1 = vld [vmem:[#allocation2 + $0x154] sm:$0xf0]  ;;  %v5335_v20 = vor.u32 %v7113_v15, %v5334_v0  ;;  %v7191_v31 = vld [vmem:[#allocation2 + $0x2cc] sm:$0xf] }
 0x223   :  { %2005 = vmatpush.bf16.msrb.mxu0 %v5555_v22  ;;  %v5462_v58 = vld [vmem:[#allocation2 + $0x148] sm:$0xf]  ;;  %v5735_v16 = vor.u32 %v7213_v54, %v5734_v14  ;;  %v7177_v18 = vld [vmem:[#allocation2 + $0x254] sm:$0xf0]  ;;  %v5656_v12 = vld [vmem:[#allocation2 + $0x2d8] sm:$0xf0] }
 0x224   :  { %1978 = vmatmul.bf16.vlgmr.msra.gmra.mxu2 %v8338_v63  ;;  %v7209_v22 = vld [vmem:[#allocation2 + $0x354] sm:$0xf0]  ;;  %v5463_v23 = vor.u32 %v7145_v1, %v5462_v58  ;;  %v5318_v24 = vld [vmem:[#allocation2 + $0x28] sm:$0xf]  ;;  %v7223_v14 = vld [vmem:[#allocation2 + $0x3cc] sm:$0xf] }
 0x225   :  { %2026 = vmatpush.bf16.msrb.mxu2 %v5415_v17  ;;  %1992 = vmatmul.bf16.vlgmr.msra.gmra.mxu3 %v8342_v7  ;;  %v5590_v17 = vld [vmem:[#allocation2 + $0x248] sm:$0xf]  ;;  %v7141_v29 = vld [vmem:[#allocation2 + $0x134] sm:$0xf0]  ;;  %v5784_v54 = vld [vmem:[#allocation2 + $0x3d8] sm:$0xf0] }
 0x226   :  { %2040 = vmatpush.bf16.msrb.mxu3 %v5543_v21  ;;  %2019 = vmatpush.bf16.msrb.mxu1 %v5683_v27  ;;  %v5718_v21 = vld [vmem:[#allocation2 + $0x348] sm:$0xf]  ;;  %v5591_v27 = vor.u32 %v7177_v18, %v5590_v17  ;;  %v7173_v33 = vld [vmem:[#allocation2 + $0x234] sm:$0xf0]  ;;  %v7123_v0 = vld [vmem:[#allocation2 + $0xac] sm:$0xf] }
 0x227   :  { %2054 = vmatpush.bf16.msra.mxu0 %v5671_v25  ;;  %v7109_v25 = vld [vmem:[#allocation2 + $0x34] sm:$0xf0]  ;;  %v5446_v28 = vld [vmem:[#allocation2 + $0x128] sm:$0xf]  ;;  %v5384_v15 = vld [vmem:[#allocation2 + $0xb8] sm:$0xf0] }
 0x228   :  { %2006 = vmatmul.bf16.vlgmr.msrb.gmra.mxu0 %v8346_v9  ;;  %v5574_v32 = vld [vmem:[#allocation2 + $0x228] sm:$0xf]  ;;  %v5319_v36 = vor.u32 %v7109_v25, %v5318_v24  ;;  %v7105_v37 = vld [vmem:[#allocation2 + $0x14] sm:$0xf0]  ;;  %v5447_v40 = vor.u32 %v7141_v29, %v5446_v28  ;;  %v7155_v58 = vld [vmem:[#allocation2 + $0x1ac] sm:$0xf] }
 0x229   :  { %2027 = vmatpush.bf16.msrb.mxu2 %v5399_v35  ;;  %2020 = vmatmul.bf16.vlgmr.msrb.gmra.mxu1 %v8350_v11  ;;  %v5302_v35 = vld [vmem:[#allocation2 + $0x8] sm:$0xf]  ;;  %v7205_v39 = vld [vmem:[#allocation2 + $0x334] sm:$0xf0]  ;;  %v5512_v1 = vld [vmem:[#allocation2 + $0x1b8] sm:$0xf0] }
 0x22a   :  { %2068 = vmatpush.bf16.msra.mxu1 %v5799_v30  ;;  %2041 = vmatpush.bf16.msrb.mxu3 %v5527_v38  ;;  %v5719_v30 = vor.u32 %v7209_v22, %v5718_v21  ;;  %v5702_v38 = vld [vmem:[#allocation2 + $0x328] sm:$0xf]  ;;  %v7137_v42 = vld [vmem:[#allocation2 + $0x114] sm:$0xf0]  ;;  %v5303_v56 = vor.u32 %v7105_v37, %v5302_v35  ;;  %v7187_v17 = vld [vmem:[#allocation2 + $0x2ac] sm:$0xf] }
 0x22b   :  { %2055 = vmatpush.bf16.msra.mxu0 %v5655_v41  ;;  %v5430_v41 = vld [vmem:[#allocation2 + $0x108] sm:$0xf]  ;;  %v5703_v51 = vor.u32 %v7205_v39, %v5702_v38  ;;  %v7201_v4 = vld [vmem:[#allocation2 + $0x314] sm:$0xf0]  ;;  %v5640_v18 = vld [vmem:[#allocation2 + $0x2b8] sm:$0xf0] }
 0x22c   :  { %v5558_v52 = vld [vmem:[#allocation2 + $0x208] sm:$0xf]  ;;  %v7219_v21 = vld [vmem:[#allocation2 + $0x3ac] sm:$0xf]  ;;  %v5768_v22 = vld [vmem:[#allocation2 + $0x3b8] sm:$0xf0] }
 0x22d   :  { %2028 = vmatpush.bf16.msrb.mxu2 %v5383_v50  ;;  %v5544_v50 = vld [vmem:[#allocation2 + $0x1f8] sm:$0xf0]  ;;  %v5686_v2 = vld [vmem:[#allocation2 + $0x308] sm:$0xf]  ;;  %v7119_v24 = vld [vmem:[#allocation2 + $0x8c] sm:$0xf] }
 0x22e   :  { %2069 = vmatpush.bf16.msra.mxu1 %v5783_v45  ;;  %2042 = vmatpush.bf16.msrb.mxu3 %v5511_v53  ;;  %v5575_v45 = vor.u32 %v7173_v33, %v5574_v32  ;;  %v7169_v53 = vld [vmem:[#allocation2 + $0x214] sm:$0xf0]  ;;  %v5547_v48 = vor.u32 %v7163_v49, %v5544_v50  ;;  %v5368_v25 = vld [vmem:[#allocation2 + $0x98] sm:$0xf0]  ;;  %v7151_v28 = vld [vmem:[#allocation2 + $0x18c] sm:$0xf] }
 0x22f   :  { %2056 = vmatpush.bf16.msra.mxu0 %v5639_v57  ;;  %v5672_v57 = vld [vmem:[#allocation2 + $0x2f8] sm:$0xf0]  ;;  %v5559_v6 = vor.u32 %v7169_v53, %v5558_v52  ;;  %v7183_v32 = vld [vmem:[#allocation2 + $0x28c] sm:$0xf]  ;;  %v5371_v35 = vor.u32 %v7119_v24, %v5368_v25 }
 0x230   :  { %v5675_v8 = vor.u32 %v7195_v55, %v5672_v57  ;;  %v5496_v29 = vld [vmem:[#allocation2 + $0x198] sm:$0xf0]  ;;  %v7115_v39 = vld [vmem:[#allocation2 + $0x6c] sm:$0xf] }
 0x231   :  { %2029 = vmatpush.bf16.msrb.mxu2 %v5367_v43  ;;  %v5800_v43 = vld [vmem:[#allocation2 + $0x3f8] sm:$0xf0]  ;;  %v5499_v38 = vor.u32 %v7151_v28, %v5496_v29  ;;  %v7179_v47 = vld [vmem:[#allocation2 + $0x26c] sm:$0xf] }
 0x232   :  { %2070 = vmatpush.bf16.msra.mxu1 %v5767_v5  ;;  %2043 = vmatpush.bf16.msrb.mxu3 %v5495_v3  ;;  %v5431_v5 = vor.u32 %v7137_v42, %v5430_v41  ;;  %v7127_v3 = vld [vmem:[#allocation2 + $0xcc] sm:$0xf]  ;;  %v5624_v33 = vld [vmem:[#allocation2 + $0x298] sm:$0xf0] }
 0x233   :  { %2057 = vmatpush.bf16.msra.mxu0 %v5623_v26  ;;  %v5687_v26 = vor.u32 %v7201_v4, %v5686_v2  ;;  %v5752_v37 = vld [vmem:[#allocation2 + $0x398] sm:$0xf0]  ;;  %v5627_v41 = vor.u32 %v7183_v32, %v5624_v33  ;;  %v7147_v42 = vld [vmem:[#allocation2 + $0x16c] sm:$0xf] }
 0x234   :  { %v5480_v44 = vld [vmem:[#allocation2 + $0x178] sm:$0xf0]  ;;  %v7111_v55 = vld [vmem:[#allocation2 + $0x4c] sm:$0xf] }
 0x235   :  { %2030 = vmatpush.bf16.msrb.mxu2 %v5351_v13  ;;  %v5403_v13 = vor.u32 %v7127_v3, %v5400_v59  ;;  %v5608_v49 = vld [vmem:[#allocation2 + $0x278] sm:$0xf0]  ;;  %v5483_v53 = vor.u32 %v7147_v42, %v5480_v44  ;;  %v7143_v2 = vld [vmem:[#allocation2 + $0x14c] sm:$0xf] }
 0x236   :  { %2071 = vmatpush.bf16.msra.mxu1 %v5751_v19  ;;  %2044 = vmatpush.bf16.msrb.mxu3 %v5479_v60  ;;  %v5803_v19 = vor.u32 %v7227_v62, %v5800_v43  ;;  %v5531_v60 = vor.u32 %v7159_v34, %v5528_v10  ;;  %v5736_v52 = vld [vmem:[#allocation2 + $0x378] sm:$0xf0]  ;;  %v5611_v57 = vor.u32 %v7179_v47, %v5608_v49  ;;  %v7107_v59 = vld [vmem:[#allocation2 + $0x2c] sm:$0xf] }
 0x237   :  { %2058 = vmatpush.bf16.msra.mxu0 %v5607_v46  ;;  %v5659_v46 = vor.u32 %v7191_v31, %v5656_v12  ;;  %v5464_v4 = vld [vmem:[#allocation2 + $0x158] sm:$0xf0]  ;;  %v7139_v34 = vld [vmem:[#allocation2 + $0x12c] sm:$0xf] }
 0x238   :  { %v5592_v62 = vld [vmem:[#allocation2 + $0x258] sm:$0xf0]  ;;  %v5467_v3 = vor.u32 %v7143_v2, %v5464_v4  ;;  %v7171_v31 = vld [vmem:[#allocation2 + $0x22c] sm:$0xf] }
 0x239   :  { %2031 = vmatpush.bf16.msrb.mxu2 %v5335_v20  ;;  %v5387_v20 = vor.u32 %v7123_v0, %v5384_v15  ;;  %v5448_v10 = vld [vmem:[#allocation2 + $0x138] sm:$0xf0]  ;;  %v7103_v0 = vld [vmem:[#allocation2 + $0xc] sm:$0xf] }
 0x23a   :  { %2072 = vmatpush.bf16.msra.mxu1 %v5735_v16  ;;  %2045 = vmatpush.bf16.msrb.mxu3 %v5463_v23  ;;  %v5787_v16 = vor.u32 %v7223_v14, %v5784_v54  ;;  %v5515_v23 = vor.u32 %v7155_v58, %v5512_v1  ;;  %v5576_v12 = vld [vmem:[#allocation2 + $0x238] sm:$0xf0]  ;;  %v7203_v14 = vld [vmem:[#allocation2 + $0x32c] sm:$0xf] }
 0x23b   :  { %2059 = vmatpush.bf16.msra.mxu0 %v5591_v27  ;;  %v5643_v27 = vor.u32 %v7187_v17, %v5640_v18  ;;  %v5704_v54 = vld [vmem:[#allocation2 + $0x338] sm:$0xf0]  ;;  %v7135_v58 = vld [vmem:[#allocation2 + $0x10c] sm:$0xf] }
 0x23c   :  { %v5304_v15 = vld [vmem:[#allocation2 + $0x18] sm:$0xf0]  ;;  %v7167_v17 = vld [vmem:[#allocation2 + $0x20c] sm:$0xf] }
 0x23d   :  { %2032 = vmatpush.bf16.msrb.mxu2 %v5319_v36  ;;  %v7215_v36 = vld [vmem:[#allocation2 + $0x38c] sm:$0xf]  ;;  %v5432_v1 = vld [vmem:[#allocation2 + $0x118] sm:$0xf0] }
 0x23e   :  { %2073 = vmatpush.bf16.msra.mxu1 %v5719_v30  ;;  %2046 = vmatpush.bf16.msrb.mxu3 %v5447_v40  ;;  %v5771_v30 = vor.u32 %v7219_v21, %v5768_v22  ;;  %v5352_v40 = vld [vmem:[#allocation2 + $0x78] sm:$0xf0]  ;;  %v7199_v21 = vld [vmem:[#allocation2 + $0x30c] sm:$0xf] }
 0x23f   :  { %2060 = vmatpush.bf16.msra.mxu0 %v5575_v45  ;;  %v5755_v45 = vor.u32 %v7215_v36, %v5752_v37  ;;  %v5355_v50 = vor.u32 %v7115_v39, %v5352_v40  ;;  %v5560_v18 = vld [vmem:[#allocation2 + $0x218] sm:$0xf0] }
 0x240   :  { %v5688_v22 = vld [vmem:[#allocation2 + $0x318] sm:$0xf0]  ;;  %v5563_v24 = vor.u32 %v7167_v17, %v5560_v18 }
 0x241   :  { %2033 = vmatpush.bf16.msrb.mxu2 %v5303_v56  ;;  %v5336_v56 = vld [vmem:[#allocation2 + $0x58] sm:$0xf0]  ;;  %v5691_v25 = vor.u32 %v7199_v21, %v5688_v22 }
 0x242   :  { %2074 = vmatpush.bf16.msra.mxu1 %v5703_v51  ;;  %2047 = vmatpush.bf16.msrb.mxu3 %v5431_v5  ;;  %v7211_v51 = vld [vmem:[#allocation2 + $0x36c] sm:$0xf]  ;;  %v5339_v43 = vor.u32 %v7111_v55, %v5336_v56 }
 0x243   :  { %2061 = vmatpush.bf16.msra.mxu0 %v5559_v6  ;;  %v5739_v5 = vor.u32 %v7211_v51, %v5736_v52  ;;  %v5720_v6 = vld [vmem:[#allocation2 + $0x358] sm:$0xf0] }
 0x244   :  { %2034 = vmatmul.bf16.vlgmr.msrb.gmra.mxu2 %v8338_v63 }
 0x245   :  { %2082 = vmatpush.bf16.msra.mxu2 %v5419_v61  ;;  %2048 = vmatmul.bf16.vlgmr.msrb.gmra.mxu3 %v8342_v7  ;;  %v7175_v61 = vld [vmem:[#allocation2 + $0x24c] sm:$0xf] }
 0x246   :  { %2096 = vmatpush.bf16.msra.mxu3 %v5547_v48  ;;  %2075 = vmatpush.bf16.msra.mxu1 %v5687_v26  ;;  %v7207_v48 = vld [vmem:[#allocation2 + $0x34c] sm:$0xf]  ;;  %v5595_v26 = vor.u32 %v7175_v61, %v5592_v62 }
 0x247   :  { %2110 = vmatpush.bf16.msrb.mxu0 %v5675_v8  ;;  %v5320_v8 = vld [vmem:[#allocation2 + $0x38] sm:$0xf0] }
 0x248   :  { %2062 = vmatmul.bf16.vlgmr.msra.gmra.mxu0 %v8346_v9  ;;  %2169 = dma.hbm_to_vmem [thread:$0]  %s2163_s10, 2048, %s8244_s28, [#allocation4], %s8075_s1, %s8073_s4, %s8076_s27 }
 0x249   :  { %2083 = vmatpush.bf16.msra.mxu2 %v5403_v13  ;;  %2076 = vmatmul.bf16.vlgmr.msra.gmra.mxu1 %v8350_v11  ;;  %v5323_v13 = vor.u32 %v7107_v59, %v5320_v8 }
 0x24a   :  { %2124 = vmatpush.bf16.msrb.mxu1 %v5803_v19  ;;  %2097 = vmatpush.bf16.msra.mxu3 %v5531_v60  ;;  %v5723_v19 = vor.u32 %v7207_v48, %v5720_v6  ;;  %v5451_v60 = vor.u32 %v7139_v34, %v5448_v10 }
 0x24b   :  { %2111 = vmatpush.bf16.msrb.mxu0 %v5659_v46  ;;  %v5579_v46 = vor.u32 %v7171_v31, %v5576_v12 }
 0x24d   :  { %2084 = vmatpush.bf16.msra.mxu2 %v5387_v20  ;;  %v5307_v20 = vor.u32 %v7103_v0, %v5304_v15 }
 0x24e   :  { %2125 = vmatpush.bf16.msrb.mxu1 %v5787_v16  ;;  %2098 = vmatpush.bf16.msra.mxu3 %v5515_v23  ;;  %v5707_v16 = vor.u32 %v7203_v14, %v5704_v54  ;;  %v5435_v23 = vor.u32 %v7135_v58, %v5432_v1 }
 0x24f   :  { %2112 = vmatpush.bf16.msrb.mxu0 %v5643_v27 }
 0x251   :  { %2085 = vmatpush.bf16.msra.mxu2 %v5371_v35 }
 0x252   :  { %2126 = vmatpush.bf16.msrb.mxu1 %v5771_v30  ;;  %2099 = vmatpush.bf16.msra.mxu3 %v5499_v38 }
 0x253   :  { %2113 = vmatpush.bf16.msrb.mxu0 %v5627_v41 }
 0x255   :  { %2086 = vmatpush.bf16.msra.mxu2 %v5355_v50 }
 0x256   :  { %2127 = vmatpush.bf16.msrb.mxu1 %v5755_v45  ;;  %2100 = vmatpush.bf16.msra.mxu3 %v5483_v53 }
 0x257   :  { %2114 = vmatpush.bf16.msrb.mxu0 %v5611_v57 }
 0x259   :  { %2087 = vmatpush.bf16.msra.mxu2 %v5339_v43 }
 0x25a   :  { %2128 = vmatpush.bf16.msrb.mxu1 %v5739_v5  ;;  %2101 = vmatpush.bf16.msra.mxu3 %v5467_v3 }
 0x25b   :  { %2115 = vmatpush.bf16.msrb.mxu0 %v5595_v26 }
 0x25d   :  { %2088 = vmatpush.bf16.msra.mxu2 %v5323_v13 }
 0x25e   :  { %2129 = vmatpush.bf16.msrb.mxu1 %v5723_v19  ;;  %2102 = vmatpush.bf16.msra.mxu3 %v5451_v60 }
 0x25f   :  { %2116 = vmatpush.bf16.msrb.mxu0 %v5579_v46 }
 0x261   :  { %2089 = vmatpush.bf16.msra.mxu2 %v5307_v20 }
 0x262   :  { %2130 = vmatpush.bf16.msrb.mxu1 %v5707_v16  ;;  %2103 = vmatpush.bf16.msra.mxu3 %v5435_v23 }
 0x263   :  { %2117 = vmatpush.bf16.msrb.mxu0 %v5563_v24 }
 0x264   :  { %2090 = vmatmul.bf16.vlgmr.msra.gmra.mxu2 %v8338_v63  ;;  %v8378_v63 = vld [vmem:[%s8619_s15] sm:$0xf] }
 0x265   :  { %2104 = vmatmul.bf16.vlgmr.msra.gmra.mxu3 %v8342_v7  ;;  %v1266_v7 = vperm.slane %v8378_v63, 0  ;;  %v1267_v50 = vperm.slane %v8378_v63, 1  ;;  %v1268_v19 = vperm.slane %v8378_v63, 2 }
 0x266   :  { %2131 = vmatpush.bf16.msrb.mxu1 %v5691_v25  ;;  %2118 = vmatmul.bf16.vlgmr.msrb.gmra.mxu0 %v8346_v9 }
 0x269   :  { %2132 = vmatmul.bf16.vlgmr.msrb.gmra.mxu1 %v8350_v11 }
 0x285   :  { %v1951_v11 = vpop.f32.mrf.mxu0 }
 0x286   :  { %v1965_v29 = vpop.f32.mrf.mxu1 }
 0x287   :  { %v1923_v9 = vpop.f32.mrf.mxu2 }
 0x288   :  { %v1924_v27 = vadd.f32 %v1923_v9, %v1266_v7  ;;  %v1937_v28 = vpop.f32.mrf.mxu3 }
 0x28a   :  { %v1938_v30 = vadd.f32 %v1937_v28, %v1924_v27 }
 0x28c   :  { %v1952_v32 = vadd.f32 %v1951_v11, %v1938_v30 }
 0x28d   :  { %v1953_v39 = vpop.f32.mrf.mxu0 }
 0x28e   :  { %v1966_v33 = vadd.f32 %v1965_v29, %v1952_v32  ;;  %v1967_v42 = vpop.f32.mrf.mxu1 }
 0x28f   :  { %v1925_v35 = vpop.f32.mrf.mxu2 }
 0x290   :  { %vm2138_vm12 = vcmp.gt.f32.partialorder %v1966_v33, 0.0  ;;  %v2146_v36 = vmul.f32 0.2, %v1966_v33  ;;  %v1926_v37 = vadd.f32 %v1925_v35, %v1266_v7  ;;  %v1939_v38 = vpop.f32.mrf.mxu3  ;;  %v1269_v7 = vperm.slane %v8378_v63, 3 }
 0x292   :  { %v8381_v40 = vsel %vm2138_vm12, %v1966_v33, %v2146_v36  ;;  %v1940_v41 = vadd.f32 %v1939_v38, %v1926_v37 }
 0x294   :  { %v1954_v44 = vadd.f32 %v1953_v39, %v1940_v41 }
 0x296   :  { %v1968_v45 = vadd.f32 %v1967_v42, %v1954_v44 }
 0x298   :  { %vm2142_vm13 = vcmp.gt.f32.partialorder %v1968_v45, 0.0  ;;  %v2150_v47 = vmul.f32 0.2, %v1968_v45 }
 0x29a   :  { %v8383_v49 = vsel %vm2142_vm13, %v1968_v45, %v2150_v47 }
 0x2a5   :  { %v2007_v52 = vpop.f32.mrf.mxu0 }
 0x2a6   :  { %v2021_v56 = vpop.f32.mrf.mxu1 }
 0x2a7   :  { %v1979_v51 = vpop.f32.mrf.mxu2 }
 0x2a8   :  { %v1980_v53 = vadd.f32 %v1979_v51, %v1267_v50  ;;  %v1993_v55 = vpop.f32.mrf.mxu3 }
 0x2aa   :  { %v1994_v57 = vadd.f32 %v1993_v55, %v1980_v53 }
 0x2ac   :  { %v2008_v2 = vadd.f32 %v2007_v52, %v1994_v57 }
 0x2ad   :  { %v2009_v48 = vpop.f32.mrf.mxu0 }
 0x2ae   :  { %v2022_v4 = vadd.f32 %v2021_v56, %v2008_v2  ;;  %v2023_v59 = vpop.f32.mrf.mxu1 }
 0x2af   :  { %v1981_v5 = vpop.f32.mrf.mxu2 }
 0x2b0   :  { %vm2139_vm14 = vcmp.gt.f32.partialorder %v2022_v4, 0.0  ;;  %v2147_v61 = vmul.f32 0.2, %v2022_v4  ;;  %v1982_v62 = vadd.f32 %v1981_v5, %v1267_v50  ;;  %v1995_v43 = vpop.f32.mrf.mxu3 }
 0x2b2   :  { %v8386_v6 = vsel %vm2139_vm14, %v2022_v4, %v2147_v61  ;;  %v1996_v3 = vadd.f32 %v1995_v43, %v1982_v62 }
 0x2b4   :  { %v2010_v8 = vadd.f32 %v2009_v48, %v1996_v3 }
 0x2b6   :  { %v2024_v26 = vadd.f32 %v2023_v59, %v2010_v8 }
 0x2b8   :  { %vm2143_vm15 = vcmp.gt.f32.partialorder %v2024_v26, 0.0  ;;  %v2151_v34 = vmul.f32 0.2, %v2024_v26 }
 0x2ba   :  { %v8388_v10 = vsel %vm2143_vm15, %v2024_v26, %v2151_v34 }
 0x2c5   :  { %v2063_v12 = vpop.f32.mrf.mxu0 }
 0x2c6   :  { %v2077_v54 = vpop.f32.mrf.mxu1 }
 0x2c7   :  { %v2035_v31 = vpop.f32.mrf.mxu2 }
 0x2c8   :  { %v2036_v13 = vadd.f32 %v2035_v31, %v1268_v19  ;;  %v2049_v14 = vpop.f32.mrf.mxu3 }
 0x2ca   :  { %v2050_v60 = vadd.f32 %v2049_v14, %v2036_v13 }
 0x2cc   :  { %v2064_v0 = vadd.f32 %v2063_v12, %v2050_v60 }
 0x2cd   :  { %v2065_v17 = vpop.f32.mrf.mxu0 }
 0x2ce   :  { %v2078_v15 = vadd.f32 %v2077_v54, %v2064_v0  ;;  %v2079_v21 = vpop.f32.mrf.mxu1 }
 0x2cf   :  { %v2037_v46 = vpop.f32.mrf.mxu2 }
 0x2d0   :  { %vm2140_vm0 = vcmp.gt.f32.partialorder %v2078_v15, 0.0  ;;  %v2148_v58 = vmul.f32 0.2, %v2078_v15  ;;  %v2038_v1 = vadd.f32 %v2037_v46, %v1268_v19  ;;  %v2051_v16 = vpop.f32.mrf.mxu3 }
 0x2d2   :  { %v8391_v18 = vsel %vm2140_vm0, %v2078_v15, %v2148_v58  ;;  %v2052_v20 = vadd.f32 %v2051_v16, %v2038_v1 }
 0x2d4   :  { %v2066_v22 = vadd.f32 %v2065_v17, %v2052_v20 }
 0x2d6   :  { %v2080_v23 = vadd.f32 %v2079_v21, %v2066_v22 }
 0x2d8   :  { %vm2144_vm1 = vcmp.gt.f32.partialorder %v2080_v23, 0.0  ;;  %v2152_v24 = vmul.f32 0.2, %v2080_v23 }
 0x2da   :  { %v8393_v25 = vsel %vm2144_vm1, %v2080_v23, %v2152_v24 }
 0x2e3   :  { %v2119_v28 = vpop.f32.mrf.mxu0 }
 0x2e6   :  { %v2133_v30 = vpop.f32.mrf.mxu1 }
 0x2e7   :  { %v2091_v9 = vpop.f32.mrf.mxu2 }
 0x2e8   :  { %v2092_v11 = vadd.f32 %v2091_v9, %v1269_v7  ;;  %v2105_v27 = vpop.f32.mrf.mxu3 }
 0x2ea   :  { %v2106_v29 = vadd.f32 %v2105_v27, %v2092_v11 }
 0x2eb   :  { %v2121_v42 = vpop.f32.mrf.mxu0 }
 0x2ec   :  { %v2120_v32 = vadd.f32 %v2119_v28, %v2106_v29 }
 0x2ee   :  { %v2134_v33 = vadd.f32 %v2133_v30, %v2120_v32  ;;  %v2135_v45 = vpop.f32.mrf.mxu1 }
 0x2ef   :  { %v2093_v35 = vpop.f32.mrf.mxu2 }
 0x2f0   :  { %vm2141_vm2 = vcmp.gt.f32.partialorder %v2134_v33, 0.0  ;;  %v2149_v36 = vmul.f32 0.2, %v2134_v33  ;;  %v2094_v37 = vadd.f32 %v2093_v35, %v1269_v7  ;;  %v2107_v38 = vpop.f32.mrf.mxu3 }
 0x2f2   :  { %v8396_v39 = vsel %vm2141_vm2, %v2134_v33, %v2149_v36  ;;  %v2108_v41 = vadd.f32 %v2107_v38, %v2094_v37 }
 0x2f4   :  { %v2122_v44 = vadd.f32 %v2121_v42, %v2108_v41 }
 0x2f6   :  { %v2136_v63 = vadd.f32 %v2135_v45, %v2122_v44 }
 0x2f8   :  { %vm2145_vm3 = vcmp.gt.f32.partialorder %v2136_v63, 0.0  ;;  %v2153_v47 = vmul.f32 0.2, %v2136_v63 }
 0x2fa   :  { %v8398_v50 = vsel %vm2145_vm3, %v2136_v63, %v2153_v47 }
 0x2fb   :  { %8042 = dma.done.wait [#allocation4 + $0x1], 8192 }
 0x2fc   :  { %8043 = vsyncadd [#allocation4 + $0x1], 4294959104  ;;  %v5862_v51 = vld [vmem:[#allocation3 + $0xe0] sm:$0xf]  ;;  %v7245_v52 = vld [vmem:[#allocation3 + $0xec] sm:$0xf0] }
 0x2fd   :  { %v5926_v53 = vld [vmem:[#allocation3 + $0x1e0] sm:$0xf]  ;;  %v5863_v55 = vor.u32 %v7245_v52, %v5862_v51  ;;  %v7261_v56 = vld [vmem:[#allocation3 + $0x1ec] sm:$0xf0]  ;;  %s8651_s17 = sld [smem:[#allocation60_spill]] }
 0x2fe   :  { %v5990_v57 = vld [vmem:[#allocation3 + $0x2e0] sm:$0xf]  ;;  %v7277_v2 = vld [vmem:[#allocation3 + $0x2ec] sm:$0xf0]  ;;  %v5927_v4 = vor.u32 %v7261_v56, %v5926_v53 }
 0x2ff   :  { %v5991_v5 = vor.u32 %v7277_v2, %v5990_v57  ;;  %v5854_v61 = vld [vmem:[#allocation3 + $0xc0] sm:$0xf]  ;;  %v7243_v62 = vld [vmem:[#allocation3 + $0xcc] sm:$0xf0]  ;;  %2567 = vmatpush.bf16.msrb.mxu2 %v5863_v55 }
 0x300   :  { %v5918_v43 = vld [vmem:[#allocation3 + $0x1c0] sm:$0xf]  ;;  %v5855_v48 = vor.u32 %v7243_v62, %v5854_v61  ;;  %v7259_v3 = vld [vmem:[#allocation3 + $0x1cc] sm:$0xf0]  ;;  %2581 = vmatpush.bf16.msrb.mxu3 %v5927_v4 }
 0x301   :  { %v6054_v59 = vld [vmem:[#allocation3 + $0x3e0] sm:$0xf]  ;;  %v7293_v8 = vld [vmem:[#allocation3 + $0x3ec] sm:$0xf0]  ;;  %2595 = vmatpush.bf16.msra.mxu0 %v5991_v5  ;;  %v5919_v26 = vor.u32 %v7259_v3, %v5918_v43 }
 0x302   :  { %v6055_v34 = vor.u32 %v7293_v8, %v6054_v59  ;;  %v5982_v19 = vld [vmem:[#allocation3 + $0x2c0] sm:$0xf]  ;;  %v7275_v31 = vld [vmem:[#allocation3 + $0x2cc] sm:$0xf0] }
 0x303   :  { %v5846_v12 = vld [vmem:[#allocation3 + $0xa0] sm:$0xf]  ;;  %v5983_v13 = vor.u32 %v7275_v31, %v5982_v19  ;;  %v7241_v14 = vld [vmem:[#allocation3 + $0xac] sm:$0xf0]  ;;  %2568 = vmatpush.bf16.msrb.mxu2 %v5855_v48  ;;  %s2691_s16 = sshll.u32 %s8651_s17, 4  ;;  %s2692_s16 = int_to_ptr.hbm [resolvable:$true] %s2691_s16 }
 0x304   :  { %v5910_v54 = vld [vmem:[#allocation3 + $0x1a0] sm:$0xf]  ;;  %v7257_v60 = vld [vmem:[#allocation3 + $0x1ac] sm:$0xf0]  ;;  %2609 = vmatpush.bf16.msra.mxu1 %v6055_v34  ;;  %v5847_v58 = vor.u32 %v7241_v14, %v5846_v12  ;;  %2582 = vmatpush.bf16.msrb.mxu3 %v5919_v26 }
 0x305   :  { %v6046_v0 = vld [vmem:[#allocation3 + $0x3c0] sm:$0xf]  ;;  %v7291_v15 = vld [vmem:[#allocation3 + $0x3cc] sm:$0xf0]  ;;  %2596 = vmatpush.bf16.msra.mxu0 %v5983_v13  ;;  %v5911_v21 = vor.u32 %v7257_v60, %v5910_v54 }
 0x306   :  { %v5974_v46 = vld [vmem:[#allocation3 + $0x2a0] sm:$0xf]  ;;  %v6047_v1 = vor.u32 %v7291_v15, %v6046_v0  ;;  %v7273_v16 = vld [vmem:[#allocation3 + $0x2ac] sm:$0xf0] }
 0x307   :  { %v5838_v17 = vld [vmem:[#allocation3 + $0x80] sm:$0xf]  ;;  %v7239_v20 = vld [vmem:[#allocation3 + $0x8c] sm:$0xf0]  ;;  %v5975_v22 = vor.u32 %v7273_v16, %v5974_v46  ;;  %2569 = vmatpush.bf16.msrb.mxu2 %v5847_v58 }
 0x308   :  { %v5902_v23 = vld [vmem:[#allocation3 + $0x180] sm:$0xf]  ;;  %v7255_v24 = vld [vmem:[#allocation3 + $0x18c] sm:$0xf0]  ;;  %2610 = vmatpush.bf16.msra.mxu1 %v6047_v1  ;;  %v5839_v29 = vor.u32 %v7239_v20, %v5838_v17  ;;  %2583 = vmatpush.bf16.msrb.mxu3 %v5911_v21  ;;  %v7244_v17 = vld [vmem:[#allocation3 + $0xe4] sm:$0xf] }
 0x309   :  { %v6038_v7 = vld [vmem:[#allocation3 + $0x3a0] sm:$0xf]  ;;  %v7289_v9 = vld [vmem:[#allocation3 + $0x3ac] sm:$0xf0]  ;;  %2597 = vmatpush.bf16.msra.mxu0 %v5975_v22  ;;  %v5903_v33 = vor.u32 %v7255_v24, %v5902_v23  ;;  %v5864_v20 = vld [vmem:[#allocation3 + $0xf0] sm:$0xf0] }
 0x30a   :  { %v5966_v11 = vld [vmem:[#allocation3 + $0x280] sm:$0xf]  ;;  %v7271_v27 = vld [vmem:[#allocation3 + $0x28c] sm:$0xf0]  ;;  %v6039_v28 = vor.u32 %v7289_v9, %v6038_v7  ;;  %v7260_v21 = vld [vmem:[#allocation3 + $0x1e4] sm:$0xf] }
 0x30b   :  { %v6030_v30 = vld [vmem:[#allocation3 + $0x380] sm:$0xf]  ;;  %v7287_v32 = vld [vmem:[#allocation3 + $0x38c] sm:$0xf0]  ;;  %v5967_v35 = vor.u32 %v7271_v27, %v5966_v11  ;;  %2570 = vmatpush.bf16.msrb.mxu2 %v5839_v29  ;;  %v5928_v22 = vld [vmem:[#allocation3 + $0x1f0] sm:$0xf0] }
 0x30c   :  { %v5830_v36 = vld [vmem:[#allocation3 + $0x60] sm:$0xf]  ;;  %v7237_v37 = vld [vmem:[#allocation3 + $0x6c] sm:$0xf0]  ;;  %2611 = vmatpush.bf16.msra.mxu1 %v6039_v28  ;;  %v6031_v45 = vor.u32 %v7287_v32, %v6030_v30  ;;  %2584 = vmatpush.bf16.msrb.mxu3 %v5903_v33  ;;  %v7276_v9 = vld [vmem:[#allocation3 + $0x2e4] sm:$0xf]  ;;  %v5867_v32 = vor.u32 %v7244_v17, %v5864_v20 }
 0x30d   :  { %v5894_v38 = vld [vmem:[#allocation3 + $0x160] sm:$0xf]  ;;  %v7253_v41 = vld [vmem:[#allocation3 + $0x16c] sm:$0xf0]  ;;  %v5831_v63 = vor.u32 %v7237_v37, %v5830_v36  ;;  %2598 = vmatpush.bf16.msra.mxu0 %v5967_v35  ;;  %v5992_v27 = vld [vmem:[#allocation3 + $0x2f0] sm:$0xf0]  ;;  %v5931_v36 = vor.u32 %v7260_v21, %v5928_v22 }
 0x30e   :  { %v5958_v42 = vld [vmem:[#allocation3 + $0x260] sm:$0xf]  ;;  %v7269_v44 = vld [vmem:[#allocation3 + $0x26c] sm:$0xf0]  ;;  %v5895_v52 = vor.u32 %v7253_v41, %v5894_v38  ;;  %v7292_v33 = vld [vmem:[#allocation3 + $0x3e4] sm:$0xf] }
 0x30f   :  { %v6022_v47 = vld [vmem:[#allocation3 + $0x360] sm:$0xf]  ;;  %v7285_v51 = vld [vmem:[#allocation3 + $0x36c] sm:$0xf0]  ;;  %v5959_v53 = vor.u32 %v7269_v44, %v5958_v42  ;;  %2571 = vmatpush.bf16.msrb.mxu2 %v5831_v63  ;;  %v6056_v35 = vld [vmem:[#allocation3 + $0x3f0] sm:$0xf0]  ;;  %v5995_v42 = vor.u32 %v7276_v9, %v5992_v27 }
 0x310   :  { %v5822_v55 = vld [vmem:[#allocation3 + $0x40] sm:$0xf]  ;;  %v7235_v56 = vld [vmem:[#allocation3 + $0x4c] sm:$0xf0]  ;;  %2612 = vmatpush.bf16.msra.mxu1 %v6031_v45  ;;  %v6023_v61 = vor.u32 %v7285_v51, %v6022_v47  ;;  %2585 = vmatpush.bf16.msrb.mxu3 %v5895_v52  ;;  %v7242_v38 = vld [vmem:[#allocation3 + $0xc4] sm:$0xf]  ;;  %v6059_v47 = vor.u32 %v7292_v33, %v6056_v35  ;;  %v8402_v51 = vpack.c.bf16 %v8383_v49, %v8381_v40 }
 0x311   :  { %v5886_v57 = vld [vmem:[#allocation3 + $0x140] sm:$0xf]  ;;  %v7251_v2 = vld [vmem:[#allocation3 + $0x14c] sm:$0xf0]  ;;  %v5823_v62 = vor.u32 %v7235_v56, %v5822_v55  ;;  %2599 = vmatpush.bf16.msra.mxu0 %v5959_v53  ;;  %v5856_v41 = vld [vmem:[#allocation3 + $0xd0] sm:$0xf0]  ;;  %v8406_v56 = vpack.c.bf16 %v8388_v10, %v8386_v6  ;;  %v8410_v40 = vpack.c.bf16 %v8393_v25, %v8391_v18  ;;  %v8414_v6 = vpack.c.bf16 %v8398_v50, %v8396_v39 }
 0x312   :  { %v5950_v4 = vld [vmem:[#allocation3 + $0x240] sm:$0xf]  ;;  %v7267_v5 = vld [vmem:[#allocation3 + $0x24c] sm:$0xf0]  ;;  %v5887_v3 = vor.u32 %v7251_v2, %v5886_v57  ;;  %v7258_v45 = vld [vmem:[#allocation3 + $0x1c4] sm:$0xf]  ;;  %v5859_v55 = vor.u32 %v7242_v38, %v5856_v41 }
 0x313   :  { %v6014_v43 = vld [vmem:[#allocation3 + $0x340] sm:$0xf]  ;;  %v7283_v48 = vld [vmem:[#allocation3 + $0x34c] sm:$0xf0]  ;;  %v5951_v59 = vor.u32 %v7267_v5, %v5950_v4  ;;  %2572 = vmatpush.bf16.msrb.mxu2 %v5823_v62  ;;  %v5920_v63 = vld [vmem:[#allocation3 + $0x1d0] sm:$0xf0] }
 0x314   :  { %v5814_v8 = vld [vmem:[#allocation3 + $0x20] sm:$0xf]  ;;  %v7233_v26 = vld [vmem:[#allocation3 + $0x2c] sm:$0xf0]  ;;  %2613 = vmatpush.bf16.msra.mxu1 %v6023_v61  ;;  %v6015_v13 = vor.u32 %v7283_v48, %v6014_v43  ;;  %2586 = vmatpush.bf16.msrb.mxu3 %v5887_v3  ;;  %v7274_v52 = vld [vmem:[#allocation3 + $0x2c4] sm:$0xf]  ;;  %v5923_v4 = vor.u32 %v7258_v45, %v5920_v63 }
 0x315   :  { %v5878_v34 = vld [vmem:[#allocation3 + $0x120] sm:$0xf]  ;;  %v7249_v19 = vld [vmem:[#allocation3 + $0x12c] sm:$0xf0]  ;;  %v5815_v54 = vor.u32 %v7233_v26, %v5814_v8  ;;  %2600 = vmatpush.bf16.msra.mxu0 %v5951_v59  ;;  %v5984_v53 = vld [vmem:[#allocation3 + $0x2d0] sm:$0xf0] }
 0x316   :  { %v5942_v31 = vld [vmem:[#allocation3 + $0x220] sm:$0xf]  ;;  %v7265_v12 = vld [vmem:[#allocation3 + $0x22c] sm:$0xf0]  ;;  %v5879_v46 = vor.u32 %v7249_v19, %v5878_v34  ;;  %v7290_v57 = vld [vmem:[#allocation3 + $0x3c4] sm:$0xf]  ;;  %v5987_v49 = vor.u32 %v7274_v52, %v5984_v53 }
 0x317   :  { %v5806_v14 = vld [vmem:[#allocation3] sm:$0xf]  ;;  %v7231_v60 = vld [vmem:[#allocation3 + $0xc] sm:$0xf0]  ;;  %v5943_v58 = vor.u32 %v7265_v12, %v5942_v31  ;;  %2573 = vmatpush.bf16.msrb.mxu2 %v5815_v54  ;;  %v6048_v2 = vld [vmem:[#allocation3 + $0x3d0] sm:$0xf0] }
 0x318   :  { %v6006_v0 = vld [vmem:[#allocation3 + $0x320] sm:$0xf]  ;;  %v7281_v15 = vld [vmem:[#allocation3 + $0x32c] sm:$0xf0]  ;;  %2614 = vmatpush.bf16.msra.mxu1 %v6015_v13  ;;  %v5807_v11 = vor.u32 %v7231_v60, %v5806_v14  ;;  %2587 = vmatpush.bf16.msrb.mxu3 %v5879_v46  ;;  %v7240_v5 = vld [vmem:[#allocation3 + $0xa4] sm:$0xf]  ;;  %v6051_v10 = vor.u32 %v7290_v57, %v6048_v2 }
 0x319   :  { %v5870_v1 = vld [vmem:[#allocation3 + $0x100] sm:$0xf]  ;;  %v7247_v16 = vld [vmem:[#allocation3 + $0x10c] sm:$0xf0]  ;;  %v6007_v23 = vor.u32 %v7281_v15, %v6006_v0  ;;  %2601 = vmatpush.bf16.msra.mxu0 %v5943_v58  ;;  %v5848_v61 = vld [vmem:[#allocation3 + $0xb0] sm:$0xf0] }
 0x31a   :  { %v5934_v24 = vld [vmem:[#allocation3 + $0x200] sm:$0xf]  ;;  %v7263_v7 = vld [vmem:[#allocation3 + $0x20c] sm:$0xf0]  ;;  %v5871_v30 = vor.u32 %v7247_v16, %v5870_v1  ;;  %v7256_v62 = vld [vmem:[#allocation3 + $0x1a4] sm:$0xf]  ;;  %v5851_v18 = vor.u32 %v7240_v5, %v5848_v61 }
 0x31b   :  { %v5998_v28 = vld [vmem:[#allocation3 + $0x300] sm:$0xf]  ;;  %v7279_v29 = vld [vmem:[#allocation3 + $0x30c] sm:$0xf0]  ;;  %v5935_v37 = vor.u32 %v7263_v7, %v5934_v24  ;;  %2574 = vmatpush.bf16.msrb.mxu2 %v5807_v11  ;;  %v5912_v43 = vld [vmem:[#allocation3 + $0x1b0] sm:$0xf0] }
 0x31c   :  { %2615 = vmatpush.bf16.msra.mxu1 %v6007_v23  ;;  %v5999_v44 = vor.u32 %v7279_v29, %v5998_v28  ;;  %2588 = vmatpush.bf16.msrb.mxu3 %v5871_v30  ;;  %v7272_v48 = vld [vmem:[#allocation3 + $0x2a4] sm:$0xf]  ;;  %v5976_v3 = vld [vmem:[#allocation3 + $0x2b0] sm:$0xf0]  ;;  %v5915_v8 = vor.u32 %v7256_v62, %v5912_v43 }
 0x31d   :  { %2602 = vmatpush.bf16.msra.mxu0 %v5935_v37  ;;  %v7288_v25 = vld [vmem:[#allocation3 + $0x3a4] sm:$0xf]  ;;  %v6040_v59 = vld [vmem:[#allocation3 + $0x3b0] sm:$0xf0]  ;;  %v5979_v39 = vor.u32 %v7272_v48, %v5976_v3 }
 0x31e   :  { %2575 = vmatmul.bf16.vlgmr.msrb.gmra.mxu2 %v8402_v51  ;;  %v7238_v26 = vld [vmem:[#allocation3 + $0x84] sm:$0xf]  ;;  %v5840_v34 = vld [vmem:[#allocation3 + $0x90] sm:$0xf0]  ;;  %v6043_v31 = vor.u32 %v7288_v25, %v6040_v59 }
 0x31f   :  { %2623 = vmatpush.bf16.msra.mxu2 %v5867_v32  ;;  %2589 = vmatmul.bf16.vlgmr.msrb.gmra.mxu3 %v8406_v56  ;;  %v7254_v50 = vld [vmem:[#allocation3 + $0x184] sm:$0xf]  ;;  %v5904_v19 = vld [vmem:[#allocation3 + $0x190] sm:$0xf0]  ;;  %v5843_v14 = vor.u32 %v7238_v26, %v5840_v34 }
 0x320   :  { %2637 = vmatpush.bf16.msra.mxu3 %v5931_v36  ;;  %2616 = vmatpush.bf16.msra.mxu1 %v5999_v44  ;;  %v7270_v12 = vld [vmem:[#allocation3 + $0x284] sm:$0xf]  ;;  %v5968_v13 = vld [vmem:[#allocation3 + $0x290] sm:$0xf0]  ;;  %v5907_v0 = vor.u32 %v7254_v50, %v5904_v19 }
 0x321   :  { %2651 = vmatpush.bf16.msrb.mxu0 %v5995_v42  ;;  %v7286_v54 = vld [vmem:[#allocation3 + $0x384] sm:$0xf]  ;;  %v6032_v60 = vld [vmem:[#allocation3 + $0x390] sm:$0xf0]  ;;  %v5971_v58 = vor.u32 %v7270_v12, %v5968_v13 }
 0x322   :  { %2603 = vmatmul.bf16.vlgmr.msra.gmra.mxu0 %v8410_v40  ;;  %v7236_v15 = vld [vmem:[#allocation3 + $0x64] sm:$0xf]  ;;  %v5832_v46 = vld [vmem:[#allocation3 + $0x70] sm:$0xf0]  ;;  %v6035_v17 = vor.u32 %v7286_v54, %v6032_v60 }
 0x323   :  { %2624 = vmatpush.bf16.msra.mxu2 %v5859_v55  ;;  %2617 = vmatmul.bf16.vlgmr.msra.gmra.mxu1 %v8414_v6  ;;  %v7252_v1 = vld [vmem:[#allocation3 + $0x164] sm:$0xf]  ;;  %v5896_v16 = vld [vmem:[#allocation3 + $0x170] sm:$0xf0]  ;;  %v5835_v22 = vor.u32 %v7236_v15, %v5832_v46 }
 0x324   :  { %2665 = vmatpush.bf16.msrb.mxu1 %v6059_v47  ;;  %2638 = vmatpush.bf16.msra.mxu3 %v5923_v4  ;;  %v7268_v20 = vld [vmem:[#allocation3 + $0x264] sm:$0xf]  ;;  %v5960_v21 = vld [vmem:[#allocation3 + $0x270] sm:$0xf0]  ;;  %v5899_v7 = vor.u32 %v7252_v1, %v5896_v16 }
 0x325   :  { %2652 = vmatpush.bf16.msrb.mxu0 %v5987_v49  ;;  %v7284_v23 = vld [vmem:[#allocation3 + $0x364] sm:$0xf]  ;;  %v6024_v24 = vld [vmem:[#allocation3 + $0x370] sm:$0xf0]  ;;  %v5963_v27 = vor.u32 %v7268_v20, %v5960_v21 }
 0x326   :  { %v7234_v9 = vld [vmem:[#allocation3 + $0x44] sm:$0xf]  ;;  %v5824_v11 = vld [vmem:[#allocation3 + $0x50] sm:$0xf0]  ;;  %v6027_v30 = vor.u32 %v7284_v23, %v6024_v24 }
 0x327   :  { %2625 = vmatpush.bf16.msra.mxu2 %v5851_v18  ;;  %v7250_v28 = vld [vmem:[#allocation3 + $0x144] sm:$0xf]  ;;  %v5888_v29 = vld [vmem:[#allocation3 + $0x150] sm:$0xf0]  ;;  %v5827_v35 = vor.u32 %v7234_v9, %v5824_v11 }
 0x328   :  { %2666 = vmatpush.bf16.msrb.mxu1 %v6051_v10  ;;  %2639 = vmatpush.bf16.msra.mxu3 %v5915_v8  ;;  %v7266_v32 = vld [vmem:[#allocation3 + $0x244] sm:$0xf]  ;;  %v5952_v33 = vld [vmem:[#allocation3 + $0x250] sm:$0xf0]  ;;  %v5891_v38 = vor.u32 %v7250_v28, %v5888_v29 }
 0x329   :  { %2653 = vmatpush.bf16.msrb.mxu0 %v5979_v39  ;;  %v7282_v36 = vld [vmem:[#allocation3 + $0x344] sm:$0xf]  ;;  %v6016_v37 = vld [vmem:[#allocation3 + $0x350] sm:$0xf0]  ;;  %v5955_v44 = vor.u32 %v7266_v32, %v5952_v33  ;;  %v2241_v39 = vld [vmem:[#allocation11] sm:$0x3] }
 0x32a   :  { %v7232_v41 = vld [vmem:[#allocation3 + $0x24] sm:$0xf]  ;;  %v5816_v42 = vld [vmem:[#allocation3 + $0x30] sm:$0xf0]  ;;  %v6019_v47 = vor.u32 %v7282_v36, %v6016_v37  ;;  %v2243_v50 = vperm.slane %v2241_v39, 0 }
 0x32b   :  { %2626 = vmatpush.bf16.msra.mxu2 %v5843_v14  ;;  %v7248_v45 = vld [vmem:[#allocation3 + $0x124] sm:$0xf]  ;;  %v5880_v63 = vld [vmem:[#allocation3 + $0x130] sm:$0xf0]  ;;  %v5819_v55 = vor.u32 %v7232_v41, %v5816_v42 }
 0x32c   :  { %2667 = vmatpush.bf16.msrb.mxu1 %v6043_v31  ;;  %2640 = vmatpush.bf16.msra.mxu3 %v5907_v0  ;;  %v7264_v52 = vld [vmem:[#allocation3 + $0x224] sm:$0xf]  ;;  %v5944_v53 = vld [vmem:[#allocation3 + $0x230] sm:$0xf0]  ;;  %v5883_v4 = vor.u32 %v7248_v45, %v5880_v63 }
 0x32d   :  { %2654 = vmatpush.bf16.msrb.mxu0 %v5971_v58  ;;  %v7280_v57 = vld [vmem:[#allocation3 + $0x324] sm:$0xf]  ;;  %v6008_v2 = vld [vmem:[#allocation3 + $0x330] sm:$0xf0]  ;;  %v5947_v49 = vor.u32 %v7264_v52, %v5944_v53 }
 0x32e   :  { %v7230_v5 = vld [vmem:[#allocation3 + $0x4] sm:$0xf]  ;;  %v5808_v61 = vld [vmem:[#allocation3 + $0x10] sm:$0xf0]  ;;  %v6011_v10 = vor.u32 %v7280_v57, %v6008_v2 }
 0x32f   :  { %2627 = vmatpush.bf16.msra.mxu2 %v5835_v22  ;;  %v7246_v62 = vld [vmem:[#allocation3 + $0x104] sm:$0xf]  ;;  %v5872_v43 = vld [vmem:[#allocation3 + $0x110] sm:$0xf0]  ;;  %v5811_v18 = vor.u32 %v7230_v5, %v5808_v61  ;;  %v2244_v22 = vperm.slane %v2241_v39, 1 }
 0x330   :  { %2668 = vmatpush.bf16.msrb.mxu1 %v6035_v17  ;;  %2641 = vmatpush.bf16.msra.mxu3 %v5899_v7  ;;  %v7262_v48 = vld [vmem:[#allocation3 + $0x204] sm:$0xf]  ;;  %v5936_v3 = vld [vmem:[#allocation3 + $0x210] sm:$0xf0]  ;;  %v5875_v8 = vor.u32 %v7246_v62, %v5872_v43 }
 0x331   :  { %2655 = vmatpush.bf16.msrb.mxu0 %v5963_v27  ;;  %v7278_v25 = vld [vmem:[#allocation3 + $0x304] sm:$0xf]  ;;  %v6000_v59 = vld [vmem:[#allocation3 + $0x310] sm:$0xf0]  ;;  %v5939_v26 = vor.u32 %v7262_v48, %v5936_v3 }
 0x332   :  { %v6003_v34 = vor.u32 %v7278_v25, %v6000_v59  ;;  %2698 = dma.hbm_to_vmem [thread:$0]  %s2692_s16, 2048, %s8253_s13, [#allocation4 + $0x1], %s8063_s30, %s8073_s4, %s8064_s2 }
 0x333   :  { %2628 = vmatpush.bf16.msra.mxu2 %v5827_v35 }
 0x334   :  { %2669 = vmatpush.bf16.msrb.mxu1 %v6027_v30  ;;  %2642 = vmatpush.bf16.msra.mxu3 %v5891_v38 }
 0x335   :  { %2656 = vmatpush.bf16.msrb.mxu0 %v5955_v44 }
 0x337   :  { %2629 = vmatpush.bf16.msra.mxu2 %v5819_v55 }
 0x338   :  { %2670 = vmatpush.bf16.msrb.mxu1 %v6019_v47  ;;  %2643 = vmatpush.bf16.msra.mxu3 %v5883_v4 }
 0x339   :  { %2657 = vmatpush.bf16.msrb.mxu0 %v5947_v49 }
 0x33b   :  { %2630 = vmatpush.bf16.msra.mxu2 %v5811_v18 }
 0x33c   :  { %2671 = vmatpush.bf16.msrb.mxu1 %v6011_v10  ;;  %2644 = vmatpush.bf16.msra.mxu3 %v5875_v8 }
 0x33d   :  { %2658 = vmatpush.bf16.msrb.mxu0 %v5939_v26 }
 0x33e   :  { %2631 = vmatmul.bf16.vlgmr.msra.gmra.mxu2 %v8402_v51 }
 0x33f   :  { %2645 = vmatmul.bf16.vlgmr.msra.gmra.mxu3 %v8406_v56 }
 0x340   :  { %2672 = vmatpush.bf16.msrb.mxu1 %v6003_v34  ;;  %2659 = vmatmul.bf16.vlgmr.msrb.gmra.mxu0 %v8410_v40 }
 0x343   :  { %2673 = vmatmul.bf16.vlgmr.msrb.gmra.mxu1 %v8414_v6 }
 0x39f   :  { %v2604_v51 = vpop.f32.mrf.mxu0 }
 0x3a0   :  { %v2618_v56 = vpop.f32.mrf.mxu1 }
 0x3a1   :  { %v2576_v19 = vpop.f32.mrf.mxu2 }
 0x3a2   :  { %v2577_v31 = vadd.f32 %v2576_v19, %v2243_v50  ;;  %v2590_v12 = vpop.f32.mrf.mxu3 }
 0x3a4   :  { %v2591_v13 = vadd.f32 %v2590_v12, %v2577_v31 }
 0x3a6   :  { %v2605_v40 = vadd.f32 %v2604_v51, %v2591_v13 }
 0x3a7   :  { %v2606_v15 = vpop.f32.mrf.mxu0 }
 0x3a8   :  { %v2619_v14 = vadd.f32 %v2618_v56, %v2605_v40  ;;  %v2620_v1 = vpop.f32.mrf.mxu1 }
 0x3a9   :  { %v2578_v6 = vpop.f32.mrf.mxu2 }
 0x3aa   :  { %vm2679_vm4 = vcmp.gt.f32.partialorder %v2619_v14, 0.0  ;;  %v2683_v54 = vmul.f32 0.2, %v2619_v14  ;;  %v2579_v60 = vadd.f32 %v2578_v6, %v2243_v50  ;;  %v2592_v0 = vpop.f32.mrf.mxu3 }
 0x3ac   :  { %v8431_v46 = vsel %vm2679_vm4, %v2619_v14, %v2683_v54  ;;  %v2593_v58 = vadd.f32 %v2592_v0, %v2579_v60 }
 0x3ae   :  { %v2607_v16 = vadd.f32 %v2606_v15, %v2593_v58 }
 0x3b0   :  { %v2621_v17 = vadd.f32 %v2620_v1, %v2607_v16 }
 0x3b2   :  { %vm2681_vm5 = vcmp.gt.f32.partialorder %v2621_v17, 0.0  ;;  %v2685_v20 = vmul.f32 0.2, %v2621_v17 }
 0x3b4   :  { %v8433_v21 = vsel %vm2681_vm5, %v2621_v17, %v2685_v20 }
 0x3bd   :  { %v2660_v9 = vpop.f32.mrf.mxu0 }
 0x3c0   :  { %v2674_v27 = vpop.f32.mrf.mxu1 }
 0x3c1   :  { %v2632_v23 = vpop.f32.mrf.mxu2 }
 0x3c2   :  { %v2633_v24 = vadd.f32 %v2632_v23, %v2244_v22  ;;  %v2646_v7 = vpop.f32.mrf.mxu3 }
 0x3c4   :  { %v2647_v11 = vadd.f32 %v2646_v7, %v2633_v24 }
 0x3c5   :  { %v2662_v38 = vpop.f32.mrf.mxu0 }
 0x3c6   :  { %v2661_v28 = vadd.f32 %v2660_v9, %v2647_v11 }
 0x3c8   :  { %v2675_v29 = vadd.f32 %v2674_v27, %v2661_v28  ;;  %v2676_v42 = vpop.f32.mrf.mxu1 }
 0x3c9   :  { %v2634_v30 = vpop.f32.mrf.mxu2 }
 0x3ca   :  { %vm2680_vm6 = vcmp.gt.f32.partialorder %v2675_v29, 0.0  ;;  %v2684_v32 = vmul.f32 0.2, %v2675_v29  ;;  %v2635_v33 = vadd.f32 %v2634_v30, %v2244_v22  ;;  %v2648_v35 = vpop.f32.mrf.mxu3 }
 0x3cc   :  { %v8435_v36 = vsel %vm2680_vm6, %v2675_v29, %v2684_v32  ;;  %v2649_v37 = vadd.f32 %v2648_v35, %v2635_v33 }
 0x3ce   :  { %v2663_v41 = vadd.f32 %v2662_v38, %v2649_v37 }
 0x3d0   :  { %v2677_v44 = vadd.f32 %v2676_v42, %v2663_v41 }
 0x3d2   :  { %vm2682_vm7 = vcmp.gt.f32.partialorder %v2677_v44, 0.0  ;;  %v2686_v45 = vmul.f32 0.2, %v2677_v44 }
 0x3d4   :  { %v8437_v63 = vsel %vm2682_vm7, %v2677_v44, %v2686_v45 }
 0x3d5   :  { %8044 = dma.done.wait [#allocation4], 2048 }
 0x3d6   :  { %8045 = vsyncadd [#allocation4], 4294965248  ;;  %v6090_v47 = vld [vmem:[#allocation2 + $0xe0] sm:$0xf]  ;;  %v7301_v52 = vld [vmem:[#allocation2 + $0xec] sm:$0xf0]  ;;  %v2734_v28 = vpack.c.bf16 %v8433_v21, %v8431_v46  ;;  %v2735_v29 = vpack.c.bf16 %v8437_v63, %v8435_v36 }
 0x3d7   :  { %v6122_v53 = vld [vmem:[#allocation2 + $0x1e0] sm:$0xf]  ;;  %v6091_v55 = vor.u32 %v7301_v52, %v6090_v47  ;;  %v7309_v57 = vld [vmem:[#allocation2 + $0x1ec] sm:$0xf0]  ;;  %s8652_s0 = sld [smem:[#allocation61_spill]] }
 0x3d8   :  { %v6086_v2 = vld [vmem:[#allocation2 + $0xc0] sm:$0xf]  ;;  %v7300_v4 = vld [vmem:[#allocation2 + $0xcc] sm:$0xf0]  ;;  %v6123_v5 = vor.u32 %v7309_v57, %v6122_v53  ;;  %v7546_v30 = vld [vmem:[#allocation13] ss:$0 sm:$0xff] }
 0x3d9   :  { %v6118_v61 = vld [vmem:[#allocation2 + $0x1c0] sm:$0xf]  ;;  %v7308_v49 = vld [vmem:[#allocation2 + $0x1cc] sm:$0xf0]  ;;  %2836 = vmatpush.bf16.msrb.mxu2 %v6091_v55  ;;  %v6087_v62 = vor.u32 %v7300_v4, %v6086_v2 }
 0x3da   :  { %2850 = vmatpush.bf16.msrb.mxu3 %v6123_v5  ;;  %v6119_v43 = vor.u32 %v7308_v49, %v6118_v61  ;;  %v6082_v10 = vld [vmem:[#allocation2 + $0xa0] sm:$0xf]  ;;  %v7299_v48 = vld [vmem:[#allocation2 + $0xac] sm:$0xf0] }
 0x3db   :  { %v6114_v3 = vld [vmem:[#allocation2 + $0x1a0] sm:$0xf]  ;;  %v7307_v18 = vld [vmem:[#allocation2 + $0x1ac] sm:$0xf0]  ;;  %v6083_v25 = vor.u32 %v7299_v48, %v6082_v10 }
 0x3dc   :  { %v6115_v59 = vor.u32 %v7307_v18, %v6114_v3  ;;  %v6078_v8 = vld [vmem:[#allocation2 + $0x80] sm:$0xf]  ;;  %v7298_v26 = vld [vmem:[#allocation2 + $0x8c] sm:$0xf0] }
 0x3dd   :  { %2837 = vmatpush.bf16.msrb.mxu2 %v6087_v62  ;;  %v6110_v34 = vld [vmem:[#allocation2 + $0x180] sm:$0xf]  ;;  %v7306_v39 = vld [vmem:[#allocation2 + $0x18c] sm:$0xf0]  ;;  %v6079_v50 = vor.u32 %v7298_v26, %v6078_v8  ;;  %s2870_s5 = sshll.u32 %s8652_s0, 4  ;;  %s2871_s5 = int_to_ptr.hbm [resolvable:$true] %s2870_s5 }
 0x3de   :  { %2851 = vmatpush.bf16.msrb.mxu3 %v6119_v43  ;;  %v6111_v19 = vor.u32 %v7306_v39, %v6110_v34  ;;  %v6074_v51 = vld [vmem:[#allocation2 + $0x60] sm:$0xf]  ;;  %v7297_v31 = vld [vmem:[#allocation2 + $0x6c] sm:$0xf0] }
 0x3df   :  { %v6106_v12 = vld [vmem:[#allocation2 + $0x160] sm:$0xf]  ;;  %v7305_v56 = vld [vmem:[#allocation2 + $0x16c] sm:$0xf0]  ;;  %v6075_v13 = vor.u32 %v7297_v31, %v6074_v51 }
 0x3e0   :  { %v6107_v40 = vor.u32 %v7305_v56, %v6106_v12  ;;  %v6070_v14 = vld [vmem:[#allocation2 + $0x40] sm:$0xf]  ;;  %v7296_v6 = vld [vmem:[#allocation2 + $0x4c] sm:$0xf0] }
 0x3e1   :  { %2838 = vmatpush.bf16.msrb.mxu2 %v6083_v25  ;;  %v6102_v54 = vld [vmem:[#allocation2 + $0x140] sm:$0xf]  ;;  %v7304_v60 = vld [vmem:[#allocation2 + $0x14c] sm:$0xf0]  ;;  %v6071_v0 = vor.u32 %v7296_v6, %v6070_v14 }
 0x3e2   :  { %2852 = vmatpush.bf16.msrb.mxu3 %v6115_v59  ;;  %v6103_v15 = vor.u32 %v7304_v60, %v6102_v54  ;;  %v6066_v58 = vld [vmem:[#allocation2 + $0x20] sm:$0xf]  ;;  %v7295_v1 = vld [vmem:[#allocation2 + $0x2c] sm:$0xf0] }
 0x3e3   :  { %v6098_v16 = vld [vmem:[#allocation2 + $0x120] sm:$0xf]  ;;  %v7303_v17 = vld [vmem:[#allocation2 + $0x12c] sm:$0xf0]  ;;  %v6067_v20 = vor.u32 %v7295_v1, %v6066_v58 }
 0x3e4   :  { %v6099_v22 = vor.u32 %v7303_v17, %v6098_v16  ;;  %v6062_v23 = vld [vmem:[#allocation2] sm:$0xf]  ;;  %v7294_v24 = vld [vmem:[#allocation2 + $0xc] sm:$0xf0] }
 0x3e5   :  { %2839 = vmatpush.bf16.msrb.mxu2 %v6079_v50  ;;  %v6094_v7 = vld [vmem:[#allocation2 + $0x100] sm:$0xf]  ;;  %v7302_v9 = vld [vmem:[#allocation2 + $0x10c] sm:$0xf0]  ;;  %v6063_v11 = vor.u32 %v7294_v24, %v6062_v23 }
 0x3e6   :  { %2853 = vmatpush.bf16.msrb.mxu3 %v6111_v19  ;;  %v6095_v27 = vor.u32 %v7302_v9, %v6094_v7  ;;  %2877 = dma.hbm_to_vmem [thread:$0]  %s2871_s5, 1024, %s8244_s28, [#allocation4], %s8075_s1, %s8073_s4, %s8076_s27 }
 0x3e9   :  { %2840 = vmatpush.bf16.msrb.mxu2 %v6075_v13 }
 0x3ea   :  { %2854 = vmatpush.bf16.msrb.mxu3 %v6107_v40 }
 0x3ed   :  { %2841 = vmatpush.bf16.msrb.mxu2 %v6071_v0 }
 0x3ee   :  { %2855 = vmatpush.bf16.msrb.mxu3 %v6103_v15 }
 0x3f1   :  { %2842 = vmatpush.bf16.msrb.mxu2 %v6067_v20 }
 0x3f2   :  { %2856 = vmatpush.bf16.msrb.mxu3 %v6099_v22 }
 0x3f5   :  { %2843 = vmatpush.bf16.msrb.mxu2 %v6063_v11 }
 0x3f6   :  { %2857 = vmatpush.bf16.msrb.mxu3 %v6095_v27 }
 0x3f8   :  { %2844 = vmatmul.bf16.vlgmr.msrb.gmra.mxu2 %v2734_v28 }
 0x3f9   :  { %2858 = vmatmul.bf16.vlgmr.msrb.gmra.mxu3 %v2735_v29 }
 0x47b   :  { %v2845_v32 = vpop.f32.mrf.mxu2 }
 0x47c   :  { %v2846_v33 = vadd.f32 %v7546_v30, %v2845_v32  ;;  %v2859_v46 = vpop.f32.mrf.mxu3 }
 0x47e   :  { %v2860_v21 = vadd.f32 %v2859_v46, %v2846_v33 }
 0x480   :  { %vm2864_vm8 = vcmp.gt.f32.partialorder %v2860_v21, 0.0  ;;  %v2866_v35 = vmul.f32 0.2, %v2860_v21 }
 0x482   :  { %v8450_v36 = vsel %vm2864_vm8, %v2860_v21, %v2866_v35 }
 0x483   :  { %v2847_v37 = vpop.f32.mrf.mxu2 }
 0x484   :  { %v2848_v38 = vadd.f32 %v7546_v30, %v2847_v37  ;;  %v2861_v41 = vpop.f32.mrf.mxu3 }
 0x486   :  { %v2862_v42 = vadd.f32 %v2861_v41, %v2848_v38 }
 0x488   :  { %vm2865_vm9 = vcmp.gt.f32.partialorder %v2862_v42, 0.0  ;;  %v2867_v44 = vmul.f32 0.2, %v2862_v42 }
 0x48a   :  { %v8452_v45 = vsel %vm2865_vm9, %v2862_v42, %v2867_v44 }
 0x48b   :  { %8046 = dma.done.wait [#allocation4 + $0x1], 2048 }
 0x48c   :  { %8047 = vsyncadd [#allocation4 + $0x1], 4294965248  ;;  %v6182_v63 = vld [vmem:[#allocation3 + $0xe0] sm:$0xf]  ;;  %v7325_v47 = vld [vmem:[#allocation3 + $0xec] sm:$0xf0]  ;;  %v2898_v27 = vpack.c.bf16 %v8452_v45, %v8450_v36 }
 0x48d   :  { %v7324_v52 = vld [vmem:[#allocation3 + $0xe4] sm:$0xf]  ;;  %v6183_v53 = vor.u32 %v7325_v47, %v6182_v63  ;;  %v6184_v55 = vld [vmem:[#allocation3 + $0xf0] sm:$0xf0]  ;;  %v6174_v57 = vld [vmem:[#allocation3 + $0xc0] sm:$0xf] }
 0x48e   :  { %v7323_v2 = vld [vmem:[#allocation3 + $0xcc] sm:$0xf0]  ;;  %v6187_v4 = vor.u32 %v7324_v52, %v6184_v55  ;;  %v7322_v5 = vld [vmem:[#allocation3 + $0xc4] sm:$0xf]  ;;  %v6176_v61 = vld [vmem:[#allocation3 + $0xd0] sm:$0xf0] }
 0x48f   :  { %2985 = vmatpush.bf16.msra.mxu0 %v6183_v53  ;;  %v6175_v49 = vor.u32 %v7323_v2, %v6174_v57  ;;  %v6179_v62 = vor.u32 %v7322_v5, %v6176_v61  ;;  %v6166_v43 = vld [vmem:[#allocation3 + $0xa0] sm:$0xf]  ;;  %v7321_v10 = vld [vmem:[#allocation3 + $0xac] sm:$0xf0]  ;;  %v7320_v48 = vld [vmem:[#allocation3 + $0xa4] sm:$0xf] }
 0x490   :  { %2999 = vmatpush.bf16.msra.mxu1 %v6187_v4  ;;  %v6168_v3 = vld [vmem:[#allocation3 + $0xb0] sm:$0xf0]  ;;  %v6167_v18 = vor.u32 %v7321_v10, %v6166_v43  ;;  %v6158_v59 = vld [vmem:[#allocation3 + $0x80] sm:$0xf]  ;;  %v7319_v8 = vld [vmem:[#allocation3 + $0x8c] sm:$0xf0] }
 0x491   :  { %v6171_v25 = vor.u32 %v7320_v48, %v6168_v3  ;;  %v7318_v26 = vld [vmem:[#allocation3 + $0x84] sm:$0xf]  ;;  %v6160_v34 = vld [vmem:[#allocation3 + $0x90] sm:$0xf0]  ;;  %v6159_v39 = vor.u32 %v7319_v8, %v6158_v59  ;;  %v6150_v19 = vld [vmem:[#allocation3 + $0x60] sm:$0xf] }
 0x492   :  { %v6163_v50 = vor.u32 %v7318_v26, %v6160_v34  ;;  %v7317_v51 = vld [vmem:[#allocation3 + $0x6c] sm:$0xf0]  ;;  %v7316_v31 = vld [vmem:[#allocation3 + $0x64] sm:$0xf]  ;;  %v6152_v12 = vld [vmem:[#allocation3 + $0x70] sm:$0xf0] }
 0x493   :  { %2986 = vmatpush.bf16.msra.mxu0 %v6175_v49  ;;  %v6151_v56 = vor.u32 %v7317_v51, %v6150_v19  ;;  %v6155_v13 = vor.u32 %v7316_v31, %v6152_v12  ;;  %v6142_v40 = vld [vmem:[#allocation3 + $0x40] sm:$0xf]  ;;  %v7315_v14 = vld [vmem:[#allocation3 + $0x4c] sm:$0xf0]  ;;  %v7314_v6 = vld [vmem:[#allocation3 + $0x44] sm:$0xf] }
 0x494   :  { %3000 = vmatpush.bf16.msra.mxu1 %v6179_v62  ;;  %v6144_v54 = vld [vmem:[#allocation3 + $0x50] sm:$0xf0]  ;;  %v6143_v60 = vor.u32 %v7315_v14, %v6142_v40  ;;  %v6134_v15 = vld [vmem:[#allocation3 + $0x20] sm:$0xf]  ;;  %v7313_v58 = vld [vmem:[#allocation3 + $0x2c] sm:$0xf0] }
 0x495   :  { %v6147_v0 = vor.u32 %v7314_v6, %v6144_v54  ;;  %v7312_v1 = vld [vmem:[#allocation3 + $0x24] sm:$0xf]  ;;  %v6136_v16 = vld [vmem:[#allocation3 + $0x30] sm:$0xf0]  ;;  %v6135_v17 = vor.u32 %v7313_v58, %v6134_v15  ;;  %v6126_v22 = vld [vmem:[#allocation3] sm:$0xf] }
 0x496   :  { %v6139_v20 = vor.u32 %v7312_v1, %v6136_v16  ;;  %v7311_v23 = vld [vmem:[#allocation3 + $0xc] sm:$0xf0]  ;;  %v7310_v24 = vld [vmem:[#allocation3 + $0x4] sm:$0xf]  ;;  %v6128_v7 = vld [vmem:[#allocation3 + $0x10] sm:$0xf0] }
 0x497   :  { %2987 = vmatpush.bf16.msra.mxu0 %v6167_v18  ;;  %v6127_v9 = vor.u32 %v7311_v23, %v6126_v22  ;;  %v6131_v11 = vor.u32 %v7310_v24, %v6128_v7  ;;  %s8653_s9 = sld [smem:[#allocation62_spill]]  ;;  %v2899_v28 = vld [vmem:[%s8622_s18] sm:$0x3]  ;;  %v3017_v21 = vld [vmem:[#allocation8] sm:$0xff]  ;;  %v3018_v44 = vld [vmem:[#allocation8 + $0x8] sm:$0xff] }
 0x498   :  { %3001 = vmatpush.bf16.msra.mxu1 %v6171_v25  ;;  %v2901_v29 = vperm.slane %v2899_v28, 0  ;;  %v2902_v30 = vperm.slane %v2899_v28, 1 }
 0x49b   :  { %2988 = vmatpush.bf16.msra.mxu0 %v6159_v39 }
 0x49c   :  { %3002 = vmatpush.bf16.msra.mxu1 %v6163_v50 }
 0x49d   :  { %s3023_s10 = sshll.u32 %s8653_s9, 4  ;;  %s3024_s10 = int_to_ptr.hbm [resolvable:$true] %s3023_s10 }
 0x49e   :  { %3030 = dma.hbm_to_vmem [thread:$0]  %s3024_s10, 2048, %s8253_s13, [#allocation4 + $0x1], %s8063_s30, %s8073_s4, %s8064_s2 }
 0x49f   :  { %2989 = vmatpush.bf16.msra.mxu0 %v6151_v56 }
 0x4a0   :  { %3003 = vmatpush.bf16.msra.mxu1 %v6155_v13 }
 0x4a3   :  { %2990 = vmatpush.bf16.msra.mxu0 %v6143_v60 }
 0x4a4   :  { %3004 = vmatpush.bf16.msra.mxu1 %v6147_v0 }
 0x4a7   :  { %2991 = vmatpush.bf16.msra.mxu0 %v6135_v17 }
 0x4a8   :  { %3005 = vmatpush.bf16.msra.mxu1 %v6139_v20 }
 0x4ab   :  { %2992 = vmatpush.bf16.msra.mxu0 %v6127_v9 }
 0x4ac   :  { %3006 = vmatpush.bf16.msra.mxu1 %v6131_v11 }
 0x4ae   :  { %2993 = vmatmul.bf16.vlgmr.msra.gmra.mxu0 %v2898_v27 }
 0x4af   :  { %3007 = vmatmul.bf16.vlgmr.msra.gmra.mxu1 %v2898_v27 }
 0x52b   :  { %v2994_v32 = vpop.f32.mrf.mxu0 }
 0x52c   :  { %v2995_v33 = vadd.f32 %v2994_v32, %v2901_v29  ;;  %v3008_v46 = vpop.f32.mrf.mxu1 }
 0x52d   :  { %v3009_v35 = vadd.f32 %v3008_v46, %v2902_v30 }
 0x52e   :  { %3013 = vst [vmem:[#allocation17] sm:$0xff] %v2995_v33 }
 0x52f   :  { %3015 = vst [vmem:[#allocation19] sm:$0xff] %v3009_v35  ;;  %v3019_v36 = vmul.f32 %v3017_v21, %v3009_v35 }
 0x531   :  { %v3021_v37 = vadd.f32 %v3019_v36, %v2995_v33 }
 0x533   :  { %v2996_v38 = vpop.f32.mrf.mxu0 }
 0x534   :  { %v2997_v41 = vadd.f32 %v2996_v38, %v2901_v29  ;;  %v3010_v42 = vpop.f32.mrf.mxu1 }
 0x535   :  { %v3011_v45 = vadd.f32 %v3010_v42, %v2902_v30 }
 0x536   :  { %3014 = vst [vmem:[#allocation17 + $0x8] sm:$0xff] %v2997_v41 }
 0x537   :  { %3016 = vst [vmem:[#allocation19 + $0x8] sm:$0xff] %v3011_v45  ;;  %v3020_v63 = vmul.f32 %v3018_v44, %v3011_v45 }
 0x539   :  { %v3022_v47 = vadd.f32 %v3020_v63, %v2997_v41 }
 0x53a   :  { %8048 = dma.done.wait [#allocation4], 1024 }
 0x53b   :  { %8049 = vsyncadd [#allocation4], 4294966272  ;;  %v6218_v52 = vld [vmem:[#allocation2 + $0xe0] sm:$0xf]  ;;  %v7333_v53 = vld [vmem:[#allocation2 + $0xec] sm:$0xf0]  ;;  %v3050_v31 = vpack.c.bf16 %v3022_v47, %v3021_v37 }
 0x53c   :  { %v6214_v55 = vld [vmem:[#allocation2 + $0xc0] sm:$0xf]  ;;  %v6219_v57 = vor.u32 %v7333_v53, %v6218_v52  ;;  %v7332_v2 = vld [vmem:[#allocation2 + $0xcc] sm:$0xf0]  ;;  %s8654_s3 = sld [smem:[#allocation63_spill]] }
 0x53d   :  { %v6215_v4 = vor.u32 %v7332_v2, %v6214_v55  ;;  %v6210_v5 = vld [vmem:[#allocation2 + $0xa0] sm:$0xf]  ;;  %v7331_v61 = vld [vmem:[#allocation2 + $0xac] sm:$0xf0]  ;;  %v7547_v12 = vld [vmem:[#allocation14] ss:$0 sm:$0xff] }
 0x53e   :  { %3103 = vmatpush.bf16.msra.mxu2 %v6219_v57  ;;  %v6211_v49 = vor.u32 %v7331_v61, %v6210_v5  ;;  %v6206_v62 = vld [vmem:[#allocation2 + $0x80] sm:$0xf]  ;;  %v7330_v43 = vld [vmem:[#allocation2 + $0x8c] sm:$0xf0] }
 0x53f   :  { %v6207_v10 = vor.u32 %v7330_v43, %v6206_v62  ;;  %v6202_v48 = vld [vmem:[#allocation2 + $0x60] sm:$0xf]  ;;  %v7329_v3 = vld [vmem:[#allocation2 + $0x6c] sm:$0xf0] }
 0x540   :  { %v6203_v18 = vor.u32 %v7329_v3, %v6202_v48  ;;  %v6198_v25 = vld [vmem:[#allocation2 + $0x40] sm:$0xf]  ;;  %v7328_v59 = vld [vmem:[#allocation2 + $0x4c] sm:$0xf0] }
 0x541   :  { %v6199_v8 = vor.u32 %v7328_v59, %v6198_v25  ;;  %v6194_v26 = vld [vmem:[#allocation2 + $0x20] sm:$0xf]  ;;  %v7327_v34 = vld [vmem:[#allocation2 + $0x2c] sm:$0xf0] }
 0x542   :  { %3104 = vmatpush.bf16.msra.mxu2 %v6215_v4  ;;  %v6195_v39 = vor.u32 %v7327_v34, %v6194_v26  ;;  %v6190_v50 = vld [vmem:[#allocation2] sm:$0xf]  ;;  %v7326_v19 = vld [vmem:[#allocation2 + $0xc] sm:$0xf0]  ;;  %s3130_s15 = sshll.u32 %s8654_s3, 4  ;;  %s3131_s15 = int_to_ptr.hbm [resolvable:$true] %s3130_s15 }
 0x543   :  { %v6191_v51 = vor.u32 %v7326_v19, %v6190_v50  ;;  %3135 = dma.hbm_to_vmem [thread:$0]  %s3131_s15, 8192, %s8244_s28, [#allocation4] }
 0x546   :  { %3105 = vmatpush.bf16.msra.mxu2 %v6211_v49 }
 0x54a   :  { %3106 = vmatpush.bf16.msra.mxu2 %v6207_v10 }
 0x54e   :  { %3107 = vmatpush.bf16.msra.mxu2 %v6203_v18 }
 0x552   :  { %3108 = vmatpush.bf16.msra.mxu2 %v6199_v8 }
 0x556   :  { %3109 = vmatpush.bf16.msra.mxu2 %v6195_v39 }
 0x55a   :  { %3110 = vmatpush.bf16.msra.mxu2 %v6191_v51 }
 0x55d   :  { %3111 = vmatmul.bf16.vlgmr.msra.gmra.mxu2 %v3050_v31 }
 0x5e0   :  { %v3112_v56 = vpop.f32.mrf.mxu2 }
 0x5e1   :  { %v3113_v13 = vadd.f32 %v7547_v12, %v3112_v56 }
 0x5e3   :  { %vm3117_vm10 = vcmp.gt.f32.partialorder %v3113_v13, 0.0  ;;  %v3119_v40 = vmul.f32 0.2, %v3113_v13 }
 0x5e5   :  { %v8470_v14 = vsel %vm3117_vm10, %v3113_v13, %v3119_v40 }
 0x5e8   :  { %v3114_v6 = vpop.f32.mrf.mxu2 }
 0x5e9   :  { %v3115_v54 = vadd.f32 %v7547_v12, %v3114_v6 }
 0x5eb   :  { %vm3118_vm11 = vcmp.gt.f32.partialorder %v3115_v54, 0.0  ;;  %v3120_v60 = vmul.f32 0.2, %v3115_v54 }
 0x5ed   :  { %v8472_v0 = vsel %vm3118_vm11, %v3115_v54, %v3120_v60 }
 0x5ee   :  { %8050 = dma.done.wait [#allocation4 + $0x1], 2048 }
 0x5ef   :  { %8051 = vsyncadd [#allocation4 + $0x1], 4294965248  ;;  %v6278_v15 = vld [vmem:[#allocation3 + $0xe0] sm:$0xf]  ;;  %v7349_v58 = vld [vmem:[#allocation3 + $0xec] sm:$0xf0]  ;;  %v3154_v26 = vpack.c.bf16 %v8472_v0, %v8470_v14 }
 0x5f0   :  { %v7348_v1 = vld [vmem:[#allocation3 + $0xe4] sm:$0xf]  ;;  %v6279_v16 = vor.u32 %v7349_v58, %v6278_v15  ;;  %v6280_v17 = vld [vmem:[#allocation3 + $0xf0] sm:$0xf0]  ;;  %v6270_v20 = vld [vmem:[#allocation3 + $0xc0] sm:$0xf] }
 0x5f1   :  { %v7347_v22 = vld [vmem:[#allocation3 + $0xcc] sm:$0xf0]  ;;  %v6283_v23 = vor.u32 %v7348_v1, %v6280_v17  ;;  %v7346_v24 = vld [vmem:[#allocation3 + $0xc4] sm:$0xf]  ;;  %v6272_v7 = vld [vmem:[#allocation3 + $0xd0] sm:$0xf0] }
 0x5f2   :  { %3241 = vmatpush.bf16.msra.mxu3 %v6279_v16  ;;  %v6271_v9 = vor.u32 %v7347_v22, %v6270_v20  ;;  %v6275_v11 = vor.u32 %v7346_v24, %v6272_v7  ;;  %v6262_v27 = vld [vmem:[#allocation3 + $0xa0] sm:$0xf]  ;;  %v7345_v28 = vld [vmem:[#allocation3 + $0xac] sm:$0xf0]  ;;  %v7344_v29 = vld [vmem:[#allocation3 + $0xa4] sm:$0xf] }
 0x5f3   :  { %3255 = vmatpush.bf16.msrb.mxu0 %v6283_v23  ;;  %v6264_v30 = vld [vmem:[#allocation3 + $0xb0] sm:$0xf0]  ;;  %v6263_v32 = vor.u32 %v7345_v28, %v6262_v27  ;;  %v6254_v46 = vld [vmem:[#allocation3 + $0x80] sm:$0xf]  ;;  %v7343_v21 = vld [vmem:[#allocation3 + $0x8c] sm:$0xf0] }
 0x5f4   :  { %v6267_v33 = vor.u32 %v7344_v29, %v6264_v30  ;;  %v7342_v35 = vld [vmem:[#allocation3 + $0x84] sm:$0xf]  ;;  %v6256_v36 = vld [vmem:[#allocation3 + $0x90] sm:$0xf0]  ;;  %v6255_v37 = vor.u32 %v7343_v21, %v6254_v46  ;;  %v6246_v41 = vld [vmem:[#allocation3 + $0x60] sm:$0xf] }
 0x5f5   :  { %v6259_v38 = vor.u32 %v7342_v35, %v6256_v36  ;;  %v7341_v42 = vld [vmem:[#allocation3 + $0x6c] sm:$0xf0]  ;;  %v7340_v44 = vld [vmem:[#allocation3 + $0x64] sm:$0xf]  ;;  %v6248_v45 = vld [vmem:[#allocation3 + $0x70] sm:$0xf0] }
 0x5f6   :  { %3242 = vmatpush.bf16.msra.mxu3 %v6271_v9  ;;  %v6247_v63 = vor.u32 %v7341_v42, %v6246_v41  ;;  %v6251_v47 = vor.u32 %v7340_v44, %v6248_v45  ;;  %v6238_v52 = vld [vmem:[#allocation3 + $0x40] sm:$0xf]  ;;  %v7339_v53 = vld [vmem:[#allocation3 + $0x4c] sm:$0xf0]  ;;  %v7338_v55 = vld [vmem:[#allocation3 + $0x44] sm:$0xf] }
 0x5f7   :  { %3256 = vmatpush.bf16.msrb.mxu0 %v6275_v11  ;;  %v6240_v57 = vld [vmem:[#allocation3 + $0x50] sm:$0xf0]  ;;  %v6239_v2 = vor.u32 %v7339_v53, %v6238_v52  ;;  %v6230_v5 = vld [vmem:[#allocation3 + $0x20] sm:$0xf]  ;;  %v7337_v61 = vld [vmem:[#allocation3 + $0x2c] sm:$0xf0] }
 0x5f8   :  { %v6243_v4 = vor.u32 %v7338_v55, %v6240_v57  ;;  %v7336_v49 = vld [vmem:[#allocation3 + $0x24] sm:$0xf]  ;;  %v6232_v62 = vld [vmem:[#allocation3 + $0x30] sm:$0xf0]  ;;  %v6231_v43 = vor.u32 %v7337_v61, %v6230_v5  ;;  %v6222_v48 = vld [vmem:[#allocation3] sm:$0xf] }
 0x5f9   :  { %v6235_v10 = vor.u32 %v7336_v49, %v6232_v62  ;;  %v7335_v3 = vld [vmem:[#allocation3 + $0xc] sm:$0xf0]  ;;  %v7334_v18 = vld [vmem:[#allocation3 + $0x4] sm:$0xf]  ;;  %v6224_v25 = vld [vmem:[#allocation3 + $0x10] sm:$0xf0] }
 0x5fa   :  { %3243 = vmatpush.bf16.msra.mxu3 %v6263_v32  ;;  %v6223_v59 = vor.u32 %v7335_v3, %v6222_v48  ;;  %v6227_v8 = vor.u32 %v7334_v18, %v6224_v25  ;;  %s3281_s16 = sshll.u32 %s8615_s11, 4  ;;  %v3155_v34 = vld [vmem:[%s8624_s20] sm:$0x3]  ;;  %s3282_s16 = int_to_ptr.hbm [resolvable:$true] %s3281_s16 }
 0x5fb   :  { %3257 = vmatpush.bf16.msrb.mxu0 %v6267_v33  ;;  %3288 = dma.hbm_to_vmem [thread:$0]  %s3282_s16, 8192, %s8253_s13, [#allocation4 + $0x1], %s8063_s30, %s8073_s4, %s8064_s2  ;;  %v3158_v39 = vperm.slane %v3155_v34, 1  ;;  %v3157_v51 = vperm.slane %v3155_v34, 0 }
 0x5fe   :  { %3244 = vmatpush.bf16.msra.mxu3 %v6255_v37 }
 0x5ff   :  { %3258 = vmatpush.bf16.msrb.mxu0 %v6259_v38 }
 0x602   :  { %3245 = vmatpush.bf16.msra.mxu3 %v6247_v63 }
 0x603   :  { %3259 = vmatpush.bf16.msrb.mxu0 %v6251_v47 }
 0x606   :  { %3246 = vmatpush.bf16.msra.mxu3 %v6239_v2 }
 0x607   :  { %3260 = vmatpush.bf16.msrb.mxu0 %v6243_v4 }
 0x60a   :  { %3247 = vmatpush.bf16.msra.mxu3 %v6231_v43 }
 0x60b   :  { %3261 = vmatpush.bf16.msrb.mxu0 %v6235_v10 }
 0x60e   :  { %3248 = vmatpush.bf16.msra.mxu3 %v6223_v59 }
 0x60f   :  { %3262 = vmatpush.bf16.msrb.mxu0 %v6227_v8 }
 0x611   :  { %3249 = vmatmul.bf16.vlgmr.msra.gmra.mxu3 %v3154_v26 }
 0x612   :  { %3263 = vmatmul.bf16.vlgmr.msrb.gmra.mxu0 %v3154_v26 }
 0x68f   :  { %v3264_v50 = vpop.f32.mrf.mxu0 }
 0x690   :  { %v3265_v19 = vadd.f32 %v3264_v50, %v3158_v39 }
 0x692   :  { %vm3270_vm12 = vcmp.gt.f32.partialorder %v3265_v19, 0.0  ;;  %v3274_v31 = vmul.f32 0.2, %v3265_v19 }
 0x694   :  { %v8486_v12 = vsel %vm3270_vm12, %v3265_v19, %v3274_v31  ;;  %v3250_v56 = vpop.f32.mrf.mxu3 }
 0x695   :  { %v3251_v13 = vadd.f32 %v3250_v56, %v3157_v51 }
 0x697   :  { %vm3269_vm13 = vcmp.gt.f32.partialorder %v3251_v13, 0.0  ;;  %v3273_v40 = vmul.f32 0.2, %v3251_v13  ;;  %v3266_v14 = vpop.f32.mrf.mxu0 }
 0x698   :  { %v3267_v6 = vadd.f32 %v3266_v14, %v3158_v39 }
 0x699   :  { %v8488_v54 = vsel %vm3269_vm13, %v3251_v13, %v3273_v40 }
 0x69a   :  { %vm3272_vm14 = vcmp.gt.f32.partialorder %v3267_v6, 0.0  ;;  %v3276_v60 = vmul.f32 0.2, %v3267_v6 }
 0x69c   :  { %v8490_v0 = vsel %vm3272_vm14, %v3267_v6, %v3276_v60  ;;  %v3252_v15 = vpop.f32.mrf.mxu3 }
 0x69d   :  { %v3253_v58 = vadd.f32 %v3252_v15, %v3157_v51 }
 0x69f   :  { %vm3271_vm15 = vcmp.gt.f32.partialorder %v3253_v58, 0.0  ;;  %v3275_v1 = vmul.f32 0.2, %v3253_v58 }
 0x6a1   :  { %v8492_v16 = vsel %vm3271_vm15, %v3253_v58, %v3275_v1 }
 0x6a2   :  { %8052 = dma.done.wait [#allocation4], 8192 }
 0x6a3   :  { %8053 = vsyncadd [#allocation4], 4294959104  ;;  %v6398_v17 = vld [vmem:[#allocation2 + $0xe0] sm:$0xf]  ;;  %v7380_v20 = vld [vmem:[#allocation2 + $0xec] sm:$0xf0] }
 0x6a4   :  { %v6526_v22 = vld [vmem:[#allocation2 + $0x1e0] sm:$0xf]  ;;  %v6399_v23 = vor.u32 %v7380_v20, %v6398_v17  ;;  %v7412_v24 = vld [vmem:[#allocation2 + $0x1ec] sm:$0xf0]  ;;  %v7378_v7 = vld [vmem:[#allocation2 + $0xe4] sm:$0xf] }
 0x6a5   :  { %v6400_v9 = vld [vmem:[#allocation2 + $0xf0] sm:$0xf0]  ;;  %v6527_v11 = vor.u32 %v7412_v24, %v6526_v22  ;;  %v7410_v28 = vld [vmem:[#allocation2 + $0x1e4] sm:$0xf]  ;;  %v6382_v30 = vld [vmem:[#allocation2 + $0xc0] sm:$0xf] }
 0x6a6   :  { %v6403_v27 = vor.u32 %v7378_v7, %v6400_v9  ;;  %v6528_v29 = vld [vmem:[#allocation2 + $0x1f0] sm:$0xf0]  ;;  %3687 = vmatpush.bf16.msrb.mxu1 %v6399_v23  ;;  %v7376_v33 = vld [vmem:[#allocation2 + $0xcc] sm:$0xf0]  ;;  %v6510_v46 = vld [vmem:[#allocation2 + $0x1c0] sm:$0xf] }
 0x6a7   :  { %v6531_v32 = vor.u32 %v7410_v28, %v6528_v29  ;;  %v7408_v21 = vld [vmem:[#allocation2 + $0x1cc] sm:$0xf0]  ;;  %3701 = vmatpush.bf16.msrb.mxu2 %v6527_v11  ;;  %v6383_v35 = vor.u32 %v7376_v33, %v6382_v30  ;;  %v7374_v37 = vld [vmem:[#allocation2 + $0xc4] sm:$0xf]  ;;  %v6384_v38 = vld [vmem:[#allocation2 + $0xd0] sm:$0xf0] }
 0x6a8   :  { %3715 = vmatpush.bf16.msrb.mxu3 %v6403_v27  ;;  %v6511_v36 = vor.u32 %v7408_v21, %v6510_v46  ;;  %v7406_v41 = vld [vmem:[#allocation2 + $0x1c4] sm:$0xf]  ;;  %v6387_v42 = vor.u32 %v7374_v37, %v6384_v38  ;;  %v6512_v44 = vld [vmem:[#allocation2 + $0x1d0] sm:$0xf0]  ;;  %v6366_v45 = vld [vmem:[#allocation2 + $0xa0] sm:$0xf] }
 0x6a9   :  { %3729 = vmatpush.bf16.msra.mxu0 %v6531_v32  ;;  %v7372_v63 = vld [vmem:[#allocation2 + $0xac] sm:$0xf0]  ;;  %v6515_v47 = vor.u32 %v7406_v41, %v6512_v44  ;;  %v6494_v52 = vld [vmem:[#allocation2 + $0x1a0] sm:$0xf]  ;;  %v7370_v55 = vld [vmem:[#allocation2 + $0xa4] sm:$0xf] }
 0x6aa   :  { %v7404_v53 = vld [vmem:[#allocation2 + $0x1ac] sm:$0xf0]  ;;  %3688 = vmatpush.bf16.msrb.mxu1 %v6383_v35  ;;  %v6367_v57 = vor.u32 %v7372_v63, %v6366_v45  ;;  %v6368_v2 = vld [vmem:[#allocation2 + $0xb0] sm:$0xf0]  ;;  %v7402_v4 = vld [vmem:[#allocation2 + $0x1a4] sm:$0xf] }
 0x6ab   :  { %v6496_v5 = vld [vmem:[#allocation2 + $0x1b0] sm:$0xf0]  ;;  %3702 = vmatpush.bf16.msrb.mxu2 %v6511_v36  ;;  %v6495_v61 = vor.u32 %v7404_v53, %v6494_v52  ;;  %v6371_v49 = vor.u32 %v7370_v55, %v6368_v2  ;;  %v6350_v62 = vld [vmem:[#allocation2 + $0x80] sm:$0xf]  ;;  %v7368_v43 = vld [vmem:[#allocation2 + $0x8c] sm:$0xf0] }
 0x6ac   :  { %3716 = vmatpush.bf16.msrb.mxu3 %v6387_v42  ;;  %v6478_v10 = vld [vmem:[#allocation2 + $0x180] sm:$0xf]  ;;  %v6499_v48 = vor.u32 %v7402_v4, %v6496_v5  ;;  %v7400_v3 = vld [vmem:[#allocation2 + $0x18c] sm:$0xf0]  ;;  %v7366_v18 = vld [vmem:[#allocation2 + $0x84] sm:$0xf]  ;;  %v6351_v26 = vor.u32 %v7368_v43, %v6350_v62 }
 0x6ad   :  { %3730 = vmatpush.bf16.msra.mxu0 %v6515_v47  ;;  %v6352_v25 = vld [vmem:[#allocation2 + $0x90] sm:$0xf0]  ;;  %v7398_v59 = vld [vmem:[#allocation2 + $0x184] sm:$0xf]  ;;  %v6479_v34 = vor.u32 %v7400_v3, %v6478_v10  ;;  %v6334_v50 = vld [vmem:[#allocation2 + $0x60] sm:$0xf] }
 0x6ae   :  { %v6480_v8 = vld [vmem:[#allocation2 + $0x190] sm:$0xf0]  ;;  %3689 = vmatpush.bf16.msrb.mxu1 %v6367_v57  ;;  %v6355_v39 = vor.u32 %v7366_v18, %v6352_v25  ;;  %v7364_v19 = vld [vmem:[#allocation2 + $0x6c] sm:$0xf0]  ;;  %v6462_v51 = vld [vmem:[#allocation2 + $0x160] sm:$0xf] }
 0x6af   :  { %3703 = vmatpush.bf16.msrb.mxu2 %v6495_v61  ;;  %v6483_v31 = vor.u32 %v7398_v59, %v6480_v8  ;;  %v7396_v56 = vld [vmem:[#allocation2 + $0x16c] sm:$0xf0]  ;;  %v7362_v13 = vld [vmem:[#allocation2 + $0x64] sm:$0xf]  ;;  %v6336_v40 = vld [vmem:[#allocation2 + $0x70] sm:$0xf0]  ;;  %v6335_v60 = vor.u32 %v7364_v19, %v6334_v50 }
 0x6b0   :  { %3717 = vmatpush.bf16.msrb.mxu3 %v6371_v49  ;;  %v7394_v14 = vld [vmem:[#allocation2 + $0x164] sm:$0xf]  ;;  %v6464_v6 = vld [vmem:[#allocation2 + $0x170] sm:$0xf0]  ;;  %v6463_v15 = vor.u32 %v7396_v56, %v6462_v51  ;;  %v6339_v58 = vor.u32 %v7362_v13, %v6336_v40  ;;  %v6318_v1 = vld [vmem:[#allocation2 + $0x40] sm:$0xf] }
 0x6b1   :  { %3731 = vmatpush.bf16.msra.mxu0 %v6499_v48  ;;  %v7360_v17 = vld [vmem:[#allocation2 + $0x4c] sm:$0xf0]  ;;  %v6446_v20 = vld [vmem:[#allocation2 + $0x140] sm:$0xf]  ;;  %v6467_v22 = vor.u32 %v7394_v14, %v6464_v6  ;;  %v7358_v24 = vld [vmem:[#allocation2 + $0x44] sm:$0xf]  ;;  %v8496_v14 = vpack.c.bf16 %v8492_v16, %v8488_v54 }
 0x6b2   :  { %3690 = vmatpush.bf16.msrb.mxu1 %v6351_v26  ;;  %v7392_v23 = vld [vmem:[#allocation2 + $0x14c] sm:$0xf0]  ;;  %v6320_v7 = vld [vmem:[#allocation2 + $0x50] sm:$0xf0]  ;;  %v7390_v9 = vld [vmem:[#allocation2 + $0x144] sm:$0xf]  ;;  %v6319_v27 = vor.u32 %v7360_v17, %v6318_v1 }
 0x6b3   :  { %3704 = vmatpush.bf16.msrb.mxu2 %v6479_v34  ;;  %v6448_v11 = vld [vmem:[#allocation2 + $0x150] sm:$0xf0]  ;;  %v6447_v28 = vor.u32 %v7392_v23, %v6446_v20  ;;  %v6323_v29 = vor.u32 %v7358_v24, %v6320_v7  ;;  %v6302_v30 = vld [vmem:[#allocation2 + $0x20] sm:$0xf]  ;;  %v7356_v32 = vld [vmem:[#allocation2 + $0x2c] sm:$0xf0] }
 0x6b4   :  { %3718 = vmatpush.bf16.msrb.mxu3 %v6355_v39  ;;  %v6430_v33 = vld [vmem:[#allocation2 + $0x120] sm:$0xf]  ;;  %v6451_v46 = vor.u32 %v7390_v9, %v6448_v11  ;;  %v7388_v21 = vld [vmem:[#allocation2 + $0x12c] sm:$0xf0]  ;;  %v7354_v35 = vld [vmem:[#allocation2 + $0x24] sm:$0xf]  ;;  %v6303_v41 = vor.u32 %v7356_v32, %v6302_v30 }
 0x6b5   :  { %3732 = vmatpush.bf16.msra.mxu0 %v6483_v31  ;;  %v6304_v36 = vld [vmem:[#allocation2 + $0x30] sm:$0xf0]  ;;  %v7386_v37 = vld [vmem:[#allocation2 + $0x124] sm:$0xf]  ;;  %v6286_v42 = vld [vmem:[#allocation2] sm:$0xf]  ;;  %v6431_v45 = vor.u32 %v7388_v21, %v6430_v33 }
 0x6b6   :  { %3691 = vmatpush.bf16.msrb.mxu1 %v6335_v60  ;;  %v6432_v38 = vld [vmem:[#allocation2 + $0x130] sm:$0xf0]  ;;  %v7352_v44 = vld [vmem:[#allocation2 + $0xc] sm:$0xf0]  ;;  %v6307_v63 = vor.u32 %v7354_v35, %v6304_v36  ;;  %v6414_v47 = vld [vmem:[#allocation2 + $0x100] sm:$0xf] }
 0x6b7   :  { %3705 = vmatpush.bf16.msrb.mxu2 %v6463_v15  ;;  %v7384_v52 = vld [vmem:[#allocation2 + $0x10c] sm:$0xf0]  ;;  %v7350_v53 = vld [vmem:[#allocation2 + $0x4] sm:$0xf]  ;;  %v6435_v55 = vor.u32 %v7386_v37, %v6432_v38  ;;  %v6288_v57 = vld [vmem:[#allocation2 + $0x10] sm:$0xf0]  ;;  %v6287_v62 = vor.u32 %v7352_v44, %v6286_v42  ;;  %v8500_v15 = vpack.c.bf16 %v8490_v0, %v8486_v12 }
 0x6b8   :  { %3719 = vmatpush.bf16.msrb.mxu3 %v6339_v58  ;;  %v7382_v2 = vld [vmem:[#allocation2 + $0x104] sm:$0xf]  ;;  %v6416_v4 = vld [vmem:[#allocation2 + $0x110] sm:$0xf0]  ;;  %v6406_v5 = vld [vmem:[#allocation2 + $0xe8] sm:$0xf]  ;;  %v6415_v3 = vor.u32 %v7384_v52, %v6414_v47  ;;  %v6291_v18 = vor.u32 %v7350_v53, %v6288_v57 }
 0x6b9   :  { %3733 = vmatpush.bf16.msra.mxu0 %v6467_v22  ;;  %v7381_v61 = vld [vmem:[#allocation2 + $0xf4] sm:$0xf0]  ;;  %v6534_v49 = vld [vmem:[#allocation2 + $0x1e8] sm:$0xf]  ;;  %v7379_v10 = vld [vmem:[#allocation2 + $0xec] sm:$0xf]  ;;  %v6419_v8 = vor.u32 %v7382_v2, %v6416_v4 }
 0x6ba   :  { %3692 = vmatpush.bf16.msrb.mxu1 %v6319_v27  ;;  %v7413_v43 = vld [vmem:[#allocation2 + $0x1f4] sm:$0xf0]  ;;  %v6408_v48 = vld [vmem:[#allocation2 + $0xf8] sm:$0xf0]  ;;  %v7411_v25 = vld [vmem:[#allocation2 + $0x1ec] sm:$0xf]  ;;  %v6407_v26 = vor.u32 %v7381_v61, %v6406_v5 }
 0x6bb   :  { %3706 = vmatpush.bf16.msrb.mxu2 %v6447_v28  ;;  %v6536_v59 = vld [vmem:[#allocation2 + $0x1f8] sm:$0xf0]  ;;  %v6535_v34 = vor.u32 %v7413_v43, %v6534_v49  ;;  %v6411_v39 = vor.u32 %v7379_v10, %v6408_v48  ;;  %v6390_v50 = vld [vmem:[#allocation2 + $0xc8] sm:$0xf]  ;;  %v7377_v19 = vld [vmem:[#allocation2 + $0xd4] sm:$0xf0] }
 0x6bc   :  { %3720 = vmatpush.bf16.msrb.mxu3 %v6323_v29  ;;  %v6518_v51 = vld [vmem:[#allocation2 + $0x1c8] sm:$0xf]  ;;  %v6539_v31 = vor.u32 %v7411_v25, %v6536_v59  ;;  %v7409_v56 = vld [vmem:[#allocation2 + $0x1d4] sm:$0xf0]  ;;  %v7375_v13 = vld [vmem:[#allocation2 + $0xcc] sm:$0xf]  ;;  %v6391_v58 = vor.u32 %v7377_v19, %v6390_v50 }
 0x6bd   :  { %3734 = vmatpush.bf16.msra.mxu0 %v6451_v46  ;;  %v6392_v40 = vld [vmem:[#allocation2 + $0xd8] sm:$0xf0]  ;;  %v7407_v6 = vld [vmem:[#allocation2 + $0x1cc] sm:$0xf]  ;;  %v6519_v1 = vor.u32 %v7409_v56, %v6518_v51  ;;  %v6374_v20 = vld [vmem:[#allocation2 + $0xa8] sm:$0xf] }
 0x6be   :  { %3693 = vmatpush.bf16.msrb.mxu1 %v6303_v41  ;;  %v6520_v60 = vld [vmem:[#allocation2 + $0x1d8] sm:$0xf0]  ;;  %v6395_v17 = vor.u32 %v7375_v13, %v6392_v40  ;;  %v7373_v22 = vld [vmem:[#allocation2 + $0xb4] sm:$0xf0]  ;;  %v6502_v23 = vld [vmem:[#allocation2 + $0x1a8] sm:$0xf] }
 0x6bf   :  { %3707 = vmatpush.bf16.msrb.mxu2 %v6431_v45  ;;  %v6523_v54 = vor.u32 %v7407_v6, %v6520_v60  ;;  %v7405_v16 = vld [vmem:[#allocation2 + $0x1b4] sm:$0xf0]  ;;  %v7371_v24 = vld [vmem:[#allocation2 + $0xac] sm:$0xf]  ;;  %v6376_v7 = vld [vmem:[#allocation2 + $0xb8] sm:$0xf0]  ;;  %v6375_v9 = vor.u32 %v7373_v22, %v6374_v20 }
 0x6c0   :  { %3721 = vmatpush.bf16.msrb.mxu3 %v6307_v63  ;;  %v7403_v12 = vld [vmem:[#allocation2 + $0x1ac] sm:$0xf]  ;;  %v6504_v0 = vld [vmem:[#allocation2 + $0x1b8] sm:$0xf0]  ;;  %v6503_v11 = vor.u32 %v7405_v16, %v6502_v23  ;;  %v6379_v27 = vor.u32 %v7371_v24, %v6376_v7  ;;  %v6358_v28 = vld [vmem:[#allocation2 + $0x88] sm:$0xf] }
 0x6c1   :  { %3735 = vmatpush.bf16.msra.mxu0 %v6435_v55  ;;  %v7369_v29 = vld [vmem:[#allocation2 + $0x94] sm:$0xf0]  ;;  %v6486_v30 = vld [vmem:[#allocation2 + $0x188] sm:$0xf]  ;;  %v6507_v32 = vor.u32 %v7403_v12, %v6504_v0  ;;  %v7367_v46 = vld [vmem:[#allocation2 + $0x8c] sm:$0xf] }
 0x6c2   :  { %3694 = vmatpush.bf16.msrb.mxu1 %v6287_v62  ;;  %v7401_v33 = vld [vmem:[#allocation2 + $0x194] sm:$0xf0]  ;;  %v6360_v21 = vld [vmem:[#allocation2 + $0x98] sm:$0xf0]  ;;  %v7399_v35 = vld [vmem:[#allocation2 + $0x18c] sm:$0xf]  ;;  %v6359_v37 = vor.u32 %v7369_v29, %v6358_v28 }
 0x6c3   :  { %3708 = vmatpush.bf16.msrb.mxu2 %v6415_v3  ;;  %v6488_v36 = vld [vmem:[#allocation2 + $0x198] sm:$0xf0]  ;;  %v6487_v38 = vor.u32 %v7401_v33, %v6486_v30  ;;  %v6363_v41 = vor.u32 %v7367_v46, %v6360_v21  ;;  %v6342_v42 = vld [vmem:[#allocation2 + $0x68] sm:$0xf]  ;;  %v7365_v44 = vld [vmem:[#allocation2 + $0x74] sm:$0xf0] }
 0x6c4   :  { %3722 = vmatpush.bf16.msrb.mxu3 %v6291_v18  ;;  %v6470_v45 = vld [vmem:[#allocation2 + $0x168] sm:$0xf]  ;;  %v6491_v63 = vor.u32 %v7399_v35, %v6488_v36  ;;  %v7397_v47 = vld [vmem:[#allocation2 + $0x174] sm:$0xf0]  ;;  %v7363_v52 = vld [vmem:[#allocation2 + $0x6c] sm:$0xf]  ;;  %v6343_v2 = vor.u32 %v7365_v44, %v6342_v42 }
 0x6c5   :  { %3736 = vmatpush.bf16.msra.mxu0 %v6419_v8  ;;  %3695 = vmatmul.bf16.vlgmr.msrb.gmra.mxu1 %v8496_v14  ;;  %v6344_v53 = vld [vmem:[#allocation2 + $0x78] sm:$0xf0]  ;;  %v7395_v55 = vld [vmem:[#allocation2 + $0x16c] sm:$0xf]  ;;  %v6471_v4 = vor.u32 %v7397_v47, %v6470_v45  ;;  %v6326_v61 = vld [vmem:[#allocation2 + $0x48] sm:$0xf] }
 0x6c6   :  { %3743 = vmatpush.bf16.msra.mxu1 %v6407_v26  ;;  %3709 = vmatmul.bf16.vlgmr.msrb.gmra.mxu2 %v8500_v15  ;;  %v6472_v57 = vld [vmem:[#allocation2 + $0x178] sm:$0xf0]  ;;  %v6347_v5 = vor.u32 %v7363_v52, %v6344_v53  ;;  %v7361_v49 = vld [vmem:[#allocation2 + $0x54] sm:$0xf0]  ;;  %v6454_v62 = vld [vmem:[#allocation2 + $0x148] sm:$0xf] }
 0x6c7   :  { %3757 = vmatpush.bf16.msra.mxu2 %v6535_v34  ;;  %3723 = vmatmul.bf16.vlgmr.msrb.gmra.mxu3 %v8496_v14  ;;  %v6475_v43 = vor.u32 %v7395_v55, %v6472_v57  ;;  %v7393_v10 = vld [vmem:[#allocation2 + $0x154] sm:$0xf0]  ;;  %v7359_v48 = vld [vmem:[#allocation2 + $0x4c] sm:$0xf]  ;;  %v6328_v3 = vld [vmem:[#allocation2 + $0x58] sm:$0xf0]  ;;  %v6327_v59 = vor.u32 %v7361_v49, %v6326_v61 }
 0x6c8   :  { %3771 = vmatpush.bf16.msra.mxu3 %v6411_v39  ;;  %3737 = vmatmul.bf16.vlgmr.msra.gmra.mxu0 %v8500_v15  ;;  %v7391_v18 = vld [vmem:[#allocation2 + $0x14c] sm:$0xf]  ;;  %v6456_v25 = vld [vmem:[#allocation2 + $0x158] sm:$0xf0]  ;;  %v6455_v8 = vor.u32 %v7393_v10, %v6454_v62  ;;  %v6331_v26 = vor.u32 %v7359_v48, %v6328_v3  ;;  %v6310_v34 = vld [vmem:[#allocation2 + $0x28] sm:$0xf] }
 0x6c9   :  { %3785 = vmatpush.bf16.msrb.mxu0 %v6539_v31  ;;  %v7357_v39 = vld [vmem:[#allocation2 + $0x34] sm:$0xf0]  ;;  %v6438_v50 = vld [vmem:[#allocation2 + $0x128] sm:$0xf]  ;;  %v6459_v19 = vor.u32 %v7391_v18, %v6456_v25  ;;  %v7355_v31 = vld [vmem:[#allocation2 + $0x2c] sm:$0xf] }
 0x6ca   :  { %3744 = vmatpush.bf16.msra.mxu1 %v6391_v58  ;;  %v7389_v51 = vld [vmem:[#allocation2 + $0x134] sm:$0xf0]  ;;  %v6312_v56 = vld [vmem:[#allocation2 + $0x38] sm:$0xf0]  ;;  %v7387_v13 = vld [vmem:[#allocation2 + $0x12c] sm:$0xf]  ;;  %v6311_v6 = vor.u32 %v7357_v39, %v6310_v34 }
 0x6cb   :  { %3758 = vmatpush.bf16.msra.mxu2 %v6519_v1  ;;  %v6440_v40 = vld [vmem:[#allocation2 + $0x138] sm:$0xf0]  ;;  %v6439_v60 = vor.u32 %v7389_v51, %v6438_v50  ;;  %v6315_v58 = vor.u32 %v7355_v31, %v6312_v56  ;;  %v6294_v1 = vld [vmem:[#allocation2 + $0x8] sm:$0xf]  ;;  %v7385_v23 = vld [vmem:[#allocation2 + $0x114] sm:$0xf0] }
 0x6cc   :  { %3772 = vmatpush.bf16.msra.mxu3 %v6395_v17  ;;  %v7353_v17 = vld [vmem:[#allocation2 + $0x14] sm:$0xf0]  ;;  %v6422_v20 = vld [vmem:[#allocation2 + $0x108] sm:$0xf]  ;;  %v6443_v22 = vor.u32 %v7387_v13, %v6440_v40  ;;  %v6296_v16 = vld [vmem:[#allocation2 + $0x18] sm:$0xf0] }
 0x6cd   :  { %3786 = vmatpush.bf16.msrb.mxu0 %v6523_v54  ;;  %v7351_v54 = vld [vmem:[#allocation2 + $0xc] sm:$0xf]  ;;  %v6424_v7 = vld [vmem:[#allocation2 + $0x118] sm:$0xf0]  ;;  %v6295_v12 = vor.u32 %v7353_v17, %v6294_v1  ;;  %v6423_v0 = vor.u32 %v7385_v23, %v6422_v20  ;;  %s3823_s13 = sshll.u32 %s8616_s12, 4  ;;  %s8077_s0 = smov 192   ;;  %s3824_s13 = int_to_ptr.hbm [resolvable:$true] %s3823_s13 }
 0x6ce   :  { %3745 = vmatpush.bf16.msra.mxu1 %v6375_v9  ;;  %v7383_v24 = vld [vmem:[#allocation2 + $0x10c] sm:$0xf]  ;;  %v6299_v9 = vor.u32 %v7351_v54, %v6296_v16  ;;  %s8078_s5 = smov 12  }
 0x6cf   :  { %3759 = vmatpush.bf16.msra.mxu2 %v6503_v11  ;;  %v6427_v11 = vor.u32 %v7383_v24, %v6424_v7  ;;  %3830 = dma.hbm_to_vmem [thread:$0]  %s3824_s13, 6144, %s8244_s28, [#allocation4], %s8077_s0, %s8073_s4, %s8078_s5 }
 0x6d0   :  { %3773 = vmatpush.bf16.msra.mxu3 %v6379_v27  ;;  %v3357_v27 = vld [vmem:[%s8625_s21] sm:$0xf] }
 0x6d1   :  { %3787 = vmatpush.bf16.msrb.mxu0 %v6507_v32  ;;  %v3359_v28 = vperm.slane %v3357_v27, 0  ;;  %v3360_v30 = vperm.slane %v3357_v27, 1  ;;  %v3361_v61 = vperm.slane %v3357_v27, 2 }
 0x6d2   :  { %3746 = vmatpush.bf16.msra.mxu1 %v6359_v37 }
 0x6d3   :  { %3760 = vmatpush.bf16.msra.mxu2 %v6487_v38 }
 0x6d4   :  { %3774 = vmatpush.bf16.msra.mxu3 %v6363_v41 }
 0x6d5   :  { %3788 = vmatpush.bf16.msrb.mxu0 %v6491_v63 }
 0x6d6   :  { %3747 = vmatpush.bf16.msra.mxu1 %v6343_v2 }
 0x6d7   :  { %3761 = vmatpush.bf16.msra.mxu2 %v6471_v4 }
 0x6d8   :  { %3775 = vmatpush.bf16.msra.mxu3 %v6347_v5 }
 0x6d9   :  { %3789 = vmatpush.bf16.msrb.mxu0 %v6475_v43  ;;  %v3362_v43 = vperm.slane %v3357_v27, 3 }
 0x6da   :  { %3748 = vmatpush.bf16.msra.mxu1 %v6327_v59 }
 0x6db   :  { %3762 = vmatpush.bf16.msra.mxu2 %v6455_v8 }
 0x6dc   :  { %3776 = vmatpush.bf16.msra.mxu3 %v6331_v26 }
 0x6dd   :  { %3790 = vmatpush.bf16.msrb.mxu0 %v6459_v19 }
 0x6de   :  { %3749 = vmatpush.bf16.msra.mxu1 %v6311_v6 }
 0x6df   :  { %3763 = vmatpush.bf16.msra.mxu2 %v6439_v60 }
 0x6e0   :  { %3777 = vmatpush.bf16.msra.mxu3 %v6315_v58 }
 0x6e1   :  { %3791 = vmatpush.bf16.msrb.mxu0 %v6443_v22 }
 0x6e2   :  { %3750 = vmatpush.bf16.msra.mxu1 %v6295_v12 }
 0x6e3   :  { %3764 = vmatpush.bf16.msra.mxu2 %v6423_v0 }
 0x6e4   :  { %3778 = vmatpush.bf16.msra.mxu3 %v6299_v9 }
 0x6e5   :  { %3792 = vmatpush.bf16.msrb.mxu0 %v6427_v11  ;;  %3751 = vmatmul.bf16.vlgmr.msra.gmra.mxu1 %v8496_v14 }
 0x6e6   :  { %3765 = vmatmul.bf16.vlgmr.msra.gmra.mxu2 %v8500_v15 }
 0x6e7   :  { %3779 = vmatmul.bf16.vlgmr.msra.gmra.mxu3 %v8496_v14 }
 0x6e8   :  { %3793 = vmatmul.bf16.vlgmr.msrb.gmra.mxu0 %v8500_v15 }
 0x742   :  { %v3696_v29 = vpop.f32.mrf.mxu1 }
 0x743   :  { %v3697_v32 = vadd.f32 %v3696_v29, %v3359_v28 }
 0x745   :  { %v3738_v14 = vpop.f32.mrf.mxu0 }
 0x749   :  { %v3710_v46 = vpop.f32.mrf.mxu2 }
 0x74a   :  { %v3724_v33 = vpop.f32.mrf.mxu3  ;;  %v3711_v21 = vadd.f32 %v3710_v46, %v3697_v32  ;;  %v3698_v36 = vpop.f32.mrf.mxu1 }
 0x74b   :  { %v3725_v15 = vadd.f32 %v3724_v33, %v3360_v30  ;;  %v3699_v42 = vadd.f32 %v3698_v36, %v3359_v28 }
 0x74c   :  { %vm3799_vm0 = vcmp.gt.f32.partialorder %v3711_v21, 0.0  ;;  %v3807_v37 = vmul.f32 0.2, %v3711_v21 }
 0x74d   :  { %v3739_v35 = vadd.f32 %v3738_v14, %v3725_v15  ;;  %v3740_v63 = vpop.f32.mrf.mxu0 }
 0x74e   :  { %v8518_v41 = vsel %vm3799_vm0, %v3711_v21, %v3807_v37 }
 0x74f   :  { %vm3800_vm1 = vcmp.gt.f32.partialorder %v3739_v35, 0.0  ;;  %v3808_v38 = vmul.f32 0.2, %v3739_v35 }
 0x751   :  { %v8520_v44 = vsel %vm3800_vm1, %v3739_v35, %v3808_v38  ;;  %v3712_v52 = vpop.f32.mrf.mxu2 }
 0x752   :  { %v3726_v45 = vpop.f32.mrf.mxu3  ;;  %v3713_v53 = vadd.f32 %v3712_v52, %v3699_v42 }
 0x753   :  { %v3727_v47 = vadd.f32 %v3726_v45, %v3360_v30 }
 0x754   :  { %vm3803_vm2 = vcmp.gt.f32.partialorder %v3713_v53, 0.0  ;;  %v3811_v57 = vmul.f32 0.2, %v3713_v53 }
 0x755   :  { %v3741_v55 = vadd.f32 %v3740_v63, %v3727_v47 }
 0x756   :  { %v8522_v4 = vsel %vm3803_vm2, %v3713_v53, %v3811_v57 }
 0x757   :  { %vm3804_vm3 = vcmp.gt.f32.partialorder %v3741_v55, 0.0  ;;  %v3812_v2 = vmul.f32 0.2, %v3741_v55 }
 0x759   :  { %v8524_v5 = vsel %vm3804_vm3, %v3741_v55, %v3812_v2 }
 0x762   :  { %v3752_v49 = vpop.f32.mrf.mxu1 }
 0x763   :  { %v3753_v62 = vadd.f32 %v3752_v49, %v3361_v61 }
 0x765   :  { %v3794_v10 = vpop.f32.mrf.mxu0 }
 0x769   :  { %v3766_v48 = vpop.f32.mrf.mxu2 }
 0x76a   :  { %v3780_v3 = vpop.f32.mrf.mxu3  ;;  %v3767_v18 = vadd.f32 %v3766_v48, %v3753_v62  ;;  %v3754_v26 = vpop.f32.mrf.mxu1 }
 0x76b   :  { %v3781_v25 = vadd.f32 %v3780_v3, %v3362_v43  ;;  %v3755_v19 = vadd.f32 %v3754_v26, %v3361_v61 }
 0x76c   :  { %vm3801_vm4 = vcmp.gt.f32.partialorder %v3767_v18, 0.0  ;;  %v3809_v59 = vmul.f32 0.2, %v3767_v18 }
 0x76d   :  { %v3795_v8 = vadd.f32 %v3794_v10, %v3781_v25  ;;  %v3796_v40 = vpop.f32.mrf.mxu0 }
 0x76e   :  { %v8526_v34 = vsel %vm3801_vm4, %v3767_v18, %v3809_v59 }
 0x76f   :  { %vm3802_vm5 = vcmp.gt.f32.partialorder %v3795_v8, 0.0  ;;  %v3810_v39 = vmul.f32 0.2, %v3795_v8 }
 0x771   :  { %v8528_v50 = vsel %vm3802_vm5, %v3795_v8, %v3810_v39  ;;  %v3768_v51 = vpop.f32.mrf.mxu2 }
 0x772   :  { %v3782_v31 = vpop.f32.mrf.mxu3  ;;  %v3769_v56 = vadd.f32 %v3768_v51, %v3755_v19 }
 0x773   :  { %v3783_v13 = vadd.f32 %v3782_v31, %v3362_v43 }
 0x774   :  { %vm3805_vm6 = vcmp.gt.f32.partialorder %v3769_v56, 0.0  ;;  %v3813_v6 = vmul.f32 0.2, %v3769_v56 }
 0x775   :  { %v3797_v60 = vadd.f32 %v3796_v40, %v3783_v13 }
 0x776   :  { %v8530_v58 = vsel %vm3805_vm6, %v3769_v56, %v3813_v6 }
 0x777   :  { %vm3806_vm7 = vcmp.gt.f32.partialorder %v3797_v60, 0.0  ;;  %v3814_v1 = vmul.f32 0.2, %v3797_v60 }
 0x779   :  { %v8532_v17 = vsel %vm3806_vm7, %v3797_v60, %v3814_v1 }
 0x77a   :  { %8054 = dma.done.wait [#allocation4 + $0x1], 8192 }
 0x77b   :  { %8055 = vsyncadd [#allocation4 + $0x1], 4294959104  ;;  %v6598_v20 = vld [vmem:[#allocation3 + $0xe0] sm:$0xf]  ;;  %v7429_v22 = vld [vmem:[#allocation3 + $0xec] sm:$0xf0] }
 0x77c   :  { %v6662_v23 = vld [vmem:[#allocation3 + $0x1e0] sm:$0xf]  ;;  %v6599_v54 = vor.u32 %v7429_v22, %v6598_v20  ;;  %v7445_v16 = vld [vmem:[#allocation3 + $0x1ec] sm:$0xf0] }
 0x77d   :  { %v6726_v24 = vld [vmem:[#allocation3 + $0x2e0] sm:$0xf]  ;;  %v7461_v7 = vld [vmem:[#allocation3 + $0x2ec] sm:$0xf0]  ;;  %v6663_v12 = vor.u32 %v7445_v16, %v6662_v23 }
 0x77e   :  { %v6727_v0 = vor.u32 %v7461_v7, %v6726_v24  ;;  %v6790_v9 = vld [vmem:[#allocation3 + $0x3e0] sm:$0xf]  ;;  %v7477_v11 = vld [vmem:[#allocation3 + $0x3ec] sm:$0xf0]  ;;  %4227 = vmatpush.bf16.msrb.mxu1 %v6599_v54 }
 0x77f   :  { %v6590_v27 = vld [vmem:[#allocation3 + $0xc0] sm:$0xf]  ;;  %v6791_v28 = vor.u32 %v7477_v11, %v6790_v9  ;;  %v7427_v29 = vld [vmem:[#allocation3 + $0xcc] sm:$0xf0]  ;;  %4241 = vmatpush.bf16.msrb.mxu2 %v6663_v12 }
 0x780   :  { %v6654_v30 = vld [vmem:[#allocation3 + $0x1c0] sm:$0xf]  ;;  %v7443_v32 = vld [vmem:[#allocation3 + $0x1cc] sm:$0xf0]  ;;  %4255 = vmatpush.bf16.msrb.mxu3 %v6727_v0  ;;  %v6591_v14 = vor.u32 %v7427_v29, %v6590_v27 }
 0x781   :  { %v6655_v33 = vor.u32 %v7443_v32, %v6654_v30  ;;  %v6718_v15 = vld [vmem:[#allocation3 + $0x2c0] sm:$0xf]  ;;  %v7459_v46 = vld [vmem:[#allocation3 + $0x2cc] sm:$0xf0]  ;;  %4269 = vmatpush.bf16.msra.mxu0 %v6791_v28 }
 0x782   :  { %v6782_v21 = vld [vmem:[#allocation3 + $0x3c0] sm:$0xf]  ;;  %v6719_v35 = vor.u32 %v7459_v46, %v6718_v15  ;;  %v7475_v36 = vld [vmem:[#allocation3 + $0x3cc] sm:$0xf0]  ;;  %4228 = vmatpush.bf16.msrb.mxu1 %v6591_v14 }
 0x783   :  { %v6582_v37 = vld [vmem:[#allocation3 + $0xa0] sm:$0xf]  ;;  %v7425_v38 = vld [vmem:[#allocation3 + $0xac] sm:$0xf0]  ;;  %v6783_v42 = vor.u32 %v7475_v36, %v6782_v21  ;;  %4242 = vmatpush.bf16.msrb.mxu2 %v6655_v33 }
 0x784   :  { %v6646_v45 = vld [vmem:[#allocation3 + $0x1a0] sm:$0xf]  ;;  %v7441_v63 = vld [vmem:[#allocation3 + $0x1ac] sm:$0xf0]  ;;  %v6583_v52 = vor.u32 %v7425_v38, %v6582_v37  ;;  %4256 = vmatpush.bf16.msrb.mxu3 %v6719_v35 }
 0x785   :  { %v6710_v47 = vld [vmem:[#allocation3 + $0x2a0] sm:$0xf]  ;;  %v7457_v53 = vld [vmem:[#allocation3 + $0x2ac] sm:$0xf0]  ;;  %v6647_v2 = vor.u32 %v7441_v63, %v6646_v45  ;;  %4270 = vmatpush.bf16.msra.mxu0 %v6783_v42 }
 0x786   :  { %v6774_v55 = vld [vmem:[#allocation3 + $0x3a0] sm:$0xf]  ;;  %v7473_v57 = vld [vmem:[#allocation3 + $0x3ac] sm:$0xf0]  ;;  %v6711_v61 = vor.u32 %v7457_v53, %v6710_v47  ;;  %4229 = vmatpush.bf16.msrb.mxu1 %v6583_v52 }
 0x787   :  { %v6574_v49 = vld [vmem:[#allocation3 + $0x80] sm:$0xf]  ;;  %v7423_v62 = vld [vmem:[#allocation3 + $0x8c] sm:$0xf0]  ;;  %v6775_v10 = vor.u32 %v7473_v57, %v6774_v55  ;;  %4243 = vmatpush.bf16.msrb.mxu2 %v6647_v2 }
 0x788   :  { %v6638_v43 = vld [vmem:[#allocation3 + $0x180] sm:$0xf]  ;;  %v7439_v48 = vld [vmem:[#allocation3 + $0x18c] sm:$0xf0]  ;;  %v6575_v8 = vor.u32 %v7423_v62, %v6574_v49  ;;  %4257 = vmatpush.bf16.msrb.mxu3 %v6711_v61  ;;  %v7428_v61 = vld [vmem:[#allocation3 + $0xe4] sm:$0xf] }
 0x789   :  { %v6702_v3 = vld [vmem:[#allocation3 + $0x280] sm:$0xf]  ;;  %v7455_v18 = vld [vmem:[#allocation3 + $0x28c] sm:$0xf0]  ;;  %v6639_v26 = vor.u32 %v7439_v48, %v6638_v43  ;;  %4271 = vmatpush.bf16.msra.mxu0 %v6775_v10  ;;  %v6600_v49 = vld [vmem:[#allocation3 + $0xf0] sm:$0xf0] }
 0x78a   :  { %v6766_v25 = vld [vmem:[#allocation3 + $0x380] sm:$0xf]  ;;  %v7471_v59 = vld [vmem:[#allocation3 + $0x38c] sm:$0xf0]  ;;  %v6703_v39 = vor.u32 %v7455_v18, %v6702_v3  ;;  %4230 = vmatpush.bf16.msrb.mxu1 %v6575_v8  ;;  %v7444_v62 = vld [vmem:[#allocation3 + $0x1e4] sm:$0xf] }
 0x78b   :  { %v6566_v19 = vld [vmem:[#allocation3 + $0x60] sm:$0xf]  ;;  %v7421_v51 = vld [vmem:[#allocation3 + $0x6c] sm:$0xf0]  ;;  %v6767_v56 = vor.u32 %v7471_v59, %v6766_v25  ;;  %4244 = vmatpush.bf16.msrb.mxu2 %v6639_v26  ;;  %v6664_v43 = vld [vmem:[#allocation3 + $0x1f0] sm:$0xf0] }
 0x78c   :  { %v6630_v31 = vld [vmem:[#allocation3 + $0x160] sm:$0xf]  ;;  %v7437_v13 = vld [vmem:[#allocation3 + $0x16c] sm:$0xf0]  ;;  %v6567_v20 = vor.u32 %v7421_v51, %v6566_v19  ;;  %4258 = vmatpush.bf16.msrb.mxu3 %v6703_v39  ;;  %v7460_v10 = vld [vmem:[#allocation3 + $0x2e4] sm:$0xf]  ;;  %v6603_v19 = vor.u32 %v7428_v61, %v6600_v49  ;;  %v6667_v51 = vor.u32 %v7444_v62, %v6664_v43 }
 0x78d   :  { %v6694_v40 = vld [vmem:[#allocation3 + $0x260] sm:$0xf]  ;;  %v7453_v6 = vld [vmem:[#allocation3 + $0x26c] sm:$0xf0]  ;;  %v6631_v22 = vor.u32 %v7437_v13, %v6630_v31  ;;  %4272 = vmatpush.bf16.msra.mxu0 %v6767_v56  ;;  %v6728_v3 = vld [vmem:[#allocation3 + $0x2f0] sm:$0xf0] }
 0x78e   :  { %v6758_v60 = vld [vmem:[#allocation3 + $0x360] sm:$0xf]  ;;  %v7469_v1 = vld [vmem:[#allocation3 + $0x36c] sm:$0xf0]  ;;  %v6695_v23 = vor.u32 %v7453_v6, %v6694_v40  ;;  %4231 = vmatpush.bf16.msrb.mxu1 %v6567_v20  ;;  %v7476_v26 = vld [vmem:[#allocation3 + $0x3e4] sm:$0xf]  ;;  %v6731_v56 = vor.u32 %v7460_v10, %v6728_v3 }
 0x78f   :  { %v6558_v54 = vld [vmem:[#allocation3 + $0x40] sm:$0xf]  ;;  %v7419_v16 = vld [vmem:[#allocation3 + $0x4c] sm:$0xf0]  ;;  %v6759_v7 = vor.u32 %v7469_v1, %v6758_v60  ;;  %4245 = vmatpush.bf16.msrb.mxu2 %v6631_v22  ;;  %v6792_v39 = vld [vmem:[#allocation3 + $0x3f0] sm:$0xf0] }
 0x790   :  { %v6622_v24 = vld [vmem:[#allocation3 + $0x140] sm:$0xf]  ;;  %v7435_v12 = vld [vmem:[#allocation3 + $0x14c] sm:$0xf0]  ;;  %v6559_v28 = vor.u32 %v7419_v16, %v6558_v54  ;;  %4259 = vmatpush.bf16.msrb.mxu3 %v6695_v23  ;;  %v7426_v31 = vld [vmem:[#allocation3 + $0xc4] sm:$0xf]  ;;  %v6795_v1 = vor.u32 %v7476_v26, %v6792_v39  ;;  %v8536_v23 = vpack.c.bf16 %v8524_v5, %v8520_v44 }
 0x791   :  { %v6686_v0 = vld [vmem:[#allocation3 + $0x240] sm:$0xf]  ;;  %v7451_v9 = vld [vmem:[#allocation3 + $0x24c] sm:$0xf0]  ;;  %v6623_v29 = vor.u32 %v7435_v12, %v6622_v24  ;;  %4273 = vmatpush.bf16.msra.mxu0 %v6759_v7  ;;  %v6592_v40 = vld [vmem:[#allocation3 + $0xd0] sm:$0xf0]  ;;  %v8540_v24 = vpack.c.bf16 %v8530_v58, %v8526_v34  ;;  %v8544_v7 = vpack.c.bf16 %v8522_v4, %v8518_v41 }
 0x792   :  { %v6750_v11 = vld [vmem:[#allocation3 + $0x340] sm:$0xf]  ;;  %v7467_v27 = vld [vmem:[#allocation3 + $0x34c] sm:$0xf0]  ;;  %v6687_v30 = vor.u32 %v7451_v9, %v6686_v0  ;;  %4232 = vmatpush.bf16.msrb.mxu1 %v6559_v28  ;;  %v7442_v6 = vld [vmem:[#allocation3 + $0x1c4] sm:$0xf]  ;;  %v6595_v12 = vor.u32 %v7426_v31, %v6592_v40  ;;  %v8548_v28 = vpack.c.bf16 %v8532_v17, %v8528_v50 }
 0x793   :  { %v6550_v32 = vld [vmem:[#allocation3 + $0x20] sm:$0xf]  ;;  %v7417_v14 = vld [vmem:[#allocation3 + $0x2c] sm:$0xf0]  ;;  %v6751_v15 = vor.u32 %v7467_v27, %v6750_v11  ;;  %4246 = vmatpush.bf16.msrb.mxu2 %v6623_v29  ;;  %v6656_v60 = vld [vmem:[#allocation3 + $0x1d0] sm:$0xf0] }
 0x794   :  { %v6614_v33 = vld [vmem:[#allocation3 + $0x120] sm:$0xf]  ;;  %v7433_v46 = vld [vmem:[#allocation3 + $0x12c] sm:$0xf0]  ;;  %v6551_v38 = vor.u32 %v7417_v14, %v6550_v32  ;;  %4260 = vmatpush.bf16.msrb.mxu3 %v6687_v30  ;;  %v7458_v20 = vld [vmem:[#allocation3 + $0x2c4] sm:$0xf]  ;;  %v6659_v0 = vor.u32 %v7442_v6, %v6656_v60 }
 0x795   :  { %v6678_v21 = vld [vmem:[#allocation3 + $0x220] sm:$0xf]  ;;  %v7449_v35 = vld [vmem:[#allocation3 + $0x22c] sm:$0xf0]  ;;  %v6615_v63 = vor.u32 %v7433_v46, %v6614_v33  ;;  %4274 = vmatpush.bf16.msra.mxu0 %v6751_v15  ;;  %v6720_v22 = vld [vmem:[#allocation3 + $0x2d0] sm:$0xf0] }
 0x796   :  { %v6742_v36 = vld [vmem:[#allocation3 + $0x320] sm:$0xf]  ;;  %v7465_v37 = vld [vmem:[#allocation3 + $0x32c] sm:$0xf0]  ;;  %v6679_v47 = vor.u32 %v7449_v35, %v6678_v21  ;;  %4233 = vmatpush.bf16.msrb.mxu1 %v6551_v38  ;;  %v7474_v54 = vld [vmem:[#allocation3 + $0x3c4] sm:$0xf]  ;;  %v6723_v44 = vor.u32 %v7458_v20, %v6720_v22 }
 0x797   :  { %v6542_v42 = vld [vmem:[#allocation3] sm:$0xf]  ;;  %v7415_v45 = vld [vmem:[#allocation3 + $0xc] sm:$0xf0]  ;;  %v6743_v57 = vor.u32 %v7465_v37, %v6742_v36  ;;  %4247 = vmatpush.bf16.msrb.mxu2 %v6615_v63  ;;  %v6784_v16 = vld [vmem:[#allocation3 + $0x3d0] sm:$0xf0] }
 0x798   :  { %v6606_v52 = vld [vmem:[#allocation3 + $0x100] sm:$0xf]  ;;  %v7431_v53 = vld [vmem:[#allocation3 + $0x10c] sm:$0xf0]  ;;  %v6543_v48 = vor.u32 %v7415_v45, %v6542_v42  ;;  %4261 = vmatpush.bf16.msrb.mxu3 %v6679_v47  ;;  %v7424_v9 = vld [vmem:[#allocation3 + $0xa4] sm:$0xf]  ;;  %v6787_v41 = vor.u32 %v7474_v54, %v6784_v16 }
 0x799   :  { %v6670_v55 = vld [vmem:[#allocation3 + $0x200] sm:$0xf]  ;;  %v7447_v2 = vld [vmem:[#allocation3 + $0x20c] sm:$0xf0]  ;;  %v6607_v59 = vor.u32 %v7431_v53, %v6606_v52  ;;  %4275 = vmatpush.bf16.msra.mxu0 %v6743_v57  ;;  %v6584_v5 = vld [vmem:[#allocation3 + $0xb0] sm:$0xf0] }
 0x79a   :  { %v6734_v18 = vld [vmem:[#allocation3 + $0x300] sm:$0xf]  ;;  %v7463_v25 = vld [vmem:[#allocation3 + $0x30c] sm:$0xf0]  ;;  %v6671_v8 = vor.u32 %v7447_v2, %v6670_v55  ;;  %4234 = vmatpush.bf16.msrb.mxu1 %v6543_v48  ;;  %v7440_v11 = vld [vmem:[#allocation3 + $0x1a4] sm:$0xf]  ;;  %v6587_v30 = vor.u32 %v7424_v9, %v6584_v5 }
 0x79b   :  { %v6735_v13 = vor.u32 %v7463_v25, %v6734_v18  ;;  %4248 = vmatpush.bf16.msrb.mxu2 %v6607_v59  ;;  %v6648_v27 = vld [vmem:[#allocation3 + $0x1b0] sm:$0xf0]  ;;  %v7456_v4 = vld [vmem:[#allocation3 + $0x2a4] sm:$0xf] }
 0x79c   :  { %4262 = vmatpush.bf16.msrb.mxu3 %v6671_v8  ;;  %v6712_v34 = vld [vmem:[#allocation3 + $0x2b0] sm:$0xf0]  ;;  %v7472_v58 = vld [vmem:[#allocation3 + $0x3a4] sm:$0xf]  ;;  %v6651_v32 = vor.u32 %v7440_v11, %v6648_v27 }
 0x79d   :  { %4276 = vmatpush.bf16.msra.mxu0 %v6735_v13  ;;  %4235 = vmatmul.bf16.vlgmr.msrb.gmra.mxu1 %v8544_v7  ;;  %v6776_v29 = vld [vmem:[#allocation3 + $0x3b0] sm:$0xf0]  ;;  %v7422_v14 = vld [vmem:[#allocation3 + $0x84] sm:$0xf]  ;;  %v6715_v50 = vor.u32 %v7456_v4, %v6712_v34 }
 0x79e   :  { %4283 = vmatpush.bf16.msra.mxu1 %v6603_v19  ;;  %4249 = vmatmul.bf16.vlgmr.msrb.gmra.mxu2 %v8536_v23  ;;  %v6576_v17 = vld [vmem:[#allocation3 + $0x90] sm:$0xf0]  ;;  %v7438_v33 = vld [vmem:[#allocation3 + $0x184] sm:$0xf]  ;;  %v6779_v46 = vor.u32 %v7472_v58, %v6776_v29 }
 0x79f   :  { %4297 = vmatpush.bf16.msra.mxu2 %v6667_v51  ;;  %4263 = vmatmul.bf16.vlgmr.msrb.gmra.mxu3 %v8540_v24  ;;  %v6640_v15 = vld [vmem:[#allocation3 + $0x190] sm:$0xf0]  ;;  %v7454_v21 = vld [vmem:[#allocation3 + $0x284] sm:$0xf]  ;;  %v6579_v38 = vor.u32 %v7422_v14, %v6576_v17  ;;  %v3901_v17 = vld [vmem:[%s8626_s22] sm:$0x3] }
 0x7a0   :  { %4311 = vmatpush.bf16.msra.mxu3 %v6731_v56  ;;  %4277 = vmatmul.bf16.vlgmr.msra.gmra.mxu0 %v8548_v28  ;;  %v6704_v35 = vld [vmem:[#allocation3 + $0x290] sm:$0xf0]  ;;  %v7470_v36 = vld [vmem:[#allocation3 + $0x384] sm:$0xf]  ;;  %v6643_v42 = vor.u32 %v7438_v33, %v6640_v15  ;;  %v3903_v33 = vperm.slane %v3901_v17, 0 }
 0x7a1   :  { %4325 = vmatpush.bf16.msrb.mxu0 %v6795_v1  ;;  %v6768_v37 = vld [vmem:[#allocation3 + $0x390] sm:$0xf0]  ;;  %v7420_v45 = vld [vmem:[#allocation3 + $0x64] sm:$0xf]  ;;  %v6707_v63 = vor.u32 %v7454_v21, %v6704_v35 }
 0x7a2   :  { %4284 = vmatpush.bf16.msra.mxu1 %v6595_v12  ;;  %v6568_v47 = vld [vmem:[#allocation3 + $0x70] sm:$0xf0]  ;;  %v7436_v52 = vld [vmem:[#allocation3 + $0x164] sm:$0xf]  ;;  %v6771_v55 = vor.u32 %v7470_v36, %v6768_v37 }
 0x7a3   :  { %4298 = vmatpush.bf16.msra.mxu2 %v6659_v0  ;;  %v6632_v53 = vld [vmem:[#allocation3 + $0x170] sm:$0xf0]  ;;  %v7452_v57 = vld [vmem:[#allocation3 + $0x264] sm:$0xf]  ;;  %v6571_v62 = vor.u32 %v7420_v45, %v6568_v47 }
 0x7a4   :  { %4312 = vmatpush.bf16.msra.mxu3 %v6723_v44  ;;  %v6696_v2 = vld [vmem:[#allocation3 + $0x270] sm:$0xf0]  ;;  %v7468_v61 = vld [vmem:[#allocation3 + $0x364] sm:$0xf]  ;;  %v6635_v43 = vor.u32 %v7436_v52, %v6632_v53 }
 0x7a5   :  { %4326 = vmatpush.bf16.msrb.mxu0 %v6787_v41  ;;  %v6760_v49 = vld [vmem:[#allocation3 + $0x370] sm:$0xf0]  ;;  %v7418_v10 = vld [vmem:[#allocation3 + $0x44] sm:$0xf]  ;;  %v6699_v48 = vor.u32 %v7452_v57, %v6696_v2 }
 0x7a6   :  { %4285 = vmatpush.bf16.msra.mxu1 %v6587_v30  ;;  %v6560_v3 = vld [vmem:[#allocation3 + $0x50] sm:$0xf0]  ;;  %v7434_v18 = vld [vmem:[#allocation3 + $0x144] sm:$0xf]  ;;  %v6763_v59 = vor.u32 %v7468_v61, %v6760_v49  ;;  %v3904_v61 = vperm.slane %v3901_v17, 1 }
 0x7a7   :  { %4299 = vmatpush.bf16.msra.mxu2 %v6651_v32  ;;  %v6624_v25 = vld [vmem:[#allocation3 + $0x150] sm:$0xf0]  ;;  %v7450_v8 = vld [vmem:[#allocation3 + $0x244] sm:$0xf]  ;;  %v6563_v51 = vor.u32 %v7418_v10, %v6560_v3 }
 0x7a8   :  { %4313 = vmatpush.bf16.msra.mxu3 %v6715_v50  ;;  %v6688_v26 = vld [vmem:[#allocation3 + $0x250] sm:$0xf0]  ;;  %v7466_v39 = vld [vmem:[#allocation3 + $0x344] sm:$0xf]  ;;  %v6627_v31 = vor.u32 %v7434_v18, %v6624_v25 }
 0x7a9   :  { %4327 = vmatpush.bf16.msrb.mxu0 %v6779_v46  ;;  %v6752_v19 = vld [vmem:[#allocation3 + $0x350] sm:$0xf0]  ;;  %v7416_v56 = vld [vmem:[#allocation3 + $0x24] sm:$0xf]  ;;  %v6691_v13 = vor.u32 %v7450_v8, %v6688_v26 }
 0x7aa   :  { %4286 = vmatpush.bf16.msra.mxu1 %v6579_v38  ;;  %v6552_v40 = vld [vmem:[#allocation3 + $0x30] sm:$0xf0]  ;;  %v7432_v6 = vld [vmem:[#allocation3 + $0x124] sm:$0xf]  ;;  %v6755_v1 = vor.u32 %v7466_v39, %v6752_v19 }
 0x7ab   :  { %4300 = vmatpush.bf16.msra.mxu2 %v6643_v42  ;;  %v6616_v60 = vld [vmem:[#allocation3 + $0x130] sm:$0xf0]  ;;  %v7448_v20 = vld [vmem:[#allocation3 + $0x224] sm:$0xf]  ;;  %v6555_v12 = vor.u32 %v7416_v56, %v6552_v40 }
 0x7ac   :  { %4314 = vmatpush.bf16.msra.mxu3 %v6707_v63  ;;  %v6680_v22 = vld [vmem:[#allocation3 + $0x230] sm:$0xf0]  ;;  %v7464_v54 = vld [vmem:[#allocation3 + $0x324] sm:$0xf]  ;;  %v6619_v0 = vor.u32 %v7432_v6, %v6616_v60 }
 0x7ad   :  { %4328 = vmatpush.bf16.msrb.mxu0 %v6771_v55  ;;  %v6744_v16 = vld [vmem:[#allocation3 + $0x330] sm:$0xf0]  ;;  %v7414_v9 = vld [vmem:[#allocation3 + $0x4] sm:$0xf]  ;;  %v6683_v44 = vor.u32 %v7448_v20, %v6680_v22 }
 0x7ae   :  { %4287 = vmatpush.bf16.msra.mxu1 %v6571_v62  ;;  %v6544_v5 = vld [vmem:[#allocation3 + $0x10] sm:$0xf0]  ;;  %v7430_v11 = vld [vmem:[#allocation3 + $0x104] sm:$0xf]  ;;  %v6747_v41 = vor.u32 %v7464_v54, %v6744_v16 }
 0x7af   :  { %4301 = vmatpush.bf16.msra.mxu2 %v6635_v43  ;;  %v6608_v27 = vld [vmem:[#allocation3 + $0x110] sm:$0xf0]  ;;  %v7446_v4 = vld [vmem:[#allocation3 + $0x204] sm:$0xf]  ;;  %v6547_v30 = vor.u32 %v7414_v9, %v6544_v5 }
 0x7b0   :  { %4315 = vmatpush.bf16.msra.mxu3 %v6699_v48  ;;  %v6672_v34 = vld [vmem:[#allocation3 + $0x210] sm:$0xf0]  ;;  %v7462_v58 = vld [vmem:[#allocation3 + $0x304] sm:$0xf]  ;;  %v6611_v32 = vor.u32 %v7430_v11, %v6608_v27 }
 0x7b1   :  { %4329 = vmatpush.bf16.msrb.mxu0 %v6763_v59  ;;  %v6736_v29 = vld [vmem:[#allocation3 + $0x310] sm:$0xf0]  ;;  %v6675_v14 = vor.u32 %v7446_v4, %v6672_v34 }
 0x7b2   :  { %4288 = vmatpush.bf16.msra.mxu1 %v6563_v51  ;;  %v6739_v50 = vor.u32 %v7462_v58, %v6736_v29 }
 0x7b3   :  { %4302 = vmatpush.bf16.msra.mxu2 %v6627_v31 }
 0x7b4   :  { %4316 = vmatpush.bf16.msra.mxu3 %v6691_v13 }
 0x7b5   :  { %4330 = vmatpush.bf16.msrb.mxu0 %v6755_v1 }
 0x7b6   :  { %4289 = vmatpush.bf16.msra.mxu1 %v6555_v12 }
 0x7b7   :  { %4303 = vmatpush.bf16.msra.mxu2 %v6619_v0 }
 0x7b8   :  { %4317 = vmatpush.bf16.msra.mxu3 %v6683_v44 }
 0x7b9   :  { %4331 = vmatpush.bf16.msrb.mxu0 %v6747_v41 }
 0x7ba   :  { %4290 = vmatpush.bf16.msra.mxu1 %v6547_v30 }
 0x7bb   :  { %4304 = vmatpush.bf16.msra.mxu2 %v6611_v32 }
 0x7bc   :  { %4318 = vmatpush.bf16.msra.mxu3 %v6675_v14 }
 0x7bd   :  { %4332 = vmatpush.bf16.msrb.mxu0 %v6739_v50  ;;  %4291 = vmatmul.bf16.vlgmr.msra.gmra.mxu1 %v8544_v7 }
 0x7be   :  { %4305 = vmatmul.bf16.vlgmr.msra.gmra.mxu2 %v8536_v23 }
 0x7bf   :  { %4319 = vmatmul.bf16.vlgmr.msra.gmra.mxu3 %v8540_v24 }
 0x7c0   :  { %4333 = vmatmul.bf16.vlgmr.msrb.gmra.mxu0 %v8548_v28 }
 0x81a   :  { %v4236_v15 = vpop.f32.mrf.mxu1 }
 0x81b   :  { %v4237_v46 = vadd.f32 %v4236_v15, %v3903_v33 }
 0x81d   :  { %v4278_v35 = vpop.f32.mrf.mxu0 }
 0x821   :  { %v4250_v21 = vpop.f32.mrf.mxu2 }
 0x822   :  { %v4251_v36 = vadd.f32 %v4250_v21, %v4237_v46  ;;  %v4264_v37 = vpop.f32.mrf.mxu3  ;;  %v4238_v42 = vpop.f32.mrf.mxu1 }
 0x823   :  { %v4239_v45 = vadd.f32 %v4238_v42, %v3903_v33 }
 0x824   :  { %v4265_v38 = vadd.f32 %v4264_v37, %v4251_v36 }
 0x825   :  { %v4280_v52 = vpop.f32.mrf.mxu0 }
 0x826   :  { %v4279_v7 = vadd.f32 %v4278_v35, %v4265_v38 }
 0x828   :  { %vm4339_vm8 = vcmp.gt.f32.partialorder %v4279_v7, 0.0  ;;  %v4343_v23 = vmul.f32 0.2, %v4279_v7 }
 0x829   :  { %v4252_v24 = vpop.f32.mrf.mxu2 }
 0x82a   :  { %v8561_v63 = vsel %vm4339_vm8, %v4279_v7, %v4343_v23  ;;  %v4253_v28 = vadd.f32 %v4252_v24, %v4239_v45  ;;  %v4266_v47 = vpop.f32.mrf.mxu3 }
 0x82c   :  { %v4267_v53 = vadd.f32 %v4266_v47, %v4253_v28 }
 0x82e   :  { %v4281_v55 = vadd.f32 %v4280_v52, %v4267_v53 }
 0x830   :  { %vm4341_vm9 = vcmp.gt.f32.partialorder %v4281_v55, 0.0  ;;  %v4345_v57 = vmul.f32 0.2, %v4281_v55 }
 0x832   :  { %v8563_v2 = vsel %vm4341_vm9, %v4281_v55, %v4345_v57 }
 0x83a   :  { %v4292_v49 = vpop.f32.mrf.mxu1 }
 0x83b   :  { %v4293_v62 = vadd.f32 %v4292_v49, %v3904_v61 }
 0x83d   :  { %v4334_v3 = vpop.f32.mrf.mxu0 }
 0x841   :  { %v4306_v43 = vpop.f32.mrf.mxu2 }
 0x842   :  { %v4307_v10 = vadd.f32 %v4306_v43, %v4293_v62  ;;  %v4320_v48 = vpop.f32.mrf.mxu3  ;;  %v4294_v25 = vpop.f32.mrf.mxu1 }
 0x843   :  { %v4295_v26 = vadd.f32 %v4294_v25, %v3904_v61 }
 0x844   :  { %v4321_v18 = vadd.f32 %v4320_v48, %v4307_v10 }
 0x845   :  { %v4336_v13 = vpop.f32.mrf.mxu0 }
 0x846   :  { %v4335_v59 = vadd.f32 %v4334_v3, %v4321_v18 }
 0x848   :  { %vm4340_vm10 = vcmp.gt.f32.partialorder %v4335_v59, 0.0  ;;  %v4344_v8 = vmul.f32 0.2, %v4335_v59 }
 0x849   :  { %v4308_v39 = vpop.f32.mrf.mxu2 }
 0x84a   :  { %v8565_v19 = vsel %vm4340_vm10, %v4335_v59, %v4344_v8  ;;  %v4309_v51 = vadd.f32 %v4308_v39, %v4295_v26  ;;  %v4322_v31 = vpop.f32.mrf.mxu3 }
 0x84c   :  { %v4323_v56 = vadd.f32 %v4322_v31, %v4309_v51 }
 0x84e   :  { %v4337_v40 = vadd.f32 %v4336_v13, %v4323_v56 }
 0x850   :  { %vm4342_vm11 = vcmp.gt.f32.partialorder %v4337_v40, 0.0  ;;  %v4346_v6 = vmul.f32 0.2, %v4337_v40 }
 0x852   :  { %v8567_v60 = vsel %vm4342_vm11, %v4337_v40, %v4346_v6 }
 0x853   :  { %8056 = dma.done.wait [#allocation4], 6144 }
 0x854   :  { %8057 = vsyncadd [#allocation4], 4294961152  ;;  %v6882_v1 = vld [vmem:[#allocation2 + $0xe0] sm:$0xf]  ;;  %v7500_v20 = vld [vmem:[#allocation2 + $0xec] sm:$0xf0] }
 0x855   :  { %v6978_v22 = vld [vmem:[#allocation2 + $0x1e0] sm:$0xf]  ;;  %v6883_v54 = vor.u32 %v7500_v20, %v6882_v1  ;;  %v7524_v16 = vld [vmem:[#allocation2 + $0x1ec] sm:$0xf0]  ;;  %v7499_v29 = vld [vmem:[#allocation2 + $0xe4] sm:$0xf] }
 0x856   :  { %v6870_v12 = vld [vmem:[#allocation2 + $0xc0] sm:$0xf]  ;;  %v7497_v0 = vld [vmem:[#allocation2 + $0xcc] sm:$0xf0]  ;;  %v6979_v9 = vor.u32 %v7524_v16, %v6978_v22  ;;  %v6884_v32 = vld [vmem:[#allocation2 + $0xf0] sm:$0xf0] }
 0x857   :  { %v6966_v44 = vld [vmem:[#allocation2 + $0x1c0] sm:$0xf]  ;;  %v7521_v5 = vld [vmem:[#allocation2 + $0x1cc] sm:$0xf0]  ;;  %4684 = vmatpush.bf16.msrb.mxu1 %v6883_v54  ;;  %v6871_v11 = vor.u32 %v7497_v0, %v6870_v12  ;;  %v6887_v33 = vor.u32 %v7499_v29, %v6884_v32  ;;  %v7496_v15 = vld [vmem:[#allocation2 + $0xc4] sm:$0xf] }
 0x858   :  { %4698 = vmatpush.bf16.msrb.mxu2 %v6979_v9  ;;  %v6967_v27 = vor.u32 %v7521_v5, %v6966_v44  ;;  %v6858_v41 = vld [vmem:[#allocation2 + $0xa0] sm:$0xf]  ;;  %v7494_v4 = vld [vmem:[#allocation2 + $0xac] sm:$0xf0]  ;;  %v6872_v35 = vld [vmem:[#allocation2 + $0xd0] sm:$0xf0] }
 0x859   :  { %v6954_v34 = vld [vmem:[#allocation2 + $0x1a0] sm:$0xf]  ;;  %v7518_v58 = vld [vmem:[#allocation2 + $0x1ac] sm:$0xf0]  ;;  %v6859_v30 = vor.u32 %v7494_v4, %v6858_v41  ;;  %4712 = vmatpush.bf16.msrb.mxu3 %v6887_v33  ;;  %v6875_v36 = vor.u32 %v7496_v15, %v6872_v35  ;;  %v7493_v37 = vld [vmem:[#allocation2 + $0xa4] sm:$0xf] }
 0x85a   :  { %v6955_v14 = vor.u32 %v7518_v58, %v6954_v34  ;;  %v6846_v50 = vld [vmem:[#allocation2 + $0x80] sm:$0xf]  ;;  %v7491_v17 = vld [vmem:[#allocation2 + $0x8c] sm:$0xf0]  ;;  %v6860_v42 = vld [vmem:[#allocation2 + $0xb0] sm:$0xf0] }
 0x85b   :  { %4685 = vmatpush.bf16.msrb.mxu1 %v6871_v11  ;;  %v6942_v46 = vld [vmem:[#allocation2 + $0x180] sm:$0xf]  ;;  %v7515_v21 = vld [vmem:[#allocation2 + $0x18c] sm:$0xf0]  ;;  %v6847_v38 = vor.u32 %v7491_v17, %v6846_v50  ;;  %v7523_v7 = vld [vmem:[#allocation2 + $0x1e4] sm:$0xf]  ;;  %v6863_v55 = vor.u32 %v7493_v37, %v6860_v42 }
 0x85c   :  { %4699 = vmatpush.bf16.msrb.mxu2 %v6967_v27  ;;  %v6980_v45 = vld [vmem:[#allocation2 + $0x1f0] sm:$0xf0]  ;;  %v6943_v23 = vor.u32 %v7515_v21, %v6942_v46  ;;  %v6834_v24 = vld [vmem:[#allocation2 + $0x60] sm:$0xf]  ;;  %v7488_v28 = vld [vmem:[#allocation2 + $0x6c] sm:$0xf0] }
 0x85d   :  { %v6983_v47 = vor.u32 %v7523_v7, %v6980_v45  ;;  %v6930_v52 = vld [vmem:[#allocation2 + $0x160] sm:$0xf]  ;;  %v7512_v53 = vld [vmem:[#allocation2 + $0x16c] sm:$0xf0]  ;;  %4713 = vmatpush.bf16.msrb.mxu3 %v6875_v36  ;;  %v7490_v57 = vld [vmem:[#allocation2 + $0x84] sm:$0xf]  ;;  %v6835_v61 = vor.u32 %v7488_v28, %v6834_v24  ;;  %v8571_v28 = vpack.c.bf16 %v8563_v2, %v8561_v63 }
 0x85e   :  { %v6848_v49 = vld [vmem:[#allocation2 + $0x90] sm:$0xf0]  ;;  %v7520_v62 = vld [vmem:[#allocation2 + $0x1c4] sm:$0xf]  ;;  %v6931_v10 = vor.u32 %v7512_v53, %v6930_v52  ;;  %v6822_v48 = vld [vmem:[#allocation2 + $0x40] sm:$0xf]  ;;  %v8575_v52 = vpack.c.bf16 %v8567_v60, %v8565_v19 }
 0x85f   :  { %4686 = vmatpush.bf16.msrb.mxu1 %v6859_v30  ;;  %4726 = vmatpush.bf16.msra.mxu0 %v6983_v47  ;;  %v6968_v43 = vld [vmem:[#allocation2 + $0x1d0] sm:$0xf0]  ;;  %v7485_v3 = vld [vmem:[#allocation2 + $0x4c] sm:$0xf0]  ;;  %v6918_v25 = vld [vmem:[#allocation2 + $0x140] sm:$0xf]  ;;  %v6851_v8 = vor.u32 %v7490_v57, %v6848_v49 }
 0x860   :  { %4700 = vmatpush.bf16.msrb.mxu2 %v6955_v14  ;;  %v6971_v18 = vor.u32 %v7520_v62, %v6968_v43  ;;  %v7509_v59 = vld [vmem:[#allocation2 + $0x14c] sm:$0xf0]  ;;  %v7517_v26 = vld [vmem:[#allocation2 + $0x1a4] sm:$0xf]  ;;  %v6956_v39 = vld [vmem:[#allocation2 + $0x1b0] sm:$0xf0]  ;;  %v6823_v51 = vor.u32 %v7485_v3, %v6822_v48 }
 0x861   :  { %4714 = vmatpush.bf16.msrb.mxu3 %v6863_v55  ;;  %v7487_v31 = vld [vmem:[#allocation2 + $0x64] sm:$0xf]  ;;  %v6836_v56 = vld [vmem:[#allocation2 + $0x70] sm:$0xf0]  ;;  %v6959_v13 = vor.u32 %v7517_v26, %v6956_v39  ;;  %v6919_v40 = vor.u32 %v7509_v59, %v6918_v25  ;;  %v6810_v6 = vld [vmem:[#allocation2 + $0x20] sm:$0xf] }
 0x862   :  { %v7482_v1 = vld [vmem:[#allocation2 + $0x2c] sm:$0xf0]  ;;  %v7514_v20 = vld [vmem:[#allocation2 + $0x184] sm:$0xf]  ;;  %v6906_v22 = vld [vmem:[#allocation2 + $0x120] sm:$0xf]  ;;  %v6839_v12 = vor.u32 %v7487_v31, %v6836_v56 }
 0x863   :  { %4687 = vmatpush.bf16.msrb.mxu1 %v6847_v38  ;;  %4727 = vmatpush.bf16.msra.mxu0 %v6971_v18  ;;  %v7506_v54 = vld [vmem:[#allocation2 + $0x12c] sm:$0xf0]  ;;  %v6944_v16 = vld [vmem:[#allocation2 + $0x190] sm:$0xf0]  ;;  %v7484_v0 = vld [vmem:[#allocation2 + $0x44] sm:$0xf]  ;;  %v6811_v44 = vor.u32 %v7482_v1, %v6810_v6 }
 0x864   :  { %4701 = vmatpush.bf16.msrb.mxu2 %v6943_v23  ;;  %v6947_v9 = vor.u32 %v7514_v20, %v6944_v16  ;;  %v6824_v5 = vld [vmem:[#allocation2 + $0x50] sm:$0xf0]  ;;  %v7511_v11 = vld [vmem:[#allocation2 + $0x164] sm:$0xf]  ;;  %v6907_v41 = vor.u32 %v7506_v54, %v6906_v22  ;;  %v6798_v4 = vld [vmem:[#allocation2] sm:$0xf] }
 0x865   :  { %4715 = vmatpush.bf16.msrb.mxu3 %v6851_v8  ;;  %v6932_v27 = vld [vmem:[#allocation2 + $0x170] sm:$0xf0]  ;;  %v7479_v34 = vld [vmem:[#allocation2 + $0xc] sm:$0xf0]  ;;  %v6894_v58 = vld [vmem:[#allocation2 + $0x100] sm:$0xf]  ;;  %v6827_v17 = vor.u32 %v7484_v0, %v6824_v5 }
 0x866   :  { %v7503_v29 = vld [vmem:[#allocation2 + $0x10c] sm:$0xf0]  ;;  %v6890_v30 = vld [vmem:[#allocation2 + $0xe8] sm:$0xf]  ;;  %v7501_v32 = vld [vmem:[#allocation2 + $0xf4] sm:$0xf0]  ;;  %v6935_v33 = vor.u32 %v7511_v11, %v6932_v27  ;;  %v6799_v15 = vor.u32 %v7479_v34, %v6798_v4 }
 0x867   :  { %4688 = vmatpush.bf16.msrb.mxu1 %v6835_v61  ;;  %4728 = vmatpush.bf16.msra.mxu0 %v6959_v13  ;;  %v6986_v14 = vld [vmem:[#allocation2 + $0x1e8] sm:$0xf]  ;;  %v7525_v50 = vld [vmem:[#allocation2 + $0x1f4] sm:$0xf0]  ;;  %v7481_v46 = vld [vmem:[#allocation2 + $0x24] sm:$0xf]  ;;  %v6895_v35 = vor.u32 %v7503_v29, %v6894_v58  ;;  %v6891_v36 = vor.u32 %v7501_v32, %v6890_v30 }
 0x868   :  { %4702 = vmatpush.bf16.msrb.mxu2 %v6931_v10  ;;  %v6812_v21 = vld [vmem:[#allocation2 + $0x30] sm:$0xf0]  ;;  %v7508_v37 = vld [vmem:[#allocation2 + $0x144] sm:$0xf]  ;;  %v6987_v42 = vor.u32 %v7525_v50, %v6986_v14  ;;  %v6878_v7 = vld [vmem:[#allocation2 + $0xc8] sm:$0xf] }
 0x869   :  { %4716 = vmatpush.bf16.msrb.mxu3 %v6839_v12  ;;  %v6920_v38 = vld [vmem:[#allocation2 + $0x150] sm:$0xf0]  ;;  %v7498_v45 = vld [vmem:[#allocation2 + $0xd4] sm:$0xf0]  ;;  %v6974_v23 = vld [vmem:[#allocation2 + $0x1c8] sm:$0xf]  ;;  %v6815_v47 = vor.u32 %v7481_v46, %v6812_v21 }
 0x86a   :  { %v7522_v24 = vld [vmem:[#allocation2 + $0x1d4] sm:$0xf0]  ;;  %v7478_v53 = vld [vmem:[#allocation2 + $0x4] sm:$0xf]  ;;  %v6800_v55 = vld [vmem:[#allocation2 + $0x10] sm:$0xf0]  ;;  %v6923_v57 = vor.u32 %v7508_v37, %v6920_v38  ;;  %v6879_v61 = vor.u32 %v7498_v45, %v6878_v7 }
 0x86b   :  { %4689 = vmatpush.bf16.msrb.mxu1 %v6823_v51  ;;  %4729 = vmatpush.bf16.msra.mxu0 %v6947_v9  ;;  %v7505_v49 = vld [vmem:[#allocation2 + $0x124] sm:$0xf]  ;;  %v6908_v62 = vld [vmem:[#allocation2 + $0x130] sm:$0xf0]  ;;  %v6975_v43 = vor.u32 %v7522_v24, %v6974_v23  ;;  %v6866_v10 = vld [vmem:[#allocation2 + $0xa8] sm:$0xf]  ;;  %v6803_v3 = vor.u32 %v7478_v53, %v6800_v55 }
 0x86c   :  { %4703 = vmatpush.bf16.msrb.mxu2 %v6919_v40  ;;  %v7495_v63 = vld [vmem:[#allocation2 + $0xb4] sm:$0xf0]  ;;  %v6962_v2 = vld [vmem:[#allocation2 + $0x1a8] sm:$0xf]  ;;  %v6911_v19 = vor.u32 %v7505_v49, %v6908_v62  ;;  %v7502_v18 = vld [vmem:[#allocation2 + $0x104] sm:$0xf] }
 0x86d   :  { %4717 = vmatpush.bf16.msrb.mxu3 %v6827_v17  ;;  %v7519_v48 = vld [vmem:[#allocation2 + $0x1b4] sm:$0xf0]  ;;  %v6867_v60 = vor.u32 %v7495_v63, %v6866_v10  ;;  %v6896_v25 = vld [vmem:[#allocation2 + $0x110] sm:$0xf0]  ;;  %v6854_v8 = vld [vmem:[#allocation2 + $0x88] sm:$0xf] }
 0x86e   :  { %v6963_v59 = vor.u32 %v7519_v48, %v6962_v2  ;;  %v7492_v26 = vld [vmem:[#allocation2 + $0x94] sm:$0xf0]  ;;  %v6950_v39 = vld [vmem:[#allocation2 + $0x188] sm:$0xf]  ;;  %v6899_v31 = vor.u32 %v7502_v18, %v6896_v25  ;;  %s8079_s22 = smov [#allocation17]   ;;  %s4793_s10 = sshll.u32 %s8629_s25, 4  ;;  %s4794_s10 = int_to_ptr.hbm [resolvable:$true] %s4793_s10 }
 0x86f   :  { %4690 = vmatpush.bf16.msrb.mxu1 %v6811_v44  ;;  %4730 = vmatpush.bf16.msra.mxu0 %v6935_v33  ;;  %v7516_v51 = vld [vmem:[#allocation2 + $0x194] sm:$0xf0]  ;;  %v6855_v56 = vor.u32 %v7492_v26, %v6854_v8  ;;  %v6842_v40 = vld [vmem:[#allocation2 + $0x68] sm:$0xf]  ;;  %s4791_s28 = sshll.u32 %s8079_s22, 4  ;;  %s8080_s1 = smov [#allocation19]   ;;  %s4792_s28 = int_to_ptr.vmem [resolvable:$true] %s4791_s28 }
 0x870   :  { %4704 = vmatpush.bf16.msrb.mxu2 %v6907_v41  ;;  %v6951_v13 = vor.u32 %v7516_v51, %v6950_v39  ;;  %v7489_v6 = vld [vmem:[#allocation2 + $0x74] sm:$0xf0]  ;;  %v6938_v1 = vld [vmem:[#allocation2 + $0x168] sm:$0xf]  ;;  %4799 = dma.vmem_to_hbm [thread:$0]  %s4792_s28, 256, %s4794_s10, [#allocation18], %s8063_s30, %s8063_s30, %s8064_s2  }
 0x871   :  { %4718 = vmatpush.bf16.msrb.mxu3 %v6815_v47  ;;  %v7513_v20 = vld [vmem:[#allocation2 + $0x174] sm:$0xf0]  ;;  %v6843_v22 = vor.u32 %v7489_v6, %v6842_v40  ;;  %v6830_v16 = vld [vmem:[#allocation2 + $0x48] sm:$0xf]  ;;  %s4804_s27 = sshll.u32 %s8080_s1, 4  ;;  %s4806_s3 = sshll.u32 %s8630_s26, 4  ;;  %s4805_s27 = int_to_ptr.vmem [resolvable:$true] %s4804_s27  ;;  %s4807_s3 = int_to_ptr.hbm [resolvable:$true] %s4806_s3 }
 0x872   :  { %v6939_v54 = vor.u32 %v7513_v20, %v6938_v1  ;;  %v7486_v12 = vld [vmem:[#allocation2 + $0x54] sm:$0xf0]  ;;  %v6926_v0 = vld [vmem:[#allocation2 + $0x148] sm:$0xf]  ;;  %4812 = dma.vmem_to_hbm [thread:$0]  %s4805_s27, 256, %s4807_s3, [#allocation18], %s8063_s30, %s8063_s30, %s8064_s2  }
 0x873   :  { %4691 = vmatpush.bf16.msrb.mxu1 %v6799_v15  ;;  %4731 = vmatpush.bf16.msra.mxu0 %v6923_v57  ;;  %v7510_v9 = vld [vmem:[#allocation2 + $0x154] sm:$0xf0]  ;;  %v6831_v44 = vor.u32 %v7486_v12, %v6830_v16  ;;  %v6818_v11 = vld [vmem:[#allocation2 + $0x28] sm:$0xf]  ;;  %s8655_s8 = sld [smem:[#allocation64_spill]]  ;;  %s8081_s26 = smov [#allocation16]  }
 0x874   :  { %4705 = vmatpush.bf16.msrb.mxu2 %v6895_v35  ;;  %v6927_v5 = vor.u32 %v7510_v9, %v6926_v0  ;;  %v7483_v27 = vld [vmem:[#allocation2 + $0x34] sm:$0xf0]  ;;  %v6914_v41 = vld [vmem:[#allocation2 + $0x128] sm:$0xf]  ;;  %s4778_s30 = sshll.u32 %s8081_s26, 4  ;;  %s8656_s16 = sld [smem:[#allocation65_spill]]  ;;  %s4779_s30 = int_to_ptr.vmem [resolvable:$true] %s4778_s30 }
 0x875   :  { %4719 = vmatpush.bf16.msrb.mxu3 %v6803_v3  ;;  %v7507_v4 = vld [vmem:[#allocation2 + $0x134] sm:$0xf0]  ;;  %v6819_v34 = vor.u32 %v7483_v27, %v6818_v11  ;;  %v6806_v29 = vld [vmem:[#allocation2 + $0x8] sm:$0xf] }
 0x876   :  { %4692 = vmatmul.bf16.vlgmr.msrb.gmra.mxu1 %v8571_v28  ;;  %v6915_v58 = vor.u32 %v7507_v4, %v6914_v41  ;;  %v7480_v30 = vld [vmem:[#allocation2 + $0x14] sm:$0xf0]  ;;  %v6902_v32 = vld [vmem:[#allocation2 + $0x108] sm:$0xf] }
 0x877   :  { %4740 = vmatpush.bf16.msra.mxu1 %v6891_v36  ;;  %4706 = vmatmul.bf16.vlgmr.msrb.gmra.mxu2 %v8575_v52  ;;  %v7504_v14 = vld [vmem:[#allocation2 + $0x114] sm:$0xf0]  ;;  %v6807_v50 = vor.u32 %v7480_v30, %v6806_v29 }
 0x878   :  { %4754 = vmatpush.bf16.msra.mxu2 %v6987_v42  ;;  %4732 = vmatpush.bf16.msra.mxu0 %v6911_v19  ;;  %v6903_v17 = vor.u32 %v7504_v14, %v6902_v32 }
 0x879   :  { %4720 = vmatmul.bf16.vlgmr.msrb.gmra.mxu3 %v8571_v28  ;;  %v4420_v33 = vld [vmem:[%s8655_s8] sm:$0x7] }
 0x87a   :  { %v4422_v15 = vperm.slane %v4420_v33, 0  ;;  %v4423_v38 = vperm.slane %v4420_v33, 1  ;;  %s4780_s19 = sshll.u32 %s8656_s16, 4  ;;  %s4781_s19 = int_to_ptr.hbm [resolvable:$true] %s4780_s19 }
 0x87b   :  { %4741 = vmatpush.bf16.msra.mxu1 %v6879_v61  ;;  %v4424_v61 = vperm.slane %v4420_v33, 2 }
 0x87c   :  { %4755 = vmatpush.bf16.msra.mxu2 %v6975_v43  ;;  %4733 = vmatpush.bf16.msra.mxu0 %v6899_v31 }
 0x87f   :  { %4742 = vmatpush.bf16.msra.mxu1 %v6867_v60  ;;  %4734 = vmatmul.bf16.vlgmr.msra.gmra.mxu0 %v8575_v52 }
 0x880   :  { %4756 = vmatpush.bf16.msra.mxu2 %v6963_v59 }
 0x883   :  { %4743 = vmatpush.bf16.msra.mxu1 %v6855_v56 }
 0x884   :  { %4757 = vmatpush.bf16.msra.mxu2 %v6951_v13 }
 0x887   :  { %4744 = vmatpush.bf16.msra.mxu1 %v6843_v22 }
 0x888   :  { %4758 = vmatpush.bf16.msra.mxu2 %v6939_v54 }
 0x88b   :  { %4745 = vmatpush.bf16.msra.mxu1 %v6831_v44 }
 0x88c   :  { %4759 = vmatpush.bf16.msra.mxu2 %v6927_v5 }
 0x88f   :  { %4746 = vmatpush.bf16.msra.mxu1 %v6819_v34 }
 0x890   :  { %4760 = vmatpush.bf16.msra.mxu2 %v6915_v58 }
 0x893   :  { %4747 = vmatpush.bf16.msra.mxu1 %v6807_v50 }
 0x894   :  { %4761 = vmatpush.bf16.msra.mxu2 %v6903_v17 }
 0x896   :  { %4748 = vmatmul.bf16.vlgmr.msra.gmra.mxu1 %v8571_v28 }
 0x897   :  { %4762 = vmatmul.bf16.vlgmr.msra.gmra.mxu2 %v8575_v52 }
 0x8f3   :  { %v4693_v46 = vpop.f32.mrf.mxu1 }
 0x8f4   :  { %v4694_v21 = vadd.f32 %v4693_v46, %v4422_v15 }
 0x8fa   :  { %v4707_v35 = vpop.f32.mrf.mxu2 }
 0x8fb   :  { %v4708_v36 = vadd.f32 %v4707_v35, %v4694_v21  ;;  %v4695_v37 = vpop.f32.mrf.mxu1 }
 0x8fc   :  { %v4696_v42 = vadd.f32 %v4695_v37, %v4422_v15  ;;  %v4735_v7 = vpop.f32.mrf.mxu0  ;;  %v4721_v45 = vpop.f32.mrf.mxu3 }
 0x8fd   :  { %4768 = vst [vmem:[#allocation16] sm:$0xff] %v4708_v36  ;;  %v4722_v23 = vadd.f32 %v4721_v45, %v4423_v38 }
 0x8ff   :  { %v4736_v47 = vadd.f32 %v4735_v7, %v4722_v23 }
 0x901   :  { %4769 = vst [vmem:[#allocation16 + $0x8] sm:$0xff] %v4736_v47 }
 0x902   :  { %v4709_v24 = vpop.f32.mrf.mxu2 }
 0x903   :  { %v4710_v28 = vadd.f32 %v4709_v24, %v4696_v42 }
 0x904   :  { %v4723_v52 = vpop.f32.mrf.mxu3  ;;  %v4737_v53 = vpop.f32.mrf.mxu0 }
 0x905   :  { %4771 = vst [vmem:[#allocation16 + $0x18] sm:$0xff] %v4710_v28  ;;  %v4724_v55 = vadd.f32 %v4723_v52, %v4423_v38 }
 0x907   :  { %v4738_v57 = vadd.f32 %v4737_v53, %v4724_v55 }
 0x909   :  { %4772 = vst [vmem:[#allocation16 + $0x20] sm:$0xff] %v4738_v57 }
 0x913   :  { %v4749_v49 = vpop.f32.mrf.mxu1 }
 0x914   :  { %v4750_v62 = vadd.f32 %v4749_v49, %v4424_v61 }
 0x91a   :  { %v4763_v43 = vpop.f32.mrf.mxu2 }
 0x91b   :  { %v4764_v10 = vadd.f32 %v4763_v43, %v4750_v62  ;;  %v4751_v63 = vpop.f32.mrf.mxu1 }
 0x91c   :  { %v4752_v2 = vadd.f32 %v4751_v63, %v4424_v61 }
 0x91d   :  { %4770 = vst [vmem:[#allocation16 + $0x10] sm:$0xff] %v4764_v10 }
 0x922   :  { %v4765_v48 = vpop.f32.mrf.mxu2 }
 0x923   :  { %v4766_v3 = vadd.f32 %v4765_v48, %v4752_v2 }
 0x925   :  { %4773 = vst [vmem:[#allocation16 + $0x28] sm:$0xff] %v4766_v3 }
 0x926   :  { %4786 = dma.vmem_to_hbm [thread:$0]  %s4779_s30, 768, %s4781_s19, [#allocation7], %s8067_s24, %s8067_s24, %s8068_s23  }
 0x927   :  { %8058 = dma.done.wait [#allocation7], 768  }
 0x928   :  { %8059 = vsyncadd [#allocation7], 4294966528 }
 0x929   :  { %8060 = dma.done.wait [#allocation18], 512  }
 0x92a   :  { %8061 = vsyncadd [#allocation18], 4294966784 }
 0x92b   :  { %4825 = vsyncpa [#allocation6], 1 }
 0x92c   :  { %4826 = vsyncpa [#allocation9], 1 }
 0x92d   :  { %4827 = vsyncpa [#allocation12], 1 }
 0x92e   :  { %4828 = vsyncpa [#allocation15], 1 }
 0x92f   :  { %4829 = vsyncpa [#allocation7], 1 }
 0x930   :  { %4830 = vsyncpa [#allocation18], 1 }
 0x931   :  { %4831 = vsyncmov [#allocation4] }
 0x934   :  { %s4832_s29 = vpop.sfrf %4831 }
 0x935   :  { %p6988_p0 = scmp.ne.s32.totalorder %s4832_s29, 0 }
 0x937   :  { %4836 = shalt.err (%p6988_p0)  }
 0x938   :  { %4838 = vsyncmov [#allocation4 + $0x1] }
 0x93b   :  { %s4839_s11 = vpop.sfrf %4838 }
 0x93c   :  { %p6989_p1 = scmp.ne.s32.totalorder %s4839_s11, 0 }
 0x93e   :  { %4843 = shalt.err (%p6989_p1)  }

</bundles_post_ra>
